<compile_context>
chip_gen: v6e
topology: v6e:2x2x1
jax: 0.10.0
libtpu: 0.0.40
codegen_flags: <defaults>
</compile_context>

<pallas_src>
import functools

import jax
import jax.numpy as jnp
from jax import lax
from jax.experimental import pallas as pl
from jax.experimental.pallas import tpu as pltpu

KH = KW = 3            # assumed conv kernel size (see TODO above)
EPS = 1e-5             # PyTorch BatchNorm2d default


@functools.lru_cache(maxsize=None)
def _vmem_limit_bytes():
    """Generation-aware scoped-VMEM limit: ~96 MiB on v5e/v6e (128 MiB
    physical), ~48 MiB on v7x (64 MiB physical); conservative fallback."""
    try:
        cap = int(pltpu.get_tpu_info().vmem_capacity_bytes)
    except Exception:
        cap = 64 * 1024 * 1024
    return int(min(96 * 1024 * 1024, cap * 3 // 4))


def _pick_row_tile(h, w, max_m=2048):
    """Rows per tile so the matmul M dim (= TR*W) is MXU sized: prefer
    multiples of 256 (v6e/v7x), then 128 (v5e), then 8.  Falls back to the
    whole image for awkward H instead of degenerating to TR=1."""
    divisors = [t for t in range(1, h + 1) if h % t == 0]
    fitting = [t for t in divisors if t * w <= max_m] or [1]
    for align in (256, 128, 8):
        cands = [t for t in fitting if (t * w) % align == 0]
        if cands:
            return max(cands)
    return max(fitting)
    # TODO(synk): for H with no good divisor, switch to pl.cdiv grid + masked
    #             tail rows instead of the whole-image fallback.


def _conv_stage_kernel(apply_in_bn_relu, x_ref, sc_ref, sh_ref, w_ref, b_ref,
                       y_ref, stat_ref):
    """One row tile of Conv2d(3x3, pad=1) + bias as a single im2col MXU dot.

    If `apply_in_bn_relu` (static), the previous stage's BatchNorm+ReLU is
    applied on the fly while building the padded tile (stage fusion).  Emits
    the pre-BN conv output plus packed per-tile (sum, sumsq) statistics.
    grid = (batch, row-tiles); both axes are "parallel" (no carried state).
    """
    r = pl.program_id(1)
    n_rt = pl.num_programs(1)
    H, W, Cin = x_ref.shape
    TR, _, Cout = y_ref.shape
    row0 = r * TR

    def norm(rows):                       # f32 math -> bf16 MXU operand
        rows = rows.astype(jnp.float32)
        if apply_in_bn_relu:              # fused BN+ReLU of the previous stage
            rows = jnp.maximum(rows * sc_ref[...] + sh_ref[...], 0.0)
        return rows.astype(jnp.bfloat16)

    # Per-tile haloed rows: clamped reads + masks (no per-image scratch,
    # no serial r==0 pad bubble, footprint proportional to TR).
    interior = norm(x_ref[pl.ds(row0, TR), :, :])                      # (TR,W,Cin)
    top = norm(x_ref[pl.ds(jnp.maximum(row0 - 1, 0), 1), :, :])        # (1,W,Cin)
    bot = norm(x_ref[pl.ds(jnp.minimum(row0 + TR, H - 1), 1), :, :])   # (1,W,Cin)
    zrow = jnp.zeros_like(top)
    top = jnp.where(r > 0, top, zrow)
    bot = jnp.where(r < n_rt - 1, bot, zrow)

    rows = jnp.concatenate([top, interior, bot], axis=0)               # (TR+2,W,Cin)
    zcol = jnp.zeros((TR + 2, 1, Cin), jnp.bfloat16)
    padded = jnp.concatenate([zcol, rows, zcol], axis=1)               # (TR+2,W+2,Cin)

    # im2col: one big bf16 dot with an f32 accumulator instead of 9 K=Cin dots.
    patches = [padded[kh:kh + TR, kw:kw + W, :].reshape(TR * W, Cin)
               for kh in range(KH) for kw in range(KW)]
    im2col = jnp.concatenate(patches, axis=-1)                         # (TR*W, 9*Cin)
    acc = jnp.dot(im2col, w_ref[...], preferred_element_type=jnp.float32)
    acc = acc + b_ref[...]                                             # conv bias (f32)

    y_ref[...] = acc.reshape(TR, W, Cout).astype(y_ref.dtype)

    # Packed per-tile BatchNorm partial statistics (one small store per tile).
    s = jnp.sum(acc, axis=0, keepdims=True)
    q = jnp.sum(acc * acc, axis=0, keepdims=True)
    stat_ref[...] = jnp.concatenate([s, q], axis=0)                    # (2, Cout)


def _conv_stage(x_nhwc, scale_in, shift_in, w2d, b, *, apply_in_bn_relu):
    """One pallas_call: (optional fused BN+ReLU of input) -> conv3x3 + bias,
    returning the pre-BN output and packed per-tile statistics."""
    N, H, W, Cin = x_nhwc.shape
    Cout = w2d.shape[-1]
    TR = _pick_row_tile(H, W)
    HT = H // TR

    kernel = functools.partial(_conv_stage_kernel, apply_in_bn_relu)
    y, stats = pl.pallas_call(
        kernel,
        out_shape=(
            jax.ShapeDtypeStruct((N, H, W, Cout), jnp.float32),
            jax.ShapeDtypeStruct((N, HT, 2, Cout), jnp.float32),
        ),
        grid=(N, HT),
        in_specs=[
            # Whole image per batch index (constant over r -> DMA'd once per
            # image and reused across its row tiles).
            pl.BlockSpec((None, H, W, Cin), lambda n, r: (n, 0, 0, 0)),
            pl.BlockSpec((1, Cin), lambda n, r: (0, 0)),
            pl.BlockSpec((1, Cin), lambda n, r: (0, 0)),
            pl.BlockSpec((KH * KW * Cin, Cout), lambda n, r: (0, 0)),   # bf16 weights
            pl.BlockSpec((1, Cout), lambda n, r: (0, 0)),
        ],
        out_specs=(
            pl.BlockSpec((None, TR, W, Cout), lambda n, r: (n, r, 0, 0)),
            pl.BlockSpec((None, None, 2, Cout), lambda n, r: (n, r, 0, 0)),
        ),
        compiler_params=pltpu.CompilerParams(
            dimension_semantics=("parallel", "parallel"),
            vmem_limit_bytes=_vmem_limit_bytes()),
    )(x_nhwc, scale_in.reshape(1, Cin), shift_in.reshape(1, Cin), w2d,
      b.reshape(1, Cout))
    return y, stats


def _bn_affine(stats, gamma, beta, count):
    """Fold packed per-tile (sum, sumsq) into the global BN affine."""
    s = jnp.sum(stats[:, :, 0, :], axis=(0, 1))
    q = jnp.sum(stats[:, :, 1, :], axis=(0, 1))
    mean = s / count
    var = q / count - mean * mean            # biased (training-mode) variance
    # TODO(synk): one-pass E[x^2]-mean^2 in f32; use a shifted/Welford combine
    #             if |mean| >> std at production scales.
    scale = gamma * lax.rsqrt(var + EPS)
    shift = beta - mean * scale
    return scale, shift


def _bn_relu_kernel(y_ref, sc_ref, sh_ref, o_ref):
    """Final BatchNorm (as a per-channel affine) + ReLU over one row tile."""
    o_ref[...] = jnp.maximum(y_ref[...] * sc_ref[...] + sh_ref[...],
                             0.0).astype(o_ref.dtype)


def _bn_relu(y, scale, shift):
    N, H, W, C = y.shape
    TR = _pick_row_tile(H, W)
    HT = H // TR
    return pl.pallas_call(
        _bn_relu_kernel,
        out_shape=jax.ShapeDtypeStruct((N, H, W, C), jnp.float32),
        grid=(N, HT),
        in_specs=[
            pl.BlockSpec((None, TR, W, C), lambda n, r: (n, r, 0, 0)),
            pl.BlockSpec((1, C), lambda n, r: (0, 0)),
            pl.BlockSpec((1, C), lambda n, r: (0, 0)),
        ],
        out_specs=pl.BlockSpec((None, TR, W, C), lambda n, r: (n, r, 0, 0)),
        compiler_params=pltpu.CompilerParams(
            dimension_semantics=("parallel", "parallel"),
            vmem_limit_bytes=_vmem_limit_bytes()),
    )(y, scale.reshape(1, C), shift.reshape(1, C))


def conv_block_forward(x_nchw, params):
    """Full conv_block forward: (conv3x3 + BN + ReLU) x 2.  NCHW in/out."""
    x = jnp.transpose(x_nchw, (0, 2, 3, 1)).astype(jnp.float32)   # NCHW -> NHWC
    N, H, W, Cin = x.shape
    Cout = params["w1"].shape[-1]
    count = jnp.float32(N * H * W)

    # bf16 MXU operands; weights pre-reshaped to im2col (KH*KW*Cin, Cout) form.
    w1 = params["w1"].astype(jnp.bfloat16).reshape(KH * KW * Cin, Cout)
    w2 = params["w2"].astype(jnp.bfloat16).reshape(KH * KW * Cout, Cout)

    # Stage 1: conv1 + bias1, emitting packed partial BN1 statistics.
    ident_s = jnp.ones((Cin,), jnp.float32)
    ident_b = jnp.zeros((Cin,), jnp.float32)
    y1, st1 = _conv_stage(x, ident_s, ident_b, w1, params["b1"],
                          apply_in_bn_relu=False)
    sc1, sh1 = _bn_affine(st1, params["g1"], params["be1"], count)

    # Stage 2: BN1+ReLU fused into conv2's padded-tile build (the normalized
    # activation never round-trips through HBM), emitting BN2 statistics.
    y2, st2 = _conv_stage(y1, sc1, sh1, w2, params["b2"],
                          apply_in_bn_relu=True)
    sc2, sh2 = _bn_affine(st2, params["g2"], params["be2"], count)

    out = _bn_relu(y2, sc2, sh2)                       # final BN2 + ReLU
    return jnp.transpose(out, (0, 3, 1, 2))            # NHWC -> NCHW


# ---------------------------------------------------------------------------
# Pure-JAX reference (for correctness check only; not the kernel path)
# ---------------------------------------------------------------------------
def _ref_stage(x_nhwc, w, b, gamma, beta):
    y = lax.conv_general_dilated(
        x_nhwc, w, window_strides=(1, 1), padding=((1, 1), (1, 1)),
        dimension_numbers=("NHWC", "HWIO", "NHWC"))
    y = y + b[None, None, None, :]
    mean = jnp.mean(y, axis=(0, 1, 2), keepdims=True)
    var = jnp.mean((y - mean) ** 2, axis=(0, 1, 2), keepdims=True)
    y = (y - mean) * lax.rsqrt(var + EPS)
    y = y * gamma[None, None, None, :] + beta[None, None, None, :]
    return jnp.maximum(y, 0.0)


def conv_block_reference(x_nchw, params):
    x = jnp.transpose(x_nchw, (0, 2, 3, 1))
    y = _ref_stage(x, params["w1"], params["b1"], params["g1"], params["be1"])
    y = _ref_stage(y, params["w2"], params["b2"], params["g2"], params["be2"])
    return jnp.transpose(y, (0, 3, 1, 2))


def init_params(key, in_ch, out_ch):
    k1, k2, k3, k4 = jax.random.split(key, 4)
    return {
        # conv weights in HWIO layout, deterministic init
        "w1": 0.1 * jax.random.normal(k1, (KH, KW, in_ch, out_ch), jnp.float32),
        "b1": 0.05 * jax.random.normal(k2, (out_ch,), jnp.float32),
        "g1": jnp.ones((out_ch,), jnp.float32),     # PyTorch BN default init
        "be1": jnp.zeros((out_ch,), jnp.float32),
        "w2": 0.1 * jax.random.normal(k3, (KH, KW, out_ch, out_ch), jnp.float32),
        "b2": 0.05 * jax.random.normal(k4, (out_ch,), jnp.float32),
        "g2": jnp.ones((out_ch,), jnp.float32),
        "be2": jnp.zeros((out_ch,), jnp.float32),
    }


if __name__ == "__main__":
    key = jax.random.PRNGKey(0)
    kx, kp = jax.random.split(key)

    N, in_ch, out_ch, H, W = 2, 4, 8, 16, 16
    x = jax.random.normal(kx, (N, in_ch, H, W), jnp.float32)    # NCHW input
    params = init_params(kp, in_ch, out_ch)

    fwd = jax.jit(conv_block_forward)
    out = jax.block_until_ready(fwd(x, params))
    ref = jax.block_until_ready(conv_block_reference(x, params))

    assert out.shape == (N, out_ch, H, W), out.shape
    err = float(jnp.max(jnp.abs(out - ref)))
    # bf16 MXU operands (kernel) vs. f32 reference -> ~1e-2-level deviation is
    # expected precision, not a bug (per review); tolerance loosened accordingly.
    assert jnp.allclose(out, ref, atol=3e-2, rtol=3e-2), err
    print("KERNEL_OK")
</pallas_src>

<mosaic_0001>
module attributes {stable_mosaic.version = 11 : i64} {
  func.func @_conv_stage_kernel(%arg0: i32, %arg1: i32, %arg2: memref<1x16x16x4xf32, #tpu.memory_space<vmem>>, %arg3: memref<1x4xf32, #tpu.memory_space<vmem>>, %arg4: memref<1x4xf32, #tpu.memory_space<vmem>>, %arg5: memref<36x8xbf16, #tpu.memory_space<vmem>>, %arg6: memref<1x8xf32, #tpu.memory_space<vmem>>, %arg7: memref<1x16x16x8xf32, #tpu.memory_space<vmem>>, %arg8: memref<1x1x2x8xf32, #tpu.memory_space<vmem>>) attributes {dimension_semantics = [#tpu.dimension_semantics<parallel>, #tpu.dimension_semantics<parallel>], iteration_bounds = array<i64: 2, 1>, scalar_prefetch = 0 : i64, scratch_operands = 0 : i64, tpu.core_type = #tpu.core_type<tc>, window_params = [{transform_indices = @transform_0, window_bounds = array<i64: 1, 16, 16, 4>}, {pipeline_mode = #tpu.pipeline_mode<synchronous>, transform_indices = @transform_1, window_bounds = array<i64: 1, 4>}, {pipeline_mode = #tpu.pipeline_mode<synchronous>, transform_indices = @transform_2, window_bounds = array<i64: 1, 4>}, {pipeline_mode = #tpu.pipeline_mode<synchronous>, transform_indices = @transform_3, window_bounds = array<i64: 36, 8>}, {pipeline_mode = #tpu.pipeline_mode<synchronous>, transform_indices = @transform_4, window_bounds = array<i64: 1, 8>}, {transform_indices = @transform_5, window_bounds = array<i64: 1, 16, 16, 8>}, {transform_indices = @transform_6, window_bounds = array<i64: 1, 1, 2, 8>}]} {
    %c16_i32 = arith.constant 16 : i32
    %0 = arith.muli %arg1, %c16_i32 : i32
    %c0 = arith.constant 0 : index
    %1 = arith.index_cast %0 : i32 to index
    %c0_0 = arith.constant 0 : index
    %c0_1 = arith.constant 0 : index
    %2 = vector.load %arg2[%c0, %1, %c0_0, %c0_1] : memref<1x16x16x4xf32, #tpu.memory_space<vmem>>, vector<1x16x16x4xf32>
    %3 = vector.shape_cast %2 : vector<1x16x16x4xf32> to vector<16x16x4xf32>
    %4 = arith.truncf %3 : vector<16x16x4xf32> to vector<16x16x4xbf16>
    %c1_i32 = arith.constant 1 : i32
    %5 = arith.subi %0, %c1_i32 : i32
    %c0_i32 = arith.constant 0 : i32
    %6 = arith.maxsi %5, %c0_i32 : i32
    %c0_2 = arith.constant 0 : index
    %7 = arith.index_cast %6 : i32 to index
    %c0_3 = arith.constant 0 : index
    %c0_4 = arith.constant 0 : index
    %8 = vector.load %arg2[%c0_2, %7, %c0_3, %c0_4] : memref<1x16x16x4xf32, #tpu.memory_space<vmem>>, vector<1x1x16x4xf32>
    %9 = vector.shape_cast %8 : vector<1x1x16x4xf32> to vector<1x16x4xf32>
    %10 = arith.truncf %9 : vector<1x16x4xf32> to vector<1x16x4xbf16>
    %c16_i32_5 = arith.constant 16 : i32
    %11 = arith.addi %0, %c16_i32_5 : i32
    %c15_i32 = arith.constant 15 : i32
    %12 = arith.minsi %11, %c15_i32 : i32
    %c0_6 = arith.constant 0 : index
    %13 = arith.index_cast %12 : i32 to index
    %c0_7 = arith.constant 0 : index
    %c0_8 = arith.constant 0 : index
    %14 = vector.load %arg2[%c0_6, %13, %c0_7, %c0_8] : memref<1x16x16x4xf32, #tpu.memory_space<vmem>>, vector<1x1x16x4xf32>
    %15 = vector.shape_cast %14 : vector<1x1x16x4xf32> to vector<1x16x4xf32>
    %16 = arith.truncf %15 : vector<1x16x4xf32> to vector<1x16x4xbf16>
    %cst = arith.constant 0.000000e+00 : bf16
    %17 = vector.broadcast %cst : bf16 to vector<1x16x4xbf16>
    %c0_i32_9 = arith.constant 0 : i32
    %18 = arith.cmpi sgt, %arg1, %c0_i32_9 : i32
    %19 = arith.select %18, %10, %17 : vector<1x16x4xbf16>
    %c0_i32_10 = arith.constant 0 : i32
    %20 = arith.cmpi slt, %arg1, %c0_i32_10 : i32
    %21 = arith.select %20, %16, %17 : vector<1x16x4xbf16>
    %22 = tpu.concatenate %19, %4, %21 in 0 : vector<1x16x4xbf16>, vector<16x16x4xbf16>, vector<1x16x4xbf16> -> vector<18x16x4xbf16>
    %cst_11 = arith.constant 0.000000e+00 : bf16
    %23 = vector.broadcast %cst_11 : bf16 to vector<18x1x4xbf16>
    %24 = tpu.concatenate %23, %22, %23 in 1 : vector<18x1x4xbf16>, vector<18x16x4xbf16>, vector<18x1x4xbf16> -> vector<18x18x4xbf16>
    %25 = vector.extract_strided_slice %24 {offsets = [0, 0, 0], sizes = [16, 16, 4], strides = [1, 1, 1]} : vector<18x18x4xbf16> to vector<16x16x4xbf16>
    %26 = vector.shape_cast %25 : vector<16x16x4xbf16> to vector<256x4xbf16>
    %27 = vector.extract_strided_slice %24 {offsets = [0, 1, 0], sizes = [16, 16, 4], strides = [1, 1, 1]} : vector<18x18x4xbf16> to vector<16x16x4xbf16>
    %28 = vector.shape_cast %27 : vector<16x16x4xbf16> to vector<256x4xbf16>
    %29 = vector.extract_strided_slice %24 {offsets = [0, 2, 0], sizes = [16, 16, 4], strides = [1, 1, 1]} : vector<18x18x4xbf16> to vector<16x16x4xbf16>
    %30 = vector.shape_cast %29 : vector<16x16x4xbf16> to vector<256x4xbf16>
    %31 = vector.extract_strided_slice %24 {offsets = [1, 0, 0], sizes = [16, 16, 4], strides = [1, 1, 1]} : vector<18x18x4xbf16> to vector<16x16x4xbf16>
    %32 = vector.shape_cast %31 : vector<16x16x4xbf16> to vector<256x4xbf16>
    %33 = vector.extract_strided_slice %24 {offsets = [1, 1, 0], sizes = [16, 16, 4], strides = [1, 1, 1]} : vector<18x18x4xbf16> to vector<16x16x4xbf16>
    %34 = vector.shape_cast %33 : vector<16x16x4xbf16> to vector<256x4xbf16>
    %35 = vector.extract_strided_slice %24 {offsets = [1, 2, 0], sizes = [16, 16, 4], strides = [1, 1, 1]} : vector<18x18x4xbf16> to vector<16x16x4xbf16>
    %36 = vector.shape_cast %35 : vector<16x16x4xbf16> to vector<256x4xbf16>
    %37 = vector.extract_strided_slice %24 {offsets = [2, 0, 0], sizes = [16, 16, 4], strides = [1, 1, 1]} : vector<18x18x4xbf16> to vector<16x16x4xbf16>
    %38 = vector.shape_cast %37 : vector<16x16x4xbf16> to vector<256x4xbf16>
    %39 = vector.extract_strided_slice %24 {offsets = [2, 1, 0], sizes = [16, 16, 4], strides = [1, 1, 1]} : vector<18x18x4xbf16> to vector<16x16x4xbf16>
    %40 = vector.shape_cast %39 : vector<16x16x4xbf16> to vector<256x4xbf16>
    %41 = vector.extract_strided_slice %24 {offsets = [2, 2, 0], sizes = [16, 16, 4], strides = [1, 1, 1]} : vector<18x18x4xbf16> to vector<16x16x4xbf16>
    %42 = vector.shape_cast %41 : vector<16x16x4xbf16> to vector<256x4xbf16>
    %43 = tpu.concatenate %26, %28, %30, %32, %34, %36, %38, %40, %42 in 1 : vector<256x4xbf16>, vector<256x4xbf16>, vector<256x4xbf16>, vector<256x4xbf16>, vector<256x4xbf16>, vector<256x4xbf16>, vector<256x4xbf16>, vector<256x4xbf16>, vector<256x4xbf16> -> vector<256x36xbf16>
    %c0_12 = arith.constant 0 : index
    %c0_13 = arith.constant 0 : index
    %44 = vector.load %arg5[%c0_12, %c0_13] : memref<36x8xbf16, #tpu.memory_space<vmem>>, vector<36x8xbf16>
    %cst_14 = arith.constant dense<0.000000e+00> : vector<256x8xf32>
    %45 = tpu.matmul %43, %44, %cst_14 {dimension_numbers = #tpu.dot_dimension_numbers<[1], [0], [0], [1], [0, 0, 1, 1], [], []>} : vector<256x36xbf16>, vector<36x8xbf16>, vector<256x8xf32> -> vector<256x8xf32>
    %c0_15 = arith.constant 0 : index
    %c0_16 = arith.constant 0 : index
    %46 = vector.load %arg6[%c0_15, %c0_16] : memref<1x8xf32, #tpu.memory_space<vmem>>, vector<1x8xf32>
    %47 = vector.broadcast %46 : vector<1x8xf32> to vector<256x8xf32>
    %48 = arith.addf %45, %47 : vector<256x8xf32>
    %49 = vector.shape_cast %48 : vector<256x8xf32> to vector<16x16x8xf32>
    %c0_17 = arith.constant 0 : index
    %c0_18 = arith.constant 0 : index
    %c0_19 = arith.constant 0 : index
    %c0_20 = arith.constant 0 : index
    %50 = vector.load %arg7[%c0_17, %c0_18, %c0_19, %c0_20] : memref<1x16x16x8xf32, #tpu.memory_space<vmem>>, vector<1x16x16x8xf32>
    %51 = vector.shape_cast %50 : vector<1x16x16x8xf32> to vector<16x16x8xf32>
    %52 = vector.shape_cast %49 : vector<16x16x8xf32> to vector<1x16x16x8xf32>
    tpu.vector_store %arg7[%c0_17, %c0_18, %c0_19, %c0_20], %52 {strides = array<i32>} : memref<1x16x16x8xf32, #tpu.memory_space<vmem>>, vector<1x16x16x8xf32>,
    %cst_21 = arith.constant dense<0.000000e+00> : vector<8xf32>
    %53 = vector.multi_reduction <add>, %48, %cst_21 [0] : vector<256x8xf32> to vector<8xf32>
    %54 = vector.shape_cast %53 : vector<8xf32> to vector<1x8xf32>
    %55 = arith.mulf %48, %48 : vector<256x8xf32>
    %cst_22 = arith.constant dense<0.000000e+00> : vector<8xf32>
    %56 = vector.multi_reduction <add>, %55, %cst_22 [0] : vector<256x8xf32> to vector<8xf32>
    %57 = vector.shape_cast %56 : vector<8xf32> to vector<1x8xf32>
    %58 = tpu.concatenate %54, %57 in 0 : vector<1x8xf32>, vector<1x8xf32> -> vector<2x8xf32>
    %c0_23 = arith.constant 0 : index
    %c0_24 = arith.constant 0 : index
    %c0_25 = arith.constant 0 : index
    %c0_26 = arith.constant 0 : index
    %59 = vector.load %arg8[%c0_23, %c0_24, %c0_25, %c0_26] : memref<1x1x2x8xf32, #tpu.memory_space<vmem>>, vector<1x1x2x8xf32>
    %60 = vector.shape_cast %59 : vector<1x1x2x8xf32> to vector<2x8xf32>
    %61 = vector.shape_cast %58 : vector<2x8xf32> to vector<1x1x2x8xf32>
    tpu.vector_store %arg8[%c0_23, %c0_24, %c0_25, %c0_26], %61 {strides = array<i32>} : memref<1x1x2x8xf32, #tpu.memory_space<vmem>>, vector<1x1x2x8xf32>,
    return
  }
  func.func @transform_0(%arg0: i32, %arg1: i32) -> (i32, i32, i32, i32) {
    %c0_i32 = arith.constant 0 : i32
    %c0_i32_0 = arith.constant 0 : i32
    %c0_i32_1 = arith.constant 0 : i32
    %c0_i32_2 = arith.constant 0 : i32
    return %arg0, %c0_i32, %c0_i32_0, %c0_i32_1 : i32, i32, i32, i32
  }
  func.func @transform_1(%arg0: i32, %arg1: i32) -> (i32, i32) {
    %c0_i32 = arith.constant 0 : i32
    %c0_i32_0 = arith.constant 0 : i32
    %c0_i32_1 = arith.constant 0 : i32
    return %c0_i32, %c0_i32_0 : i32, i32
  }
  func.func @transform_2(%arg0: i32, %arg1: i32) -> (i32, i32) {
    %c0_i32 = arith.constant 0 : i32
    %c0_i32_0 = arith.constant 0 : i32
    %c0_i32_1 = arith.constant 0 : i32
    return %c0_i32, %c0_i32_0 : i32, i32
  }
  func.func @transform_3(%arg0: i32, %arg1: i32) -> (i32, i32) {
    %c0_i32 = arith.constant 0 : i32
    %c0_i32_0 = arith.constant 0 : i32
    %c0_i32_1 = arith.constant 0 : i32
    return %c0_i32, %c0_i32_0 : i32, i32
  }
  func.func @transform_4(%arg0: i32, %arg1: i32) -> (i32, i32) {
    %c0_i32 = arith.constant 0 : i32
    %c0_i32_0 = arith.constant 0 : i32
    %c0_i32_1 = arith.constant 0 : i32
    return %c0_i32, %c0_i32_0 : i32, i32
  }
  func.func @transform_5(%arg0: i32, %arg1: i32) -> (i32, i32, i32, i32) {
    %c0_i32 = arith.constant 0 : i32
    %c0_i32_0 = arith.constant 0 : i32
    %c0_i32_1 = arith.constant 0 : i32
    return %arg0, %arg1, %c0_i32, %c0_i32_0 : i32, i32, i32, i32
  }
  func.func @transform_6(%arg0: i32, %arg1: i32) -> (i32, i32, i32, i32) {
    %c0_i32 = arith.constant 0 : i32
    %c0_i32_0 = arith.constant 0 : i32
    %c0_i32_1 = arith.constant 0 : i32
    return %arg0, %arg1, %c0_i32, %c0_i32_0 : i32, i32, i32, i32
  }
}

module attributes {stable_mosaic.version = 11 : i64} {
  func.func @_conv_stage_kernel(%arg0: i32, %arg1: i32, %arg2: memref<1x16x16x8xf32, #tpu.memory_space<vmem>>, %arg3: memref<1x8xf32, #tpu.memory_space<vmem>>, %arg4: memref<1x8xf32, #tpu.memory_space<vmem>>, %arg5: memref<72x8xbf16, #tpu.memory_space<vmem>>, %arg6: memref<1x8xf32, #tpu.memory_space<vmem>>, %arg7: memref<1x16x16x8xf32, #tpu.memory_space<vmem>>, %arg8: memref<1x1x2x8xf32, #tpu.memory_space<vmem>>) attributes {dimension_semantics = [#tpu.dimension_semantics<parallel>, #tpu.dimension_semantics<parallel>], iteration_bounds = array<i64: 2, 1>, scalar_prefetch = 0 : i64, scratch_operands = 0 : i64, tpu.core_type = #tpu.core_type<tc>, window_params = [{transform_indices = @transform_0, window_bounds = array<i64: 1, 16, 16, 8>}, {pipeline_mode = #tpu.pipeline_mode<synchronous>, transform_indices = @transform_1, window_bounds = array<i64: 1, 8>}, {pipeline_mode = #tpu.pipeline_mode<synchronous>, transform_indices = @transform_2, window_bounds = array<i64: 1, 8>}, {pipeline_mode = #tpu.pipeline_mode<synchronous>, transform_indices = @transform_3, window_bounds = array<i64: 72, 8>}, {pipeline_mode = #tpu.pipeline_mode<synchronous>, transform_indices = @transform_4, window_bounds = array<i64: 1, 8>}, {transform_indices = @transform_5, window_bounds = array<i64: 1, 16, 16, 8>}, {transform_indices = @transform_6, window_bounds = array<i64: 1, 1, 2, 8>}]} {
    %c16_i32 = arith.constant 16 : i32
    %0 = arith.muli %arg1, %c16_i32 : i32
    %c0 = arith.constant 0 : index
    %1 = arith.index_cast %0 : i32 to index
    %c0_0 = arith.constant 0 : index
    %c0_1 = arith.constant 0 : index
    %2 = vector.load %arg2[%c0, %1, %c0_0, %c0_1] : memref<1x16x16x8xf32, #tpu.memory_space<vmem>>, vector<1x16x16x8xf32>
    %3 = vector.shape_cast %2 : vector<1x16x16x8xf32> to vector<16x16x8xf32>
    %c0_2 = arith.constant 0 : index
    %c0_3 = arith.constant 0 : index
    %4 = vector.load %arg3[%c0_2, %c0_3] : memref<1x8xf32, #tpu.memory_space<vmem>>, vector<1x8xf32>
    %5 = vector.shape_cast %4 : vector<1x8xf32> to vector<1x1x8xf32>
    %6 = vector.broadcast %5 : vector<1x1x8xf32> to vector<16x16x8xf32>
    %7 = arith.mulf %3, %6 : vector<16x16x8xf32>
    %c0_4 = arith.constant 0 : index
    %c0_5 = arith.constant 0 : index
    %8 = vector.load %arg4[%c0_4, %c0_5] : memref<1x8xf32, #tpu.memory_space<vmem>>, vector<1x8xf32>
    %9 = vector.shape_cast %8 : vector<1x8xf32> to vector<1x1x8xf32>
    %10 = vector.broadcast %9 : vector<1x1x8xf32> to vector<16x16x8xf32>
    %11 = arith.addf %7, %10 : vector<16x16x8xf32>
    %cst = arith.constant 0.000000e+00 : f32
    %12 = vector.broadcast %cst : f32 to vector<16x16x8xf32>
    %13 = arith.maximumf %11, %12 : vector<16x16x8xf32>
    %14 = arith.truncf %13 : vector<16x16x8xf32> to vector<16x16x8xbf16>
    %c1_i32 = arith.constant 1 : i32
    %15 = arith.subi %0, %c1_i32 : i32
    %c0_i32 = arith.constant 0 : i32
    %16 = arith.maxsi %15, %c0_i32 : i32
    %c0_6 = arith.constant 0 : index
    %17 = arith.index_cast %16 : i32 to index
    %c0_7 = arith.constant 0 : index
    %c0_8 = arith.constant 0 : index
    %18 = vector.load %arg2[%c0_6, %17, %c0_7, %c0_8] : memref<1x16x16x8xf32, #tpu.memory_space<vmem>>, vector<1x1x16x8xf32>
    %19 = vector.shape_cast %18 : vector<1x1x16x8xf32> to vector<1x16x8xf32>
    %c0_9 = arith.constant 0 : index
    %c0_10 = arith.constant 0 : index
    %20 = vector.load %arg3[%c0_9, %c0_10] : memref<1x8xf32, #tpu.memory_space<vmem>>, vector<1x8xf32>
    %21 = vector.shape_cast %20 : vector<1x8xf32> to vector<1x1x8xf32>
    %22 = vector.broadcast %21 : vector<1x1x8xf32> to vector<1x16x8xf32>
    %23 = arith.mulf %19, %22 : vector<1x16x8xf32>
    %c0_11 = arith.constant 0 : index
    %c0_12 = arith.constant 0 : index
    %24 = vector.load %arg4[%c0_11, %c0_12] : memref<1x8xf32, #tpu.memory_space<vmem>>, vector<1x8xf32>
    %25 = vector.shape_cast %24 : vector<1x8xf32> to vector<1x1x8xf32>
    %26 = vector.broadcast %25 : vector<1x1x8xf32> to vector<1x16x8xf32>
    %27 = arith.addf %23, %26 : vector<1x16x8xf32>
    %cst_13 = arith.constant 0.000000e+00 : f32
    %28 = vector.broadcast %cst_13 : f32 to vector<1x16x8xf32>
    %29 = arith.maximumf %27, %28 : vector<1x16x8xf32>
    %30 = arith.truncf %29 : vector<1x16x8xf32> to vector<1x16x8xbf16>
    %c16_i32_14 = arith.constant 16 : i32
    %31 = arith.addi %0, %c16_i32_14 : i32
    %c15_i32 = arith.constant 15 : i32
    %32 = arith.minsi %31, %c15_i32 : i32
    %c0_15 = arith.constant 0 : index
    %33 = arith.index_cast %32 : i32 to index
    %c0_16 = arith.constant 0 : index
    %c0_17 = arith.constant 0 : index
    %34 = vector.load %arg2[%c0_15, %33, %c0_16, %c0_17] : memref<1x16x16x8xf32, #tpu.memory_space<vmem>>, vector<1x1x16x8xf32>
    %35 = vector.shape_cast %34 : vector<1x1x16x8xf32> to vector<1x16x8xf32>
    %c0_18 = arith.constant 0 : index
    %c0_19 = arith.constant 0 : index
    %36 = vector.load %arg3[%c0_18, %c0_19] : memref<1x8xf32, #tpu.memory_space<vmem>>, vector<1x8xf32>
    %37 = vector.shape_cast %36 : vector<1x8xf32> to vector<1x1x8xf32>
    %38 = vector.broadcast %37 : vector<1x1x8xf32> to vector<1x16x8xf32>
    %39 = arith.mulf %35, %38 : vector<1x16x8xf32>
    %c0_20 = arith.constant 0 : index
    %c0_21 = arith.constant 0 : index
    %40 = vector.load %arg4[%c0_20, %c0_21] : memref<1x8xf32, #tpu.memory_space<vmem>>, vector<1x8xf32>
    %41 = vector.shape_cast %40 : vector<1x8xf32> to vector<1x1x8xf32>
    %42 = vector.broadcast %41 : vector<1x1x8xf32> to vector<1x16x8xf32>
    %43 = arith.addf %39, %42 : vector<1x16x8xf32>
    %cst_22 = arith.constant 0.000000e+00 : f32
    %44 = vector.broadcast %cst_22 : f32 to vector<1x16x8xf32>
    %45 = arith.maximumf %43, %44 : vector<1x16x8xf32>
    %46 = arith.truncf %45 : vector<1x16x8xf32> to vector<1x16x8xbf16>
    %cst_23 = arith.constant 0.000000e+00 : bf16
    %47 = vector.broadcast %cst_23 : bf16 to vector<1x16x8xbf16>
    %c0_i32_24 = arith.constant 0 : i32
    %48 = arith.cmpi sgt, %arg1, %c0_i32_24 : i32
    %49 = arith.select %48, %30, %47 : vector<1x16x8xbf16>
    %c0_i32_25 = arith.constant 0 : i32
    %50 = arith.cmpi slt, %arg1, %c0_i32_25 : i32
    %51 = arith.select %50, %46, %47 : vector<1x16x8xbf16>
    %52 = tpu.concatenate %49, %14, %51 in 0 : vector<1x16x8xbf16>, vector<16x16x8xbf16>, vector<1x16x8xbf16> -> vector<18x16x8xbf16>
    %cst_26 = arith.constant 0.000000e+00 : bf16
    %53 = vector.broadcast %cst_26 : bf16 to vector<18x1x8xbf16>
    %54 = tpu.concatenate %53, %52, %53 in 1 : vector<18x1x8xbf16>, vector<18x16x8xbf16>, vector<18x1x8xbf16> -> vector<18x18x8xbf16>
    %55 = vector.extract_strided_slice %54 {offsets = [0, 0, 0], sizes = [16, 16, 8], strides = [1, 1, 1]} : vector<18x18x8xbf16> to vector<16x16x8xbf16>
    %56 = vector.shape_cast %55 : vector<16x16x8xbf16> to vector<256x8xbf16>
    %57 = vector.extract_strided_slice %54 {offsets = [0, 1, 0], sizes = [16, 16, 8], strides = [1, 1, 1]} : vector<18x18x8xbf16> to vector<16x16x8xbf16>
    %58 = vector.shape_cast %57 : vector<16x16x8xbf16> to vector<256x8xbf16>
    %59 = vector.extract_strided_slice %54 {offsets = [0, 2, 0], sizes = [16, 16, 8], strides = [1, 1, 1]} : vector<18x18x8xbf16> to vector<16x16x8xbf16>
    %60 = vector.shape_cast %59 : vector<16x16x8xbf16> to vector<256x8xbf16>
    %61 = vector.extract_strided_slice %54 {offsets = [1, 0, 0], sizes = [16, 16, 8], strides = [1, 1, 1]} : vector<18x18x8xbf16> to vector<16x16x8xbf16>
    %62 = vector.shape_cast %61 : vector<16x16x8xbf16> to vector<256x8xbf16>
    %63 = vector.extract_strided_slice %54 {offsets = [1, 1, 0], sizes = [16, 16, 8], strides = [1, 1, 1]} : vector<18x18x8xbf16> to vector<16x16x8xbf16>
    %64 = vector.shape_cast %63 : vector<16x16x8xbf16> to vector<256x8xbf16>
    %65 = vector.extract_strided_slice %54 {offsets = [1, 2, 0], sizes = [16, 16, 8], strides = [1, 1, 1]} : vector<18x18x8xbf16> to vector<16x16x8xbf16>
    %66 = vector.shape_cast %65 : vector<16x16x8xbf16> to vector<256x8xbf16>
    %67 = vector.extract_strided_slice %54 {offsets = [2, 0, 0], sizes = [16, 16, 8], strides = [1, 1, 1]} : vector<18x18x8xbf16> to vector<16x16x8xbf16>
    %68 = vector.shape_cast %67 : vector<16x16x8xbf16> to vector<256x8xbf16>
    %69 = vector.extract_strided_slice %54 {offsets = [2, 1, 0], sizes = [16, 16, 8], strides = [1, 1, 1]} : vector<18x18x8xbf16> to vector<16x16x8xbf16>
    %70 = vector.shape_cast %69 : vector<16x16x8xbf16> to vector<256x8xbf16>
    %71 = vector.extract_strided_slice %54 {offsets = [2, 2, 0], sizes = [16, 16, 8], strides = [1, 1, 1]} : vector<18x18x8xbf16> to vector<16x16x8xbf16>
    %72 = vector.shape_cast %71 : vector<16x16x8xbf16> to vector<256x8xbf16>
    %73 = tpu.concatenate %56, %58, %60, %62, %64, %66, %68, %70, %72 in 1 : vector<256x8xbf16>, vector<256x8xbf16>, vector<256x8xbf16>, vector<256x8xbf16>, vector<256x8xbf16>, vector<256x8xbf16>, vector<256x8xbf16>, vector<256x8xbf16>, vector<256x8xbf16> -> vector<256x72xbf16>
    %c0_27 = arith.constant 0 : index
    %c0_28 = arith.constant 0 : index
    %74 = vector.load %arg5[%c0_27, %c0_28] : memref<72x8xbf16, #tpu.memory_space<vmem>>, vector<72x8xbf16>
    %cst_29 = arith.constant dense<0.000000e+00> : vector<256x8xf32>
    %75 = tpu.matmul %73, %74, %cst_29 {dimension_numbers = #tpu.dot_dimension_numbers<[1], [0], [0], [1], [0, 0, 1, 1], [], []>} : vector<256x72xbf16>, vector<72x8xbf16>, vector<256x8xf32> -> vector<256x8xf32>
    %c0_30 = arith.constant 0 : index
    %c0_31 = arith.constant 0 : index
    %76 = vector.load %arg6[%c0_30, %c0_31] : memref<1x8xf32, #tpu.memory_space<vmem>>, vector<1x8xf32>
    %77 = vector.broadcast %76 : vector<1x8xf32> to vector<256x8xf32>
    %78 = arith.addf %75, %77 : vector<256x8xf32>
    %79 = vector.shape_cast %78 : vector<256x8xf32> to vector<16x16x8xf32>
    %c0_32 = arith.constant 0 : index
    %c0_33 = arith.constant 0 : index
    %c0_34 = arith.constant 0 : index
    %c0_35 = arith.constant 0 : index
    %80 = vector.load %arg7[%c0_32, %c0_33, %c0_34, %c0_35] : memref<1x16x16x8xf32, #tpu.memory_space<vmem>>, vector<1x16x16x8xf32>
    %81 = vector.shape_cast %80 : vector<1x16x16x8xf32> to vector<16x16x8xf32>
    %82 = vector.shape_cast %79 : vector<16x16x8xf32> to vector<1x16x16x8xf32>
    tpu.vector_store %arg7[%c0_32, %c0_33, %c0_34, %c0_35], %82 {strides = array<i32>} : memref<1x16x16x8xf32, #tpu.memory_space<vmem>>, vector<1x16x16x8xf32>,
    %cst_36 = arith.constant dense<0.000000e+00> : vector<8xf32>
    %83 = vector.multi_reduction <add>, %78, %cst_36 [0] : vector<256x8xf32> to vector<8xf32>
    %84 = vector.shape_cast %83 : vector<8xf32> to vector<1x8xf32>
    %85 = arith.mulf %78, %78 : vector<256x8xf32>
    %cst_37 = arith.constant dense<0.000000e+00> : vector<8xf32>
    %86 = vector.multi_reduction <add>, %85, %cst_37 [0] : vector<256x8xf32> to vector<8xf32>
    %87 = vector.shape_cast %86 : vector<8xf32> to vector<1x8xf32>
    %88 = tpu.concatenate %84, %87 in 0 : vector<1x8xf32>, vector<1x8xf32> -> vector<2x8xf32>
    %c0_38 = arith.constant 0 : index
    %c0_39 = arith.constant 0 : index
    %c0_40 = arith.constant 0 : index
    %c0_41 = arith.constant 0 : index
    %89 = vector.load %arg8[%c0_38, %c0_39, %c0_40, %c0_41] : memref<1x1x2x8xf32, #tpu.memory_space<vmem>>, vector<1x1x2x8xf32>
    %90 = vector.shape_cast %89 : vector<1x1x2x8xf32> to vector<2x8xf32>
    %91 = vector.shape_cast %88 : vector<2x8xf32> to vector<1x1x2x8xf32>
    tpu.vector_store %arg8[%c0_38, %c0_39, %c0_40, %c0_41], %91 {strides = array<i32>} : memref<1x1x2x8xf32, #tpu.memory_space<vmem>>, vector<1x1x2x8xf32>,
    return
  }
  func.func @transform_0(%arg0: i32, %arg1: i32) -> (i32, i32, i32, i32) {
    %c0_i32 = arith.constant 0 : i32
    %c0_i32_0 = arith.constant 0 : i32
    %c0_i32_1 = arith.constant 0 : i32
    %c0_i32_2 = arith.constant 0 : i32
    return %arg0, %c0_i32, %c0_i32_0, %c0_i32_1 : i32, i32, i32, i32
  }
  func.func @transform_1(%arg0: i32, %arg1: i32) -> (i32, i32) {
    %c0_i32 = arith.constant 0 : i32
    %c0_i32_0 = arith.constant 0 : i32
    %c0_i32_1 = arith.constant 0 : i32
    return %c0_i32, %c0_i32_0 : i32, i32
  }
  func.func @transform_2(%arg0: i32, %arg1: i32) -> (i32, i32) {
    %c0_i32 = arith.constant 0 : i32
    %c0_i32_0 = arith.constant 0 : i32
    %c0_i32_1 = arith.constant 0 : i32
    return %c0_i32, %c0_i32_0 : i32, i32
  }
  func.func @transform_3(%arg0: i32, %arg1: i32) -> (i32, i32) {
    %c0_i32 = arith.constant 0 : i32
    %c0_i32_0 = arith.constant 0 : i32
    %c0_i32_1 = arith.constant 0 : i32
    return %c0_i32, %c0_i32_0 : i32, i32
  }
  func.func @transform_4(%arg0: i32, %arg1: i32) -> (i32, i32) {
    %c0_i32 = arith.constant 0 : i32
    %c0_i32_0 = arith.constant 0 : i32
    %c0_i32_1 = arith.constant 0 : i32
    return %c0_i32, %c0_i32_0 : i32, i32
  }
  func.func @transform_5(%arg0: i32, %arg1: i32) -> (i32, i32, i32, i32) {
    %c0_i32 = arith.constant 0 : i32
    %c0_i32_0 = arith.constant 0 : i32
    %c0_i32_1 = arith.constant 0 : i32
    return %arg0, %arg1, %c0_i32, %c0_i32_0 : i32, i32, i32, i32
  }
  func.func @transform_6(%arg0: i32, %arg1: i32) -> (i32, i32, i32, i32) {
    %c0_i32 = arith.constant 0 : i32
    %c0_i32_0 = arith.constant 0 : i32
    %c0_i32_1 = arith.constant 0 : i32
    return %arg0, %arg1, %c0_i32, %c0_i32_0 : i32, i32, i32, i32
  }
}

module attributes {stable_mosaic.version = 11 : i64} {
  func.func @_bn_relu_kernel(%arg0: i32, %arg1: i32, %arg2: memref<1x16x16x8xf32, #tpu.memory_space<vmem>>, %arg3: memref<1x8xf32, #tpu.memory_space<vmem>>, %arg4: memref<1x8xf32, #tpu.memory_space<vmem>>, %arg5: memref<1x16x16x8xf32, #tpu.memory_space<vmem>>) attributes {dimension_semantics = [#tpu.dimension_semantics<parallel>, #tpu.dimension_semantics<parallel>], iteration_bounds = array<i64: 2, 1>, scalar_prefetch = 0 : i64, scratch_operands = 0 : i64, tpu.core_type = #tpu.core_type<tc>, window_params = [{transform_indices = @transform_0, window_bounds = array<i64: 1, 16, 16, 8>}, {pipeline_mode = #tpu.pipeline_mode<synchronous>, transform_indices = @transform_1, window_bounds = array<i64: 1, 8>}, {pipeline_mode = #tpu.pipeline_mode<synchronous>, transform_indices = @transform_2, window_bounds = array<i64: 1, 8>}, {transform_indices = @transform_3, window_bounds = array<i64: 1, 16, 16, 8>}]} {
    %c0 = arith.constant 0 : index
    %c0_0 = arith.constant 0 : index
    %c0_1 = arith.constant 0 : index
    %c0_2 = arith.constant 0 : index
    %0 = vector.load %arg2[%c0, %c0_0, %c0_1, %c0_2] : memref<1x16x16x8xf32, #tpu.memory_space<vmem>>, vector<1x16x16x8xf32>
    %1 = vector.shape_cast %0 : vector<1x16x16x8xf32> to vector<16x16x8xf32>
    %c0_3 = arith.constant 0 : index
    %c0_4 = arith.constant 0 : index
    %2 = vector.load %arg3[%c0_3, %c0_4] : memref<1x8xf32, #tpu.memory_space<vmem>>, vector<1x8xf32>
    %3 = vector.shape_cast %2 : vector<1x8xf32> to vector<1x1x8xf32>
    %4 = vector.broadcast %3 : vector<1x1x8xf32> to vector<16x16x8xf32>
    %5 = arith.mulf %1, %4 : vector<16x16x8xf32>
    %c0_5 = arith.constant 0 : index
    %c0_6 = arith.constant 0 : index
    %6 = vector.load %arg4[%c0_5, %c0_6] : memref<1x8xf32, #tpu.memory_space<vmem>>, vector<1x8xf32>
    %7 = vector.shape_cast %6 : vector<1x8xf32> to vector<1x1x8xf32>
    %8 = vector.broadcast %7 : vector<1x1x8xf32> to vector<16x16x8xf32>
    %9 = arith.addf %5, %8 : vector<16x16x8xf32>
    %cst = arith.constant 0.000000e+00 : f32
    %10 = vector.broadcast %cst : f32 to vector<16x16x8xf32>
    %11 = arith.maximumf %9, %10 : vector<16x16x8xf32>
    %c0_7 = arith.constant 0 : index
    %c0_8 = arith.constant 0 : index
    %c0_9 = arith.constant 0 : index
    %c0_10 = arith.constant 0 : index
    %12 = vector.load %arg5[%c0_7, %c0_8, %c0_9, %c0_10] : memref<1x16x16x8xf32, #tpu.memory_space<vmem>>, vector<1x16x16x8xf32>
    %13 = vector.shape_cast %12 : vector<1x16x16x8xf32> to vector<16x16x8xf32>
    %14 = vector.shape_cast %11 : vector<16x16x8xf32> to vector<1x16x16x8xf32>
    tpu.vector_store %arg5[%c0_7, %c0_8, %c0_9, %c0_10], %14 {strides = array<i32>} : memref<1x16x16x8xf32, #tpu.memory_space<vmem>>, vector<1x16x16x8xf32>,
    return
  }
  func.func @transform_0(%arg0: i32, %arg1: i32) -> (i32, i32, i32, i32) {
    %c0_i32 = arith.constant 0 : i32
    %c0_i32_0 = arith.constant 0 : i32
    %c0_i32_1 = arith.constant 0 : i32
    return %arg0, %arg1, %c0_i32, %c0_i32_0 : i32, i32, i32, i32
  }
  func.func @transform_1(%arg0: i32, %arg1: i32) -> (i32, i32) {
    %c0_i32 = arith.constant 0 : i32
    %c0_i32_0 = arith.constant 0 : i32
    %c0_i32_1 = arith.constant 0 : i32
    return %c0_i32, %c0_i32_0 : i32, i32
  }
  func.func @transform_2(%arg0: i32, %arg1: i32) -> (i32, i32) {
    %c0_i32 = arith.constant 0 : i32
    %c0_i32_0 = arith.constant 0 : i32
    %c0_i32_1 = arith.constant 0 : i32
    return %c0_i32, %c0_i32_0 : i32, i32
  }
  func.func @transform_3(%arg0: i32, %arg1: i32) -> (i32, i32, i32, i32) {
    %c0_i32 = arith.constant 0 : i32
    %c0_i32_0 = arith.constant 0 : i32
    %c0_i32_1 = arith.constant 0 : i32
    return %arg0, %arg1, %c0_i32, %c0_i32_0 : i32, i32, i32, i32
  }
}

</mosaic_0001>

<bundles_post_ra>
// kernel: conv_block_forward.5
= control target key start
LH: loop header
LB: loop body
LE: loop exit
PB: predicated region body
PF: predicated region fallthrough
CT: control target
= control target key end

     0   :  { %s569_s12 = smov 0   ;;  %s571_s13 = smov 0   ;;  %s776_s0 = inlined_call_operand.vmem [shape: f32[2,16,16,8], index: 0, kind: input, shape index: {}]   ;;  %s777_s1 = inlined_call_operand.vmem [shape: f32[1,8], index: 1, kind: input, shape index: {}]   ;;  %s778_s2 = inlined_call_operand.vmem [shape: f32[1,8], index: 2, kind: input, shape index: {}]   ;;  %s779_s3 = inlined_call_operand.vmem [shape: f32[2,16,16,8], index: 3, kind: output, shape index: {}]  }
   0x1   :  { %s573_s14 = smov 0  }
   0x2 LB: > { %s25_s15 = sadd.s32 1, %s543_s13  ;;  %p490_p0 = scmp.ge.s32.totalorder %s547_s14, 1  ;;  %s547_s14 = sphi %s573_s14, %s13_s14   ;;  %s543_s13 = sphi %s571_s13, %s781_s13   ;;  %s539_s12 = sphi %s569_s12, %s780_s12  }
   0x3   : > { %p27_p1 = scmp.ge.s32.totalorder %s25_s15, 2  ;;  %p159_p2 = scmp.lt.s32.totalorder %s547_s14, 3 }
   0x5   : > { %s783_s15 = smov (%p27_p1, %s25_s15), 0  ;;  %p160_p3 = pnand %p490_p0, %p159_p2 }
   0x6   : > { %p194_p4 = scmp.lt.s32.totalorder (!%p160_p3), %s539_s12, 1 }
   0x7   : > { %163 = sbr.rel (%p160_p3) target bundleno = 45 (0x2d), region = 32 }
   0xc   : > { %s785_s12 = smov (!%p194_p4, %s539_s12), 1  ;;  %v590_v0 = vld [vmem:[%s777_s1] ss:$0 sm:$0xff]  ;;  %vm357_vm0 = vcmask 64512  }
   0xd   : > { %s499_s16 = sshll.u32 %s785_s12, 8  ;;  %v600_v1 = vld [vmem:[%s778_s2] ss:$0 sm:$0xff] }
   0xe   : > { %s595_s21 = scalar_lea.vmem %s776_s0, %s499_s16  ;;  %s623_s26 = scalar_lea.vmem %s779_s3, %s499_s16 }
   0xf   : > { %v215_v2 = vld [vmem:[%s595_s21] sm:$0xff]  ;;  %v216_v3 = vld [vmem:[%s595_s21 + $0x8] sm:$0xff]  ;;  %v217_v4 = vld [vmem:[%s595_s21 + $0x10] sm:$0xff] }
  0x10   : > { %v254_v5 = vmul.f32 %v590_v0, %v215_v2  ;;  %v255_v6 = vmul.f32 %v590_v0, %v216_v3  ;;  %v256_v7 = vmul.f32 %v590_v0, %v217_v4  ;;  %v218_v8 = vld [vmem:[%s595_s21 + $0x18] sm:$0xff]  ;;  %v219_v9 = vld [vmem:[%s595_s21 + $0x20] sm:$0xff]  ;;  %v220_v10 = vld [vmem:[%s595_s21 + $0x28] sm:$0xff] }
  0x11   : > { %v257_v11 = vmul.f32 %v590_v0, %v218_v8  ;;  %v258_v12 = vmul.f32 %v590_v0, %v219_v9  ;;  %v259_v13 = vmul.f32 %v590_v0, %v220_v10  ;;  %v221_v14 = vld [vmem:[%s595_s21 + $0x30] sm:$0xff]  ;;  %v222_v15 = vld [vmem:[%s595_s21 + $0x38] sm:$0xff]  ;;  %v223_v24 = vld [vmem:[%s595_s21 + $0x40] sm:$0xff] }
  0x12   : > { %v293_v16 = vadd.f32 %v600_v1, %v254_v5  ;;  %v294_v17 = vadd.f32 %v600_v1, %v255_v6  ;;  %v295_v18 = vadd.f32 %v600_v1, %v256_v7  ;;  %v260_v19 = vmul.f32 %v590_v0, %v221_v14  ;;  %v224_v25 = vld [vmem:[%s595_s21 + $0x48] sm:$0xff]  ;;  %v225_v26 = vld [vmem:[%s595_s21 + $0x50] sm:$0xff]  ;;  %v226_v31 = vld [vmem:[%s595_s21 + $0x58] sm:$0xff] }
  0x13   : > { %v296_v20 = vadd.f32 %v600_v1, %v257_v11  ;;  %v297_v21 = vadd.f32 %v600_v1, %v258_v12  ;;  %v298_v22 = vadd.f32 %v600_v1, %v259_v13  ;;  %v261_v23 = vmul.f32 %v590_v0, %v222_v15  ;;  %v227_v32 = vld [vmem:[%s595_s21 + $0x60] sm:$0xff]  ;;  %v228_v33 = vld [vmem:[%s595_s21 + $0x68] sm:$0xff]  ;;  %v229_v38 = vld [vmem:[%s595_s21 + $0x70] sm:$0xff] }
  0x14   : > { %v325_v27 = vmax.f32 %v293_v16, 0.0  ;;  %v326_v28 = vmax.f32 %v294_v17, 0.0  ;;  %v327_v29 = vmax.f32 %v295_v18, 0.0  ;;  %v299_v30 = vadd.f32 %v600_v1, %v260_v19  ;;  %v230_v43 = vld [vmem:[%s595_s21 + $0x78] sm:$0xff]  ;;  %v231_v56 = vld [vmem:[%s595_s21 + $0x80] sm:$0xff]  ;;  %v232_v57 = vld [vmem:[%s595_s21 + $0x88] sm:$0xff] }
  0x15   : > { %v328_v34 = vmax.f32 %v296_v20, 0.0  ;;  %v329_v35 = vmax.f32 %v297_v21, 0.0  ;;  %v330_v36 = vmax.f32 %v298_v22, 0.0  ;;  %v300_v37 = vadd.f32 %v600_v1, %v261_v23  ;;  %v233_v58 = vld [vmem:[%s595_s21 + $0x90] sm:$0xff]  ;;  %v234_v63 = vld [vmem:[%s595_s21 + $0x98] sm:$0xff]  ;;  %v235_v2 = vld [vmem:[%s595_s21 + $0xa0] sm:$0xff] }
  0x16   : > { %358 = vst.msk [vmem:[%s623_s26] sm:$0xff] %vm357_vm0, %v325_v27  ;;  %359 = vst.msk [vmem:[%s623_s26 + $0x8] sm:$0xff] %vm357_vm0, %v326_v28  ;;  %v331_v39 = vmax.f32 %v299_v30, 0.0  ;;  %v262_v40 = vmul.f32 %v590_v0, %v223_v24  ;;  %v263_v41 = vmul.f32 %v590_v0, %v224_v25  ;;  %v264_v42 = vmul.f32 %v590_v0, %v225_v26  ;;  %v236_v3 = vld [vmem:[%s595_s21 + $0xa8] sm:$0xff]  ;;  %v237_v8 = vld [vmem:[%s595_s21 + $0xb0] sm:$0xff] }
  0x17   : > { %360 = vst.msk [vmem:[%s623_s26 + $0x10] sm:$0xff] %vm357_vm0, %v327_v29  ;;  %361 = vst.msk [vmem:[%s623_s26 + $0x18] sm:$0xff] %vm357_vm0, %v328_v34  ;;  %v332_v44 = vmax.f32 %v300_v37, 0.0  ;;  %v265_v45 = vmul.f32 %v590_v0, %v226_v31  ;;  %v266_v46 = vmul.f32 %v590_v0, %v227_v32  ;;  %v267_v47 = vmul.f32 %v590_v0, %v228_v33  ;;  %v238_v13 = vld [vmem:[%s595_s21 + $0xb8] sm:$0xff]  ;;  %v239_v26 = vld [vmem:[%s595_s21 + $0xc0] sm:$0xff] }
  0x18   : > { %362 = vst.msk [vmem:[%s623_s26 + $0x20] sm:$0xff] %vm357_vm0, %v329_v35  ;;  %363 = vst.msk [vmem:[%s623_s26 + $0x28] sm:$0xff] %vm357_vm0, %v330_v36  ;;  %v301_v48 = vadd.f32 %v600_v1, %v262_v40  ;;  %v302_v49 = vadd.f32 %v600_v1, %v263_v41  ;;  %v303_v50 = vadd.f32 %v600_v1, %v264_v42  ;;  %v240_v27 = vld [vmem:[%s595_s21 + $0xc8] sm:$0xff]  ;;  %v241_v28 = vld [vmem:[%s595_s21 + $0xd0] sm:$0xff] }
  0x19   : > { %364 = vst.msk [vmem:[%s623_s26 + $0x30] sm:$0xff] %vm357_vm0, %v331_v39  ;;  %v268_v51 = vmul.f32 %v590_v0, %v229_v38  ;;  %365 = vst.msk [vmem:[%s623_s26 + $0x38] sm:$0xff] %vm357_vm0, %v332_v44  ;;  %v304_v52 = vadd.f32 %v600_v1, %v265_v45  ;;  %v305_v53 = vadd.f32 %v600_v1, %v266_v46  ;;  %v242_v33 = vld [vmem:[%s595_s21 + $0xd8] sm:$0xff]  ;;  %v243_v34 = vld [vmem:[%s595_s21 + $0xe0] sm:$0xff] }
  0x1a   : > { %v306_v54 = vadd.f32 %v600_v1, %v267_v47  ;;  %v269_v55 = vmul.f32 %v590_v0, %v230_v43  ;;  %v333_v59 = vmax.f32 %v301_v48, 0.0  ;;  %v334_v60 = vmax.f32 %v302_v49, 0.0  ;;  %v244_v35 = vld [vmem:[%s595_s21 + $0xe8] sm:$0xff]  ;;  %v245_v40 = vld [vmem:[%s595_s21 + $0xf0] sm:$0xff]  ;;  %v246_v45 = vld [vmem:[%s595_s21 + $0xf8] sm:$0xff] }
  0x1b   : > { %v335_v61 = vmax.f32 %v303_v50, 0.0  ;;  %v307_v62 = vadd.f32 %v600_v1, %v268_v51  ;;  %v336_v4 = vmax.f32 %v304_v52, 0.0  ;;  %v337_v5 = vmax.f32 %v305_v53, 0.0 }
  0x1c   : > { %v338_v6 = vmax.f32 %v306_v54, 0.0  ;;  %v308_v7 = vadd.f32 %v600_v1, %v269_v55  ;;  %366 = vst.msk [vmem:[%s623_s26 + $0x40] sm:$0xff] %vm357_vm0, %v333_v59  ;;  %367 = vst.msk [vmem:[%s623_s26 + $0x48] sm:$0xff] %vm357_vm0, %v334_v60  ;;  %v270_v10 = vmul.f32 %v590_v0, %v231_v56  ;;  %v271_v11 = vmul.f32 %v590_v0, %v232_v57 }
  0x1d   : > { %368 = vst.msk [vmem:[%s623_s26 + $0x50] sm:$0xff] %vm357_vm0, %v335_v61  ;;  %v339_v9 = vmax.f32 %v307_v62, 0.0  ;;  %v272_v12 = vmul.f32 %v590_v0, %v233_v58  ;;  %369 = vst.msk [vmem:[%s623_s26 + $0x58] sm:$0xff] %vm357_vm0, %v336_v4  ;;  %v273_v15 = vmul.f32 %v590_v0, %v234_v63  ;;  %v274_v16 = vmul.f32 %v590_v0, %v235_v2 }
  0x1e   : > { %370 = vst.msk [vmem:[%s623_s26 + $0x60] sm:$0xff] %vm357_vm0, %v337_v5  ;;  %371 = vst.msk [vmem:[%s623_s26 + $0x68] sm:$0xff] %vm357_vm0, %v338_v6  ;;  %v340_v14 = vmax.f32 %v308_v7, 0.0  ;;  %v275_v17 = vmul.f32 %v590_v0, %v236_v3  ;;  %v309_v18 = vadd.f32 %v600_v1, %v270_v10  ;;  %v310_v19 = vadd.f32 %v600_v1, %v271_v11 }
  0x1f   : > { %372 = vst.msk [vmem:[%s623_s26 + $0x70] sm:$0xff] %vm357_vm0, %v339_v9  ;;  %v311_v20 = vadd.f32 %v600_v1, %v272_v12  ;;  %v276_v21 = vmul.f32 %v590_v0, %v237_v8  ;;  %v312_v22 = vadd.f32 %v600_v1, %v273_v15  ;;  %v313_v23 = vadd.f32 %v600_v1, %v274_v16 }
  0x20   : > { %373 = vst.msk [vmem:[%s623_s26 + $0x78] sm:$0xff] %vm357_vm0, %v340_v14  ;;  %v314_v24 = vadd.f32 %v600_v1, %v275_v17  ;;  %v277_v25 = vmul.f32 %v590_v0, %v238_v13  ;;  %v341_v29 = vmax.f32 %v309_v18, 0.0  ;;  %v342_v30 = vmax.f32 %v310_v19, 0.0 }
  0x21   : > { %v343_v31 = vmax.f32 %v311_v20, 0.0  ;;  %v315_v32 = vadd.f32 %v600_v1, %v276_v21  ;;  %v344_v36 = vmax.f32 %v312_v22, 0.0  ;;  %v345_v37 = vmax.f32 %v313_v23, 0.0 }
  0x22   : > { %v346_v38 = vmax.f32 %v314_v24, 0.0  ;;  %v316_v39 = vadd.f32 %v600_v1, %v277_v25  ;;  %374 = vst.msk [vmem:[%s623_s26 + $0x80] sm:$0xff] %vm357_vm0, %v341_v29  ;;  %375 = vst.msk [vmem:[%s623_s26 + $0x88] sm:$0xff] %vm357_vm0, %v342_v30  ;;  %v278_v42 = vmul.f32 %v590_v0, %v239_v26  ;;  %v279_v43 = vmul.f32 %v590_v0, %v240_v27 }
  0x23   : > { %376 = vst.msk [vmem:[%s623_s26 + $0x90] sm:$0xff] %vm357_vm0, %v343_v31  ;;  %v347_v41 = vmax.f32 %v315_v32, 0.0  ;;  %v280_v44 = vmul.f32 %v590_v0, %v241_v28  ;;  %377 = vst.msk [vmem:[%s623_s26 + $0x98] sm:$0xff] %vm357_vm0, %v344_v36  ;;  %v281_v47 = vmul.f32 %v590_v0, %v242_v33  ;;  %v282_v48 = vmul.f32 %v590_v0, %v243_v34 }
  0x24   : > { %378 = vst.msk [vmem:[%s623_s26 + $0xa0] sm:$0xff] %vm357_vm0, %v345_v37  ;;  %379 = vst.msk [vmem:[%s623_s26 + $0xa8] sm:$0xff] %vm357_vm0, %v346_v38  ;;  %v348_v46 = vmax.f32 %v316_v39, 0.0  ;;  %v283_v49 = vmul.f32 %v590_v0, %v244_v35  ;;  %v317_v50 = vadd.f32 %v600_v1, %v278_v42  ;;  %v318_v51 = vadd.f32 %v600_v1, %v279_v43 }
  0x25   : > { %380 = vst.msk [vmem:[%s623_s26 + $0xb0] sm:$0xff] %vm357_vm0, %v347_v41  ;;  %v319_v52 = vadd.f32 %v600_v1, %v280_v44  ;;  %v284_v53 = vmul.f32 %v590_v0, %v245_v40  ;;  %v320_v54 = vadd.f32 %v600_v1, %v281_v47  ;;  %v321_v55 = vadd.f32 %v600_v1, %v282_v48 }
  0x26   : > { %381 = vst.msk [vmem:[%s623_s26 + $0xb8] sm:$0xff] %vm357_vm0, %v348_v46  ;;  %v322_v56 = vadd.f32 %v600_v1, %v283_v49  ;;  %v285_v57 = vmul.f32 %v590_v0, %v246_v45  ;;  %v349_v58 = vmax.f32 %v317_v50, 0.0  ;;  %v350_v59 = vmax.f32 %v318_v51, 0.0 }
  0x27   : > { %v351_v60 = vmax.f32 %v319_v52, 0.0  ;;  %v323_v61 = vadd.f32 %v600_v1, %v284_v53  ;;  %v352_v62 = vmax.f32 %v320_v54, 0.0  ;;  %v353_v63 = vmax.f32 %v321_v55, 0.0 }
  0x28   : > { %v354_v2 = vmax.f32 %v322_v56, 0.0  ;;  %v324_v3 = vadd.f32 %v600_v1, %v285_v57  ;;  %382 = vst.msk [vmem:[%s623_s26 + $0xc0] sm:$0xff] %vm357_vm0, %v349_v58  ;;  %383 = vst.msk [vmem:[%s623_s26 + $0xc8] sm:$0xff] %vm357_vm0, %v350_v59 }
  0x29   : > { %384 = vst.msk [vmem:[%s623_s26 + $0xd0] sm:$0xff] %vm357_vm0, %v351_v60  ;;  %v355_v4 = vmax.f32 %v323_v61, 0.0  ;;  %385 = vst.msk [vmem:[%s623_s26 + $0xd8] sm:$0xff] %vm357_vm0, %v352_v62 }
  0x2a   : > { %386 = vst.msk [vmem:[%s623_s26 + $0xe0] sm:$0xff] %vm357_vm0, %v353_v63  ;;  %387 = vst.msk [vmem:[%s623_s26 + $0xe8] sm:$0xff] %vm357_vm0, %v354_v2  ;;  %v356_v0 = vmax.f32 %v324_v3, 0.0 }
  0x2b   : > { %388 = vst.msk [vmem:[%s623_s26 + $0xf0] sm:$0xff] %vm357_vm0, %v355_v4 }
  0x2c   : > { %389 = vst.msk [vmem:[%s623_s26 + $0xf8] sm:$0xff] %vm357_vm0, %v356_v0 }
  0x2d PF: > { %s13_s14 = sadd.s32 1, %s547_s14   ;;  %s780_s12 = smov %s543_s13 }
  0x2e   : > { %p10_p5 = scmp.ge.s32.totalorder %s13_s14, 4   ;;  %s781_s13 = smov %s783_s15 }
  0x30   :  { %12 = sbr.rel (!%p10_p5) target bundleno = 2 (0x2), region = 62 }

// kernel: conv_block_forward.4
= control target key start
LH: loop header
LB: loop body
LE: loop exit
PB: predicated region body
PF: predicated region fallthrough
CT: control target
= control target key end

     0   :  { %s2329_s21 = smov 0   ;;  %s2331_s22 = smov 0   ;;  %s3295_s0 = inlined_call_operand.vmem [shape: f32[2,16,16,8], index: 0, kind: input, shape index: {}]   ;;  %s3296_s1 = inlined_call_operand.vmem [shape: f32[1,8], index: 1, kind: input, shape index: {}]   ;;  %s3297_s2 = inlined_call_operand.vmem [shape: f32[1,8], index: 2, kind: input, shape index: {}]   ;;  %s3298_s3 = inlined_call_operand.vmem [shape: bf16[72,8], index: 3, kind: input, shape index: {}]   ;;  %s3299_s4 = inlined_call_operand.vmem [shape: f32[1,8], index: 4, kind: input, shape index: {}]   ;;  %s3300_s5 = inlined_call_operand.vmem [shape: f32[2,16,16,8], index: 5, kind: output, shape index: {0}]   ;;  %s3301_s6 = inlined_call_operand.vmem [shape: f32[2,1,2,8], index: 6, kind: output, shape index: {1}]  }
   0x1   :  { %s2333_s23 = smov 0  }
   0x2 LB: > { %s29_s24 = sadd.s32 1, %s2279_s22  ;;  %p2110_p0 = scmp.ge.s32.totalorder %s2283_s23, 1  ;;  %s2283_s23 = sphi %s2333_s23, %s17_s23   ;;  %s2279_s22 = sphi %s2331_s22, %s3305_s22   ;;  %s2275_s21 = sphi %s2329_s21, %s3304_s21  }
   0x3   : > { %p31_p1 = scmp.ge.s32.totalorder %s29_s24, 2  ;;  %p231_p2 = scmp.lt.s32.totalorder %s2283_s23, 3 }
   0x5   : > { %s3307_s24 = smov (%p31_p1, %s29_s24), 0  ;;  %p232_p3 = pnand %p2110_p0, %p231_p2 }
   0x6   : > { %p273_p4 = scmp.lt.s32.totalorder (!%p232_p3), %s2275_s21, 1  ;;  %s2286_s9 = smov (!%p232_p3), 16  }
   0x7   : > { %235 = sbr.rel (%p232_p3) target bundleno = 622 (0x26e), region = 40  ;;  %s2287_s10 = smov (!%p232_p3), 8  }
   0x8   : > { %s2288_s11 = smov (!%p232_p3), 24   ;;  %s2289_s12 = smov (!%p232_p3), 48  }
   0x9   : > { %s2290_s13 = smov (!%p232_p3), 40   ;;  %s2291_s14 = smov (!%p232_p3), 64  }
   0xa   : > { %s2292_s15 = smov (!%p232_p3), 32   ;;  %s2293_s16 = smov (!%p232_p3), 56  }
   0xc   : > { %vm658_vm0 = vcmask 1040384   ;;  %vm659_vm1 = vsmask.f32 256  ;;  %v2285_v0 = vmov 0   ;;  %vm922_vm3 = vcmask 1046528   ;;  %s3309_s21 = smov (!%p273_p4, %s2275_s21), 1 }
   0xd   : > { %v499_v1 = vrot.slane %v2285_v0, 7  ;;  %vm2348_vm2 = vmand %vm658_vm0, %vm659_vm1  ;;  %v2366_v9 = vld [vmem:[%s3296_s1] ss:$0 sm:$0xff]  ;;  %s2144_s27 = sshll.u32 %s3309_s21, 8  ;;  %vm697_vm4 = vsmask.f32 7424 }
   0xe   : > { %v2372_v11 = vld [vmem:[%s3297_s2] ss:$0 sm:$0xff]  ;;  %s2382_s8 = scalar_lea.vmem %s3295_s0, %s2144_s27  ;;  %vm1601_vm5 = vcmask 1043456   ;;  %vm1261_vm6 = vcmask 64512   ;;  %vm1294_vm7 = vcmask 130048   ;;  %vm1327_vm8 = vcmask 195584  }
   0xf   : > { %v2354_v3 = vsel %vm2348_vm2, 0, %v499_v1  ;;  %v679_v4 = vsel %vm2348_vm2, %v499_v1, 0  ;;  %v302_v15 = vld [vmem:[%s2382_s8 + $0x10] sm:$0xff]  ;;  %v303_v16 = vld [vmem:[%s2382_s8 + $0x18] sm:$0xff]  ;;  %v300_v17 = vld [vmem:[%s2382_s8] sm:$0xff]  ;;  %vm1360_vm9 = vcmask 261120  }
  0x10   : > { %v923_v5 = vrot.slane %v2354_v3, 1  ;;  %v924_v6 = vrot.slane %v679_v4, 1  ;;  %v699_v7 = vshrl.u32 %v2354_v3, 16  ;;  %v701_v8 = vshll.u32 %v2354_v3, 16  ;;  %v301_v21 = vld [vmem:[%s2382_s8 + $0x8] sm:$0xff]  ;;  %v304_v23 = vld [vmem:[%s2382_s8 + $0x20] sm:$0xff] }
  0x11   : > { %v706_v10 = vshll.u32 %v679_v4, 16  ;;  %v341_v19 = vmul.f32 %v2366_v9, %v302_v15  ;;  %v342_v20 = vmul.f32 %v2366_v9, %v303_v16  ;;  %v339_v22 = vmul.f32 %v2366_v9, %v300_v17  ;;  %v305_v24 = vld [vmem:[%s2382_s8 + $0x28] sm:$0xff]  ;;  %v306_v38 = vld [vmem:[%s2382_s8 + $0x30] sm:$0xff]  ;;  %v307_v39 = vld [vmem:[%s2382_s8 + $0x38] sm:$0xff] }
  0x12   : > { %v2375_v12 = vsel %vm922_vm3, %v923_v5, %v924_v6  ;;  %v703_v13 = vrot.slane %v701_v8, 1  ;;  %v340_v25 = vmul.f32 %v2366_v9, %v301_v21  ;;  %v343_v26 = vmul.f32 %v2366_v9, %v304_v23  ;;  %v308_v6 = vld [vmem:[%s2382_s8 + $0x40] sm:$0xff] }
  0x13   : > { %1037 = vrot.lane.b32.xlu1 %v2375_v12, %s2286_s9  ;;  %v708_v14 = vrot.slane %v706_v10, 1  ;;  %v344_v27 = vmul.f32 %v2366_v9, %v305_v24  ;;  %v380_v29 = vadd.f32 %v2372_v11, %v341_v19  ;;  %v381_v30 = vadd.f32 %v2372_v11, %v342_v20 }
  0x14   : > { %v704_v18 = vor.u32 %v703_v13, %v699_v7  ;;  %v378_v31 = vadd.f32 %v2372_v11, %v339_v22  ;;  %v379_v32 = vadd.f32 %v2372_v11, %v340_v25  ;;  %v382_v33 = vadd.f32 %v2372_v11, %v343_v26  ;;  %v309_v7 = vld [vmem:[%s2382_s8 + $0x48] sm:$0xff] }
  0x15   : > { %v383_v34 = vadd.f32 %v2372_v11, %v344_v27  ;;  %v412_v35 = vmax.f32 %v380_v29, 0.0  ;;  %v413_v36 = vmax.f32 %v381_v30, 0.0  ;;  %v345_v46 = vmul.f32 %v2366_v9, %v306_v38 }
  0x16   : > { %v2399_v28 = vsel %vm697_vm4, %v704_v18, %v708_v14  ;;  %v410_v37 = vmax.f32 %v378_v31, 0.0  ;;  %v411_v40 = vmax.f32 %v379_v32, 0.0  ;;  %v414_v41 = vmax.f32 %v382_v33, 0.0 }
  0x17   : > { %1005 = vrot.lane.b32.xlu0 %v2399_v28, %s2287_s10  ;;  %v415_v42 = vmax.f32 %v383_v34, 0.0  ;;  %v443_v43 = vpack.c.bf16 %v413_v36, %v412_v35  ;;  %v346_v47 = vmul.f32 %v2366_v9, %v307_v39  ;;  %v384_v57 = vadd.f32 %v2372_v11, %v345_v46 }
  0x18   : > { %v442_v44 = vpack.c.bf16 %v411_v40, %v410_v37  ;;  %v347_v16 = vmul.f32 %v2366_v9, %v308_v6  ;;  %v348_v17 = vmul.f32 %v2366_v9, %v309_v7  ;;  %v2255_v7 = vld [vmem:[%s3298_s3 + $0x18] sm:$0xff]   ;;  %vm1393_vm10 = vcmask 326656  }
  0x19   : > { %v444_v45 = vpack.c.bf16 %v415_v42, %v414_v41  ;;  %v511_v48 = vshrl.u32 %v443_v43, 16  ;;  %v514_v49 = vshll.u32 %v443_v43, 16  ;;  %v385_v58 = vadd.f32 %v2372_v11, %v346_v47 }
  0x1a   : > { %v504_v50 = vshrl.u32 %v442_v44, 16  ;;  %v507_v51 = vshll.u32 %v442_v44, 16  ;;  %v416_v4 = vmax.f32 %v384_v57, 0.0  ;;  %v386_v33 = vadd.f32 %v2372_v11, %v347_v16 }
  0x1b   : > { %v518_v52 = vshrl.u32 %v444_v45, 16  ;;  %v521_v53 = vshll.u32 %v444_v45, 16  ;;  %v513_v54 = vrot.slane %v511_v48, 7  ;;  %v417_v5 = vmax.f32 %v385_v58, 0.0  ;;  %v310_v58 = vld [vmem:[%s2382_s8 + $0x50] sm:$0xff] }
  0x1c   : > { %v506_v55 = vrot.slane %v504_v50, 7  ;;  %v387_v41 = vadd.f32 %v2372_v11, %v348_v17  ;;  %v418_v45 = vmax.f32 %v386_v33, 0.0  ;;  %vm1426_vm11 = vcmask 392192  }
  0x1d   : > { %v520_v56 = vrot.slane %v518_v52, 7  ;;  %v516_v59 = vor.u32 %v514_v49, %v513_v54  ;;  %v681_v1 = vsel %vm2348_vm2, %v513_v54, 0  ;;  %v445_v21 = vpack.c.bf16 %v417_v5, %v416_v4 }
  0x1e   : > { %v509_v60 = vor.u32 %v507_v51, %v506_v55  ;;  %v680_v62 = vsel %vm2348_vm2, %v506_v55, 0  ;;  %v930_v19 = vrot.slane %v681_v1, 1  ;;  %v730_v20 = vshll.u32 %v681_v1, 16 }
  0x1f   : > { %v523_v61 = vor.u32 %v521_v53, %v520_v56  ;;  %v2419_v63 = vsel %vm2348_vm2, 0, %v516_v59  ;;  %v927_v13 = vrot.slane %v680_v62, 1  ;;  %v718_v29 = vshll.u32 %v680_v62, 16  ;;  %v2254_v53 = vld [vmem:[%s3298_s3 + $0x20] ss:$0 sps:$4 sm:$0xff]   ;;  %v311_v59 = vld [vmem:[%s2382_s8 + $0x58] sm:$0xff] }
  0x20   : > { %1071 = vrot.lane.b32.xlu1 %v2419_v63, %s2288_s11  ;;  %v2425_v0 = vsel %vm2348_vm2, 0, %v509_v60  ;;  %v725_v14 = vshll.u32 %v2419_v63, 16  ;;  %v929_v18 = vrot.slane %v2419_v63, 1  ;;  %v723_v23 = vshrl.u32 %v2419_v63, 16  ;;  %2219 = vmatprep.subr.msk.bf16.mxu0 %vm1601_vm5, %v2254_v53 }
  0x21   : > { %1069 = vrot.lane.b32.xlu0 %v2425_v0, %s2288_s11  ;;  %v2435_v8 = vsel %vm2348_vm2, 0, %v523_v61  ;;  %v926_v10 = vrot.slane %v2425_v0, 1  ;;  %v713_v15 = vshll.u32 %v2425_v0, 16  ;;  %v711_v26 = vshrl.u32 %v2425_v0, 16  ;;  %2220 = vmatprep.subr.msk.bf16.mxu1 %vm1601_vm5, %v2254_v53 }
  0x22   : > { %v727_v24 = vrot.slane %v725_v14, 1  ;;  %v737_v25 = vshll.u32 %v2435_v8, 16  ;;  %v682_v30 = vsel %vm2348_vm2, %v520_v56, 0  ;;  %v2455_v31 = vsel %vm922_vm3, %v929_v18, %v930_v19  ;;  %v2256_v19 = vld [vmem:[%s3298_s3 + $0x10] sm:$0xff]  }
  0x23   : > { %v928_v22 = vsel %vm922_vm3, %v926_v10, %v927_v13  ;;  %v715_v27 = vrot.slane %v713_v15, 1  ;;  %v732_v32 = vrot.slane %v730_v20, 1  ;;  %v735_v35 = vshrl.u32 %v2435_v8, 16 }
  0x24   : > { %1167 = vrot.lane.b32.xlu1 %v2435_v8, %s2289_s12  ;;  %v728_v34 = vor.u32 %v727_v24, %v723_v23  ;;  %v739_v36 = vrot.slane %v737_v25, 1  ;;  %v742_v37 = vshll.u32 %v682_v30, 16  ;;  %v720_v39 = vrot.slane %v718_v29, 1  ;;  %v312_v25 = vld [vmem:[%s2382_s8 + $0x60] sm:$0xff] }
  0x25   : > { %1165 = vrot.lane.b32.xlu0 %v2419_v63, %s2289_s12  ;;  %v716_v38 = vor.u32 %v715_v27, %v711_v26  ;;  %v525_v40 = vshrl.u32 %v445_v21, 16  ;;  %v528_v48 = vshll.u32 %v445_v21, 16  ;;  %v419_v49 = vmax.f32 %v387_v41, 0.0  ;;  %v313_v26 = vld [vmem:[%s2382_s8 + $0x68] sm:$0xff] }
  0x26   : > { %v733_v42 = vsel %vm697_vm4, %v728_v34, %v732_v32  ;;  %v740_v43 = vor.u32 %v739_v36, %v735_v35  ;;  %v744_v44 = vrot.slane %v742_v37, 1  ;;  %v932_v54 = vrot.slane %v2435_v8, 1  ;;  %v2257_v27 = vld [vmem:[%s3298_s3 + $0x8] sm:$0xff]   ;;  %v2258_v37 = vld [vmem:[%s3298_s3] sm:$0xff]  }
  0x27   : > { %v721_v46 = vsel %vm697_vm4, %v716_v38, %v720_v39  ;;  %v527_v47 = vrot.slane %v525_v40, 7  ;;  %v446_v52 = vpack.c.bf16 %v419_v49, %v418_v45  ;;  %v933_v55 = vrot.slane %v682_v30, 1 }
  0x28   : > { %1039 = vrot.lane.b32.xlu1 %v928_v22, %s2286_s9  ;;  %v2470_v50 = vsel %vm697_vm4, %v740_v43, %v744_v44  ;;  %v349_v61 = vmul.f32 %v2366_v9, %v310_v58  ;;  %v350_v62 = vmul.f32 %v2366_v9, %v311_v59  ;;  %v1603_v15 = vsel %vm1601_vm5, %v2254_v53, 0  ;;  %v314_v59 = vld [vmem:[%s2382_s8 + $0x70] sm:$0xff] }
  0x29   : > { %1133 = vrot.lane.b32.xlu0 %v928_v22, %s2290_s13  ;;  %v530_v51 = vor.u32 %v528_v48, %v527_v47  ;;  %v532_v57 = vshrl.u32 %v446_v52, 16  ;;  %v934_v1 = vsel %vm922_vm3, %v932_v54, %v933_v55  ;;  %v683_v4 = vsel %vm2348_vm2, %v527_v47, 0  ;;  %2168 = vmatpush3.bf16.msra.mxu0 %v1603_v15 }
  0x2a   : > { %v535_v6 = vshll.u32 %v446_v52, 16  ;;  %v754_v14 = vshll.u32 %v683_v4, 16  ;;  %v388_v17 = vadd.f32 %v2372_v11, %v349_v61  ;;  %v389_v18 = vadd.f32 %v2372_v11, %v350_v62  ;;  %2214 = vmatpush3.bf16.msra.mxu1 %v1603_v15  ;;  %2169 = vmatprep.subr.bf16.mxu0 %v2255_v7 }
  0x2b   : > { %v2481_v56 = vsel %vm2348_vm2, 0, %v530_v51  ;;  %v534_v5 = vrot.slane %v532_v57, 7  ;;  %2210 = vmatprep.subr.bf16.mxu1 %v2255_v7  ;;  %v351_v35 = vmul.f32 %v2366_v9, %v312_v25  ;;  %v352_v36 = vmul.f32 %v2366_v9, %v313_v26  ;;  %v317_v25 = vld [vmem:[%s2382_s8 + $0x88] sm:$0xff] }
  0x2c   : > { %1135 = vrot.lane.b32.xlu1 %v2455_v31, %s2290_s13  ;;  %v749_v60 = vshll.u32 %v2481_v56, 16  ;;  %v747_v10 = vshrl.u32 %v2481_v56, 16  ;;  %v756_v21 = vrot.slane %v754_v14, 1  ;;  %v420_v23 = vmax.f32 %v388_v17, 0.0 }
  0x2d   : > { %1229 = vrot.lane.b32.xlu0 %v2455_v31, %s2291_s14  ;;  %v537_v16 = vor.u32 %v535_v6, %v534_v5  ;;  %v421_v24 = vmax.f32 %v389_v18, 0.0  ;;  %2170 = vmatpush3.bf16.msra.mxu0 %v2255_v7  ;;  %v935_v30 = vrot.slane %v2481_v56, 1  ;;  %v684_v33 = vsel %vm2348_vm2, %v534_v5, 0 }
  0x2e   : > { %v751_v13 = vrot.slane %v749_v60, 1  ;;  %2215 = vmatpush3.bf16.msra.mxu1 %v2255_v7  ;;  %2171 = vmatprep.subr.bf16.mxu0 %v2256_v19  ;;  %v766_v41 = vshll.u32 %v684_v33, 16  ;;  %v390_v43 = vadd.f32 %v2372_v11, %v351_v35  ;;  %v391_v44 = vadd.f32 %v2372_v11, %v352_v36  ;;  %v315_v60 = vld [vmem:[%s2382_s8 + $0x78] sm:$0xff] }
  0x2f   : > { %v2513_v22 = vsel %vm2348_vm2, 0, %v537_v16  ;;  %2211 = vmatprep.subr.bf16.mxu1 %v2256_v19  ;;  %v447_v34 = vpack.c.bf16 %v421_v24, %v420_v23  ;;  %v939_v55 = vrot.slane %v684_v33, 1  ;;  %v353_v62 = vmul.f32 %v2366_v9, %v314_v59  ;;  %v316_v24 = vld [vmem:[%s2382_s8 + $0x80] sm:$0xff] }
  0x30   : > { %1103 = vrot.lane.b32.xlu1 %v733_v42, %s2292_s15  ;;  %v752_v20 = vor.u32 %v751_v13, %v747_v10  ;;  %v761_v32 = vshll.u32 %v2513_v22, 16  ;;  %v759_v39 = vshrl.u32 %v2513_v22, 16  ;;  %v422_v49 = vmax.f32 %v390_v43, 0.0 }
  0x31   : > { %1007 = vrot.lane.b32.xlu0 %v721_v46, %s2287_s10  ;;  %2172 = vmatpush3.bf16.msra.mxu0 %v2256_v19  ;;  %v542_v48 = vshll.u32 %v447_v34, 16  ;;  %v938_v54 = vrot.slane %v2513_v22, 1  ;;  %v392_v16 = vadd.f32 %v2372_v11, %v353_v62  ;;  %v355_v33 = vmul.f32 %v2366_v9, %v316_v24  ;;  %v321_v24 = vld [vmem:[%s2382_s8 + $0xa8] sm:$0xff] }
  0x32   : > { %v757_v29 = vsel %vm697_vm4, %v752_v20, %v756_v21  ;;  %2216 = vmatpush3.bf16.msra.mxu1 %v2256_v19  ;;  %2173 = vmatprep.subr.bf16.mxu0 %v2257_v27  ;;  %v763_v40 = vrot.slane %v761_v32, 1  ;;  %vm1492_vm12 = vcmask 523264   ;;  %vm1459_vm13 = vcmask 457728  }
  0x33   : > { %2212 = vmatprep.subr.bf16.mxu1 %v2257_v27  ;;  %v424_v21 = vmax.f32 %v392_v16, 0.0  ;;  %vm1568_vm14 = vcmask 588800   ;;  %vm1970_vm15 = vcmask 58368  }
  0x34   : > { %1199 = vrot.lane.b32.xlu1 %v2470_v50, %s2293_s16  ;;  %v764_v45 = vor.u32 %v763_v40, %v759_v39  ;;  %v394_v40 = vadd.f32 %v2372_v11, %v355_v33  ;;  %v360_v33 = vmul.f32 %v2366_v9, %v321_v24 }
  0x35   : > { %1101 = vrot.lane.b32.xlu0 %v721_v46, %s2292_s15  ;;  %2174 = vmatpush3.bf16.msra.mxu0 %v2257_v27  ;;  %v768_v46 = vrot.slane %v766_v41, 1 }
  0x36   : > { %2175 = vmatprep.subr.bf16.mxu0 %v2258_v37  ;;  %2217 = vmatpush3.bf16.msra.mxu1 %v2257_v27 }
  0x37   : > { %2213 = vmatprep.subr.bf16.mxu1 %v2258_v37  ;;  %v769_v51 = vsel %vm697_vm4, %v764_v45, %v768_v46  ;;  %v426_v46 = vmax.f32 %v394_v40, 0.0  ;;  %v399_v40 = vadd.f32 %v2372_v11, %v360_v33 }
  0x38   : > { %1009 = vrot.lane.b32.xlu1 %v733_v42, %s2287_s10 }
  0x39   : > { %1197 = vrot.lane.b32.xlu0 %v733_v42, %s2293_s16  ;;  %v539_v42 = vshrl.u32 %v447_v34, 16  ;;  %2176 = vmatpush3.bf16.msra.mxu0 %v2258_v37  ;;  %v356_v34 = vmul.f32 %v2366_v9, %v317_v25 }
  0x3a   : > { %2218 = vmatpush3.bf16.msra.mxu1 %v2258_v37 }
  0x3b   : > { %v541_v47 = vrot.slane %v539_v42, 7  ;;  %v395_v41 = vadd.f32 %v2372_v11, %v356_v34 }
  0x3c   : > { %1011 = vrot.lane.b32.xlu1 %v2470_v50, %s2287_s10 }
  0x3d   : > { %1231 = vrot.lane.b32.xlu0 %v934_v1, %s2291_s14  ;;  %v544_v52 = vor.u32 %v542_v48, %v541_v47  ;;  %v685_v5 = vsel %vm2348_vm2, %v541_v47, 0  ;;  %v427_v47 = vmax.f32 %v395_v41, 0.0 }
  0x3e   : > { %v778_v14 = vshll.u32 %v685_v5, 16 }
  0x3f   : > { %v2553_v57 = vsel %vm2348_vm2, 0, %v544_v52 }
  0x40   : > { %1043 = vrot.lane.b32.xlu1 %v934_v1, %s2286_s9  ;;  %v773_v61 = vshll.u32 %v2553_v57, 16  ;;  %v771_v10 = vshrl.u32 %v2553_v57, 16  ;;  %v780_v19 = vrot.slane %v778_v14, 1  ;;  %v941_v27 = vrot.slane %v2553_v57, 1 }
  0x41   : > { %1041 = vrot.lane.b32.xlu0 %v2455_v31, %s2286_s9  ;;  %v936_v31 = vrot.slane %v683_v4, 1  ;;  %v940_v4 = vsel %vm922_vm3, %v938_v54, %v939_v55  ;;  %v318_v55 = vld [vmem:[%s2382_s8 + $0x90] sm:$0xff] }
  0x42   : > { %v775_v13 = vrot.slane %v773_v61, 1  ;;  %v357_v61 = vmul.f32 %v2366_v9, %v318_v55 }
  0x43   : > { %v937_v38 = vsel %vm922_vm3, %v935_v30, %v936_v31 }
  0x44   : > { %1075 = vrot.lane.b32.xlu1 %v2481_v56, %s2288_s11  ;;  %v776_v18 = vor.u32 %v775_v13, %v771_v10  ;;  %v396_v14 = vadd.f32 %v2372_v11, %v357_v61 }
  0x45   : > { %1073 = vrot.lane.b32.xlu0 %v2435_v8, %s2288_s11 }
  0x46   : > { %v781_v26 = vsel %vm697_vm4, %v776_v18, %v780_v19  ;;  %v428_v19 = vmax.f32 %v396_v14, 0.0 }
  0x48   : > { %1107 = vrot.lane.b32.xlu1 %v757_v29, %s2292_s15 }
  0x49   : > { %1105 = vrot.lane.b32.xlu0 %v2470_v50, %s2292_s15  ;;  %v423_v50 = vmax.f32 %v391_v44, 0.0 }
  0x4b   : > { %v448_v53 = vpack.c.bf16 %v423_v50, %v422_v49  ;;  %v450_v50 = vpack.c.bf16 %v427_v47, %v426_v46 }
  0x4c   : > { %1139 = vrot.lane.b32.xlu1 %v937_v38, %s2290_s13 }
  0x4d   : > { %1137 = vrot.lane.b32.xlu0 %v934_v1, %s2290_s13  ;;  %v546_v58 = vshrl.u32 %v448_v53, 16  ;;  %v354_v1 = vmul.f32 %v2366_v9, %v315_v60  ;;  %v549_v7 = vshll.u32 %v448_v53, 16  ;;  %v560_v54 = vshrl.u32 %v450_v50, 16 }
  0x4f   : > { %v548_v6 = vrot.slane %v546_v58, 7  ;;  %v393_v17 = vadd.f32 %v2372_v11, %v354_v1  ;;  %v319_v58 = vld [vmem:[%s2382_s8 + $0x98] sm:$0xff]  ;;  %v562_v1 = vrot.slane %v560_v54, 7 }
  0x50   : > { %1171 = vrot.lane.b32.xlu1 %v2513_v22, %s2289_s12 }
  0x51   : > { %1169 = vrot.lane.b32.xlu0 %v2481_v56, %s2289_s12  ;;  %v551_v15 = vor.u32 %v549_v7, %v548_v6  ;;  %v425_v23 = vmax.f32 %v393_v17, 0.0  ;;  %v686_v31 = vsel %vm2348_vm2, %v548_v6, 0 }
  0x52   : > { %v945_v52 = vrot.slane %v686_v31, 1 }
  0x53   : > { %v2574_v20 = vsel %vm2348_vm2, 0, %v551_v15  ;;  %v449_v32 = vpack.c.bf16 %v425_v23, %v424_v21  ;;  %v320_v23 = vld [vmem:[%s2382_s8 + $0xa0] sm:$0xff] }
  0x54   : > { %1203 = vrot.lane.b32.xlu1 %v769_v51, %s2293_s16  ;;  %v785_v30 = vshll.u32 %v2574_v20, 16  ;;  %v783_v36 = vshrl.u32 %v2574_v20, 16 }
  0x55   : > { %1201 = vrot.lane.b32.xlu0 %v757_v29, %s2293_s16  ;;  %v553_v39 = vshrl.u32 %v449_v32, 16  ;;  %v556_v45 = vshll.u32 %v449_v32, 16  ;;  %v359_v32 = vmul.f32 %v2366_v9, %v320_v23 }
  0x56   : > { %v787_v37 = vrot.slane %v785_v30, 1  ;;  %v688_v30 = vsel %vm2348_vm2, %v562_v1, 0 }
  0x57   : > { %v555_v44 = vrot.slane %v553_v39, 7  ;;  %v398_v39 = vadd.f32 %v2372_v11, %v359_v32  ;;  %v324_v32 = vld [vmem:[%s2382_s8 + $0xc0] sm:$0xff] }
  0x58   : > { %1013 = vrot.lane.b32.xlu1 %v757_v29, %s2287_s10  ;;  %v942_v29 = vrot.slane %v685_v5, 1  ;;  %v788_v42 = vor.u32 %v787_v37, %v783_v36  ;;  %v358_v5 = vmul.f32 %v2366_v9, %v319_v58  ;;  %v814_v37 = vshll.u32 %v688_v30, 16 }
  0x59   : > { %1233 = vrot.lane.b32.xlu0 %v937_v38, %s2291_s14  ;;  %v558_v49 = vor.u32 %v556_v45, %v555_v44  ;;  %v687_v62 = vsel %vm2348_vm2, %v555_v44, 0  ;;  %v430_v47 = vmax.f32 %v398_v39, 0.0  ;;  %v951_v58 = vrot.slane %v688_v30, 1 }
  0x5a   : > { %v943_v35 = vsel %vm922_vm3, %v941_v27, %v942_v29  ;;  %v802_v10 = vshll.u32 %v687_v62, 16  ;;  %v397_v15 = vadd.f32 %v2372_v11, %v358_v5  ;;  %v948_v27 = vrot.slane %v687_v62, 1  ;;  %v322_v62 = vld [vmem:[%s2382_s8 + $0xb0] sm:$0xff] }
  0x5b   : > { %v2607_v53 = vsel %vm2348_vm2, 0, %v558_v49  ;;  %v816_v44 = vrot.slane %v814_v37, 1 }
  0x5c   : > { %1015 = vrot.lane.b32.xlu1 %v769_v51, %s2287_s10  ;;  %v797_v60 = vshll.u32 %v2607_v53, 16  ;;  %v795_v6 = vshrl.u32 %v2607_v53, 16  ;;  %v804_v17 = vrot.slane %v802_v10, 1  ;;  %v429_v21 = vmax.f32 %v397_v15, 0.0 }
  0x5d   : > { %1235 = vrot.lane.b32.xlu0 %v940_v4, %s2291_s14 }
  0x5e   : > { %v799_v7 = vrot.slane %v797_v60, 1 }
  0x60   : > { %1047 = vrot.lane.b32.xlu1 %v940_v4, %s2286_s9  ;;  %v800_v16 = vor.u32 %v799_v7, %v795_v6  ;;  %v361_v7 = vmul.f32 %v2366_v9, %v322_v62 }
  0x61   : > { %1045 = vrot.lane.b32.xlu0 %v937_v38, %s2286_s9  ;;  %v790_v38 = vshll.u32 %v686_v31, 16  ;;  %v451_v31 = vpack.c.bf16 %v429_v21, %v428_v19 }
  0x62   : > { %v805_v25 = vsel %vm697_vm4, %v800_v16, %v804_v17 }
  0x63   : > { %v792_v43 = vrot.slane %v790_v38, 1  ;;  %v567_v38 = vshrl.u32 %v451_v31, 16  ;;  %v570_v46 = vshll.u32 %v451_v31, 16 }
  0x64   : > { %1079 = vrot.lane.b32.xlu1 %v2553_v57, %s2288_s11 }
  0x65   : > { %1077 = vrot.lane.b32.xlu0 %v2513_v22, %s2288_s11  ;;  %v793_v48 = vsel %vm697_vm4, %v788_v42, %v792_v43  ;;  %v569_v45 = vrot.slane %v567_v38, 7 }
  0x68   : > { %1111 = vrot.lane.b32.xlu1 %v781_v26, %s2292_s15 }
  0x69   : > { %1109 = vrot.lane.b32.xlu0 %v769_v51, %s2292_s15  ;;  %v944_v51 = vrot.slane %v2574_v20, 1 }
  0x6b   : > { %v946_v59 = vsel %vm922_vm3, %v944_v51, %v945_v52  ;;  %v572_v51 = vor.u32 %v570_v46, %v569_v45 }
  0x6c   : > { %1143 = vrot.lane.b32.xlu1 %v943_v35, %s2290_s13 }
  0x6d   : > { %1141 = vrot.lane.b32.xlu0 %v940_v4, %s2290_s13  ;;  %v563_v4 = vshll.u32 %v450_v50, 16  ;;  %v2672_v60 = vsel %vm2348_vm2, 0, %v572_v51 }
  0x6e   : > { %v821_v6 = vshll.u32 %v2672_v60, 16  ;;  %v819_v19 = vshrl.u32 %v2672_v60, 16 }
  0x6f   : > { %v565_v13 = vor.u32 %v563_v4, %v562_v1  ;;  %v323_v4 = vld [vmem:[%s2382_s8 + $0xb8] sm:$0xff] }
  0x70   : > { %1175 = vrot.lane.b32.xlu1 %v2574_v20, %s2289_s12  ;;  %v362_v16 = vmul.f32 %v2366_v9, %v323_v4  ;;  %v823_v21 = vrot.slane %v821_v6, 1 }
  0x71   : > { %1173 = vrot.lane.b32.xlu0 %v2553_v57, %s2289_s12  ;;  %v2628_v18 = vsel %vm2348_vm2, 0, %v565_v13  ;;  %v689_v13 = vsel %vm2348_vm2, %v569_v45, 0  ;;  %v363_v45 = vmul.f32 %v2366_v9, %v324_v32 }
  0x72   : > { %v809_v29 = vshll.u32 %v2628_v18, 16  ;;  %v950_v55 = vrot.slane %v2628_v18, 1  ;;  %v826_v23 = vshll.u32 %v689_v13, 16  ;;  %v824_v30 = vor.u32 %v823_v21, %v819_v19 }
  0x73   : > { %v402_v19 = vadd.f32 %v2372_v11, %v363_v45 }
  0x74   : > { %1207 = vrot.lane.b32.xlu1 %v793_v48, %s2293_s16  ;;  %v811_v36 = vrot.slane %v809_v29, 1  ;;  %v2681_v5 = vsel %vm922_vm3, %v950_v55, %v951_v58  ;;  %v828_v31 = vrot.slane %v826_v23, 1 }
  0x75   : > { %1205 = vrot.lane.b32.xlu0 %v781_v26, %s2293_s16 }
  0x78   : > { %1017 = vrot.lane.b32.xlu1 %v781_v26, %s2287_s10  ;;  %v947_v26 = vrot.slane %v2607_v53, 1 }
  0x79   : > { %1237 = vrot.lane.b32.xlu0 %v943_v35, %s2291_s14 }
  0x7a   : > { %v949_v34 = vsel %vm922_vm3, %v947_v26, %v948_v27  ;;  %v400_v26 = vadd.f32 %v2372_v11, %v361_v7  ;;  %v401_v27 = vadd.f32 %v2372_v11, %v362_v16 }
  0x7c   : > { %1019 = vrot.lane.b32.xlu1 %v793_v48, %s2287_s10  ;;  %v433_v37 = vmax.f32 %v401_v27, 0.0 }
  0x7d   : > { %1239 = vrot.lane.b32.xlu0 %v946_v59, %s2291_s14 }
  0x80   : > { %1051 = vrot.lane.b32.xlu1 %v946_v59, %s2286_s9 }
  0x81   : > { %1049 = vrot.lane.b32.xlu0 %v943_v35, %s2286_s9  ;;  %v807_v35 = vshrl.u32 %v2628_v18, 16 }
  0x83   : > { %v812_v43 = vor.u32 %v811_v36, %v807_v35  ;;  %v432_v36 = vmax.f32 %v400_v26, 0.0 }
  0x84   : > { %1083 = vrot.lane.b32.xlu1 %v2607_v53, %s2288_s11 }
  0x85   : > { %1081 = vrot.lane.b32.xlu0 %v2574_v20, %s2288_s11  ;;  %v2650_v41 = vpop.permute.xlu1 %1037  ;;  %v2658_v49 = vsel %vm697_vm4, %v812_v43, %v816_v44  ;;  %v953_v43 = vrot.slane %v2672_v60, 1  ;;  %v954_v44 = vrot.slane %v689_v13, 1  ;;  %v453_v55 = vpack.c.bf16 %v433_v37, %v432_v36 }
  0x87   : > { %v581_v16 = vshrl.u32 %v453_v55, 16 }
  0x88   : > { %1115 = vrot.lane.b32.xlu1 %v805_v25, %s2292_s15 }
  0x89   : > { %1113 = vrot.lane.b32.xlu0 %v793_v48, %s2292_s15  ;;  %v1006_v42 = vpop.permute.xlu0 %1005  ;;  %v431_v48 = vmax.f32 %v399_v40, 0.0  ;;  %v325_v40 = vld [vmem:[%s2382_s8 + $0xc8] sm:$0xff]  ;;  %v583_v27 = vrot.slane %v581_v16, 7 }
  0x8a   : > { %v1263_v38 = vsel %vm1261_vm6, %v2354_v3, %v1006_v42  ;;  %v2716_v42 = vsel %vm697_vm4, %v824_v30, %v828_v31  ;;  %v364_v58 = vmul.f32 %v2366_v9, %v325_v40  ;;  %v584_v30 = vshll.u32 %v453_v55, 16 }
  0x8b   : > { %v452_v52 = vpack.c.bf16 %v431_v48, %v430_v47  ;;  %v1296_v48 = vsel %vm1294_vm7, %v1263_v38, %v2650_v41  ;;  %v2735_v41 = vsel %vm922_vm3, %v953_v43, %v954_v44  ;;  %v434_v31 = vmax.f32 %v402_v19, 0.0 }
  0x8c   : > { %1147 = vrot.lane.b32.xlu1 %v949_v34, %s2290_s13  ;;  %v403_v21 = vadd.f32 %v2372_v11, %v364_v58  ;;  %v586_v37 = vor.u32 %v584_v30, %v583_v27 }
  0x8d   : > { %1145 = vrot.lane.b32.xlu0 %v946_v59, %s2290_s13  ;;  %v574_v61 = vshrl.u32 %v452_v52, 16  ;;  %v577_v15 = vshll.u32 %v452_v52, 16 }
  0x8e   : > { %v2782_v44 = vsel %vm2348_vm2, 0, %v586_v37 }
  0x8f   : > { %v576_v14 = vrot.slane %v574_v61, 7 }
  0x90   : > { %1179 = vrot.lane.b32.xlu1 %v2628_v18, %s2289_s12 }
  0x91   : > { %1177 = vrot.lane.b32.xlu0 %v2607_v53, %s2289_s12  ;;  %v2720_v47 = vsel %vm2348_vm2, %v576_v14, 0 }
  0x92   : > { %v2660_v50 = vpop.permute.xlu1 %1071  ;;  %v957_v43 = vrot.slane %v2720_v47, 1 }
  0x93   : > { %v2662_v54 = vpop.permute.xlu0 %1069 }
  0x94   : > { %1211 = vrot.lane.b32.xlu1 %v2658_v49, %s2293_s16  ;;  %v1329_v61 = vsel %vm1327_vm8, %v1296_v48, %v2662_v54 }
  0x95   : > { %1209 = vrot.lane.b32.xlu0 %v805_v25, %s2293_s16 }
  0x96   : > { %v2668_v59 = vpop.permute.xlu1 %1167 }
  0x97   : > { %v2675_v1 = vpop.permute.xlu0 %1165 }
  0x98   : > { %1021 = vrot.lane.b32.xlu1 %v805_v25, %s2287_s10  ;;  %v579_v25 = vor.u32 %v577_v15, %v576_v14 }
  0x99   : > { %1241 = vrot.lane.b32.xlu0 %v949_v34, %s2291_s14 }
  0x9a   : > { %v1040_v10 = vpop.permute.xlu1 %1039  ;;  %v2701_v35 = vsel %vm2348_vm2, 0, %v579_v25 }
  0x9b   : > { %v1134_v17 = vpop.permute.xlu0 %1133  ;;  %v831_v54 = vshrl.u32 %v2701_v35, 16 }
  0x9c   : > { %1023 = vrot.lane.b32.xlu1 %v2658_v49, %s2287_s10 }
  0x9d   : > { %1243 = vrot.lane.b32.xlu0 %v2681_v5, %s2291_s14 }
  0x9e   : > { %v1136_v24 = vpop.permute.xlu1 %1135 }
  0x9f   : > { %v1230_v29 = vpop.permute.xlu0 %1229 }
  0xa0   : > { %1055 = vrot.lane.b32.xlu1 %v2681_v5, %s2286_s9 }
  0xa1   : > { %1053 = vrot.lane.b32.xlu0 %v949_v34, %s2286_s9 }
  0xa2   : > { %v1104_v33 = vpop.permute.xlu1 %1103 }
  0xa3   : > { %v1008_v39 = vpop.permute.xlu0 %1007 }
  0xa4   : > { %v1265_v34 = vsel %vm1261_vm6, %v2425_v0, %v1008_v39  ;;  %1087 = vrot.lane.b32.xlu1 %v2672_v60, %s2288_s11  ;;  %v833_v0 = vshll.u32 %v2701_v35, 16 }
  0xa5   : > { %v1298_v46 = vsel %vm1294_vm7, %v1265_v34, %v1040_v10  ;;  %1085 = vrot.lane.b32.xlu0 %v2628_v18, %s2288_s11  ;;  %v956_v34 = vrot.slane %v2701_v35, 1 }
  0xa6   : > { %v1331_v51 = vsel %vm1327_vm8, %v1298_v46, %v2660_v50  ;;  %v1200_v52 = vpop.permute.xlu1 %1199  ;;  %v838_v50 = vshll.u32 %v2720_v47, 16  ;;  %v835_v13 = vrot.slane %v833_v0, 1  ;;  %v326_v46 = vld [vmem:[%s2382_s8 + $0xd0] sm:$0xff]  ;;  %v327_v0 = vld [vmem:[%s2382_s8 + $0xd8] sm:$0xff] }
  0xa7   : > { %v1364_v62 = vsel %vm1360_vm9, %v1331_v51, %v1104_v33  ;;  %v1102_v4 = vpop.permute.xlu0 %1101  ;;  %v845_v51 = vshll.u32 %v2782_v44, 16  ;;  %v366_v47 = vmul.f32 %v2366_v9, %v327_v0  ;;  %v2796_v58 = vsel %vm922_vm3, %v956_v34, %v957_v43 }
  0xa8   : > { %v1362_v6 = vsel %vm1360_vm9, %v1329_v61, %v1102_v4  ;;  %1119 = vrot.lane.b32.xlu1 %v2716_v42, %s2292_s15  ;;  %v1397_v7 = vsel %vm1393_vm10, %v1364_v62, %v1136_v24  ;;  %v836_v24 = vor.u32 %v835_v13, %v831_v54  ;;  %v840_v25 = vrot.slane %v838_v50, 1 }
  0xa9   : > { %v1395_v10 = vsel %vm1393_vm10, %v1362_v6, %v1134_v17  ;;  %1117 = vrot.lane.b32.xlu0 %v2658_v49, %s2292_s15  ;;  %v1430_v17 = vsel %vm1426_vm11, %v1397_v7, %v2668_v59  ;;  %v435_v59 = vmax.f32 %v403_v21, 0.0  ;;  %v691_v61 = vsel %vm2348_vm2, %v583_v27, 0 }
  0xaa   : > { %v2743_v14 = vpop.permute.xlu1 %1009  ;;  %v1428_v15 = vsel %vm1426_vm11, %v1395_v10, %v2675_v1  ;;  %v1463_v32 = vsel %vm1459_vm13, %v1430_v17, %v1200_v52  ;;  %v365_v52 = vmul.f32 %v2366_v9, %v326_v46  ;;  %v843_v6 = vshrl.u32 %v2782_v44, 16 }
  0xab   : > { %v1198_v23 = vpop.permute.xlu0 %1197  ;;  %v454_v38 = vpack.c.bf16 %v435_v59, %v434_v31  ;;  %v847_v9 = vrot.slane %v845_v51, 1  ;;  %v850_v50 = vshll.u32 %v691_v61, 16  ;;  %v405_v13 = vadd.f32 %v2372_v11, %v366_v47 }
  0xac   : > { %v1461_v49 = vsel %vm1459_vm13, %v1428_v15, %v1198_v23  ;;  %1151 = vrot.lane.b32.xlu1 %v2735_v41, %s2290_s13  ;;  %v404_v54 = vadd.f32 %v2372_v11, %v365_v52  ;;  %v959_v11 = vrot.slane %v2782_v44, 1  ;;  %v960_v27 = vrot.slane %v691_v61, 1  ;;  %v2859_v52 = vld [vmem:[%s3297_s2] ss:$0 sm:$0xff] }
  0xad   : > { %1149 = vrot.lane.b32.xlu0 %v2681_v5, %s2290_s13  ;;  %v1494_v1 = vsel %vm1492_vm12, %v1461_v49, %v1230_v29  ;;  %v2768_v5 = vsel %vm697_vm4, %v836_v24, %v840_v25  ;;  %v588_v45 = vshrl.u32 %v454_v38, 16  ;;  %v591_v4 = vshll.u32 %v454_v38, 16  ;;  %v329_v25 = vld [vmem:[%s2382_s8 + $0xe8] sm:$0xff] }
  0xae   : > { %2177 = vmatprep.mubr.msk.bf16.mxu0 %vm1568_vm14, %v1494_v1  ;;  %v2758_v26 = vpop.permute.xlu1 %1011  ;;  %v848_v16 = vor.u32 %v847_v9, %v843_v6  ;;  %v852_v19 = vrot.slane %v850_v50, 1  ;;  %v436_v17 = vmax.f32 %v404_v54, 0.0  ;;  %v437_v49 = vmax.f32 %v405_v13, 0.0  ;;  %v328_v1 = vld [vmem:[%s2382_s8 + $0xe0] sm:$0xff] }
  0xaf   : > { %v1232_v33 = vpop.permute.xlu0 %1231  ;;  %v590_v62 = vrot.slane %v588_v45, 7  ;;  %v1267_v30 = vsel %vm1261_vm6, %v2419_v63, %v2743_v14  ;;  %v2846_v45 = vsel %vm922_vm3, %v959_v11, %v960_v27 }
  0xb0   : > { %v1496_v36 = vsel %vm1492_vm12, %v1463_v32, %v1232_v33  ;;  %1183 = vrot.lane.b32.xlu1 %v2701_v35, %s2289_s12  ;;  %v2830_v31 = vsel %vm697_vm4, %v848_v16, %v852_v19  ;;  %v2836_v32 = vld [vmem:[%s3296_s1] ss:$0 sm:$0xff]  ;;  %v455_v38 = vpack.c.bf16 %v437_v49, %v436_v17 }
  0xb1   : > { %1181 = vrot.lane.b32.xlu0 %v2672_v60, %s2289_s12  ;;  %2178 = vmatmul.mubr.msk.bf16.vlgmr.msra.gmra.mxu0 %vm1568_vm14, %v1496_v36  ;;  %v593_v10 = vor.u32 %v591_v4, %v590_v62  ;;  %v367_v33 = vmul.f32 %v2836_v32, %v328_v1  ;;  %v368_v63 = vmul.f32 %v2836_v32, %v329_v25 }
  0xb2   : > { %v2770_v29 = vpop.permute.xlu1 %1043  ;;  %v598_v16 = vshll.u32 %v455_v38, 16 }
  0xb3   : > { %v1042_v39 = vpop.permute.xlu0 %1041  ;;  %v2813_v23 = vsel %vm2348_vm2, 0, %v593_v10  ;;  %v406_v47 = vadd.f32 %v2859_v52, %v367_v33 }
  0xb4   : > { %1215 = vrot.lane.b32.xlu1 %v2768_v5, %s2293_s16  ;;  %v857_v59 = vshll.u32 %v2813_v23, 16  ;;  %v1300_v36 = vsel %vm1294_vm7, %v1267_v30, %v1042_v39  ;;  %v855_v46 = vshrl.u32 %v2813_v23, 16  ;;  %v1269_v39 = vsel %vm1261_vm6, %v2435_v8, %v2758_v26 }
  0xb5   : > { %1213 = vrot.lane.b32.xlu0 %v2716_v42, %s2293_s16  ;;  %v1302_v61 = vsel %vm1294_vm7, %v1269_v39, %v2770_v29  ;;  %v595_v8 = vshrl.u32 %v455_v38, 16  ;;  %v407_v26 = vadd.f32 %v2859_v52, %v368_v63  ;;  %v438_v54 = vmax.f32 %v406_v47, 0.0  ;;  %v331_v38 = vld [vmem:[%s2382_s8 + $0xf8] sm:$0xff] }
  0xb6   : > { %v2776_v40 = vpop.permute.xlu1 %1075  ;;  %v962_v11 = vrot.slane %v2813_v23, 1  ;;  %v370_v39 = vmul.f32 %v2836_v32, %v331_v38 }
  0xb7   : > { %v1074_v48 = vpop.permute.xlu0 %1073  ;;  %v439_v19 = vmax.f32 %v407_v26, 0.0 }
  0xb8   : > { %1025 = vrot.lane.b32.xlu1 %v2716_v42, %s2287_s10  ;;  %v1333_v14 = vsel %vm1327_vm8, %v1300_v36, %v1074_v48  ;;  %v859_v48 = vrot.slane %v857_v59, 1  ;;  %v409_v26 = vadd.f32 %v2859_v52, %v370_v39 }
  0xb9   : > { %1245 = vrot.lane.b32.xlu0 %v2735_v41, %s2291_s14 }
  0xba   : > { %v2793_v55 = vpop.permute.xlu1 %1107  ;;  %v860_v10 = vor.u32 %v859_v48, %v855_v46 }
  0xbb   : > { %v1106_v42 = vpop.permute.xlu0 %1105 }
  0xbc   : > { %1027 = vrot.lane.b32.xlu1 %v2768_v5, %s2287_s10  ;;  %v1366_v43 = vsel %vm1360_vm9, %v1333_v14, %v1106_v42 }
  0xbd   : > { %1247 = vrot.lane.b32.xlu0 %v2796_v58, %s2291_s14 }
  0xbe   : > { %v1140_v7 = vpop.permute.xlu1 %1139 }
  0xbf   : > { %v1138_v15 = vpop.permute.xlu0 %1137 }
  0xc0   : > { %1059 = vrot.lane.b32.xlu1 %v2796_v58, %s2286_s9  ;;  %v1399_v51 = vsel %vm1393_vm10, %v1366_v43, %v1138_v15 }
  0xc1   : > { %1057 = vrot.lane.b32.xlu0 %v2735_v41, %s2286_s9  ;;  %v2822_v41 = vsel %vm2348_vm2, %v590_v62, 0 }
  0xc2   : > { %v1172_v21 = vpop.permute.xlu1 %1171  ;;  %v862_v0 = vshll.u32 %v2822_v41, 16  ;;  %v963_v27 = vrot.slane %v2822_v41, 1 }
  0xc3   : > { %v1170_v24 = vpop.permute.xlu0 %1169 }
  0xc4   : > { %1091 = vrot.lane.b32.xlu1 %v2782_v44, %s2288_s11  ;;  %v1432_v62 = vsel %vm1426_vm11, %v1399_v51, %v1170_v24  ;;  %v456_v24 = vpack.c.bf16 %v439_v19, %v438_v54  ;;  %v964_v63 = vsel %vm922_vm3, %v962_v11, %v963_v27 }
  0xc5   : > { %1089 = vrot.lane.b32.xlu0 %v2701_v35, %s2288_s11 }
  0xc6   : > { %v1204_v37 = vpop.permute.xlu1 %1203  ;;  %v602_v33 = vshrl.u32 %v456_v24, 16  ;;  %v605_v46 = vshll.u32 %v456_v24, 16 }
  0xc7   : > { %v1202_v34 = vpop.permute.xlu0 %1201 }
  0xc8   : > { %1123 = vrot.lane.b32.xlu1 %v2830_v31, %s2292_s15  ;;  %v1465_v42 = vsel %vm1459_vm13, %v1432_v62, %v1202_v34  ;;  %v604_v43 = vrot.slane %v602_v33, 7 }
  0xc9   : > { %1121 = vrot.lane.b32.xlu0 %v2768_v5, %s2292_s15  ;;  %v1335_v5 = vsel %vm1327_vm8, %v1302_v61, %v2776_v40  ;;  %v864_v40 = vrot.slane %v862_v0, 1 }
  0xca   : > { %v2865_v4 = vpop.permute.xlu1 %1013  ;;  %v1368_v9 = vsel %vm1360_vm9, %v1335_v5, %v2793_v55  ;;  %v597_v55 = vrot.slane %v595_v8, 7  ;;  %v607_v62 = vor.u32 %v605_v46, %v604_v43  ;;  %v694_v19 = vsel %vm2348_vm2, %v604_v43, 0 }
  0xcb   : > { %v1234_v6 = vpop.permute.xlu0 %1233  ;;  %v1401_v29 = vsel %vm1393_vm10, %v1368_v9, %v1140_v7  ;;  %v886_v27 = vshll.u32 %v694_v19, 16 }
  0xcc   : > { %v1498_v50 = vsel %vm1492_vm12, %v1465_v42, %v1234_v6  ;;  %1155 = vrot.lane.b32.xlu1 %v2846_v45, %s2290_s13  ;;  %v1434_v13 = vsel %vm1426_vm11, %v1401_v29, %v1172_v21  ;;  %v600_v1 = vor.u32 %v598_v16, %v597_v55  ;;  %v693_v41 = vsel %vm2348_vm2, %v597_v55, 0 }
  0xcd   : > { %1153 = vrot.lane.b32.xlu0 %v2796_v58, %s2290_s13  ;;  %2181 = vmatprep.mubr.msk.bf16.mxu0 %vm1568_vm14, %v1498_v50  ;;  %v1467_v17 = vsel %vm1459_vm13, %v1434_v13, %v1204_v37  ;;  %v2891_v58 = vsel %vm697_vm4, %v860_v10, %v864_v40  ;;  %v330_v37 = vld [vmem:[%s2382_s8 + $0xf0] sm:$0xff]  ;;  %v874_v47 = vshll.u32 %v693_v41, 16  ;;  %v2930_v9 = vsel %vm2348_vm2, 0, %v607_v62 }
  0xce   : > { %v2881_v15 = vpop.permute.xlu1 %1015  ;;  %v2905_v59 = vsel %vm2348_vm2, 0, %v600_v1  ;;  %v369_v0 = vmul.f32 %v2836_v32, %v330_v37  ;;  %v441_v29 = vmax.f32 %v409_v26, 0.0  ;;  %v966_v40 = vrot.slane %v693_v41, 1 }
  0xcf   : > { %v1236_v49 = vpop.permute.xlu0 %1235  ;;  %v869_v14 = vshll.u32 %v2905_v59, 16  ;;  %v876_v42 = vrot.slane %v874_v47, 1  ;;  %v881_v13 = vshll.u32 %v2930_v9, 16  ;;  %v1273_v24 = vsel %vm1261_vm6, %v2513_v22, %v2881_v15 }
  0xd0   : > { %v1500_v7 = vsel %vm1492_vm12, %v1467_v17, %v1236_v49  ;;  %1187 = vrot.lane.b32.xlu1 %v2813_v23, %s2289_s12  ;;  %v408_v8 = vadd.f32 %v2859_v52, %v369_v0  ;;  %v965_v52 = vrot.slane %v2905_v59, 1  ;;  %v888_v46 = vrot.slane %v886_v27, 1 }
  0xd1   : > { %1185 = vrot.lane.b32.xlu0 %v2782_v44, %s2289_s12  ;;  %2182 = vmatmul.mubr.msk.bf16.gmra.mxu0 %vm1568_vm14, %v1500_v7  ;;  %v871_v48 = vrot.slane %v869_v14, 1  ;;  %v883_v11 = vrot.slane %v881_v13, 1  ;;  %v968_v26 = vrot.slane %v2930_v9, 1 }
  0xd2   : > { %v2893_v21 = vpop.permute.xlu1 %1047  ;;  %v440_v50 = vmax.f32 %v408_v8, 0.0 }
  0xd3   : > { %v1046_v25 = vpop.permute.xlu0 %1045  ;;  %v1306_v33 = vsel %vm1294_vm7, %v1273_v24, %v2893_v21 }
  0xd4   : > { %1219 = vrot.lane.b32.xlu1 %v2891_v58, %s2293_s16  ;;  %v457_v17 = vpack.c.bf16 %v441_v29, %v440_v50 }
  0xd5   : > { %1217 = vrot.lane.b32.xlu0 %v2830_v31, %s2293_s16 }
  0xd6   : > { %v2901_v30 = vpop.permute.xlu1 %1079  ;;  %v609_v38 = vshrl.u32 %v457_v17, 16 }
  0xd7   : > { %v1078_v36 = vpop.permute.xlu0 %1077  ;;  %v1339_v41 = vsel %vm1327_vm8, %v1306_v33, %v2901_v30 }
  0xd8   : > { %1029 = vrot.lane.b32.xlu1 %v2830_v31, %s2287_s10  ;;  %v867_v31 = vshrl.u32 %v2905_v59, 16  ;;  %v611_v39 = vrot.slane %v609_v38, 7 }
  0xd9   : > { %1249 = vrot.lane.b32.xlu0 %v2846_v45, %s2291_s14 }
  0xda   : > { %v1112_v34 = vpop.permute.xlu1 %1111  ;;  %v872_v32 = vor.u32 %v871_v48, %v867_v31 }
  0xdb   : > { %v1110_v51 = vpop.permute.xlu0 %1109  ;;  %v1372_v15 = vsel %vm1360_vm9, %v1339_v41, %v1112_v34 }
  0xdc   : > { %1031 = vrot.lane.b32.xlu1 %v2891_v58, %s2287_s10  ;;  %v877_v54 = vsel %vm697_vm4, %v872_v32, %v876_v42 }
  0xdd   : > { %1251 = vrot.lane.b32.xlu0 %v964_v63, %s2291_s14 }
  0xde   : > { %v1144_v61 = vpop.permute.xlu1 %1143 }
  0xdf   : > { %v1142_v5 = vpop.permute.xlu0 %1141 }
  0xe0   : > { %1063 = vrot.lane.b32.xlu1 %v964_v63, %s2286_s9 }
  0xe1   : > { %1061 = vrot.lane.b32.xlu0 %v2846_v45, %s2286_s9  ;;  %v1271_v45 = vsel %vm1261_vm6, %v2481_v56, %v2865_v4  ;;  %v967_v56 = vsel %vm922_vm3, %v965_v52, %v966_v40  ;;  %v879_v4 = vshrl.u32 %v2930_v9, 16 }
  0xe2   : > { %v1176_v6 = vpop.permute.xlu1 %1175  ;;  %v1304_v55 = vsel %vm1294_vm7, %v1271_v45, %v1046_v25 }
  0xe3   : > { %v1174_v10 = vpop.permute.xlu0 %1173  ;;  %v1337_v49 = vsel %vm1327_vm8, %v1304_v55, %v1078_v36  ;;  %v884_v21 = vor.u32 %v883_v11, %v879_v4 }
  0xe4   : > { %1095 = vrot.lane.b32.xlu1 %v2905_v59, %s2288_s11  ;;  %v1370_v1 = vsel %vm1360_vm9, %v1337_v49, %v1110_v51  ;;  %v612_v51 = vshll.u32 %v457_v17, 16 }
  0xe5   : > { %1093 = vrot.lane.b32.xlu0 %v2813_v23, %s2288_s11  ;;  %v1403_v25 = vsel %vm1393_vm10, %v1370_v1, %v1142_v5  ;;  %v969_v5 = vrot.slane %v694_v19, 1 }
  0xe6   : > { %v1208_v16 = vpop.permute.xlu1 %1207  ;;  %v1436_v36 = vsel %vm1426_vm11, %v1403_v25, %v1174_v10  ;;  %v695_v10 = vsel %vm2348_vm2, %v611_v39, 0 }
  0xe7   : > { %v1206_v7 = vpop.permute.xlu0 %1205  ;;  %v970_v29 = vsel %vm922_vm3, %v968_v26, %v969_v5  ;;  %v979_v13 = vshll.u32 %v695_v10, 16  ;;  %v986_v4 = vrot.slane %v695_v10, 1 }
  0xe8   : > { %1127 = vrot.lane.b32.xlu1 %v877_v54, %s2292_s15  ;;  %v1469_v14 = vsel %vm1459_vm13, %v1436_v36, %v1206_v7 }
  0xe9   : > { %1125 = vrot.lane.b32.xlu0 %v2891_v58, %s2292_s15  ;;  %v1405_v58 = vsel %vm1393_vm10, %v1372_v15, %v1144_v61  ;;  %v614_v61 = vor.u32 %v612_v51, %v611_v39  ;;  %v981_v19 = vrot.slane %v979_v13, 1 }
  0xea   : > { %v1018_v37 = vpop.permute.xlu1 %1017  ;;  %v1438_v0 = vsel %vm1426_vm11, %v1405_v58, %v1176_v6 }
  0xeb   : > { %v1238_v22 = vpop.permute.xlu0 %1237  ;;  %v1471_v31 = vsel %vm1459_vm13, %v1438_v0, %v1208_v16  ;;  %v677_v32 = vsel %vm2348_vm2, 0, %v614_v61  ;;  %v1275_v2 = vsel %vm1261_vm6, %v2553_v57, %v1018_v37 }
  0xec   : > { %v1502_v43 = vsel %vm1492_vm12, %v1469_v14, %v1238_v22  ;;  %1159 = vrot.lane.b32.xlu1 %v967_v56, %s2290_s13  ;;  %v974_v6 = vshll.u32 %v677_v32, 16  ;;  %v972_v40 = vshrl.u32 %v677_v32, 16  ;;  %v985_v1 = vrot.slane %v677_v32, 1 }
  0xed   : > { %1157 = vrot.lane.b32.xlu0 %v964_v63, %s2290_s13  ;;  %2185 = vmatprep.mubr.msk.bf16.mxu0 %vm1568_vm14, %v1502_v43  ;;  %v889_v63 = vsel %vm697_vm4, %v884_v21, %v888_v46 }
  0xee   : > { %v1020_v30 = vpop.permute.xlu1 %1019  ;;  %v976_v45 = vrot.slane %v974_v6, 1  ;;  %v987_v36 = vsel %vm922_vm3, %v985_v1, %v986_v4 }
  0xef   : > { %v1240_v34 = vpop.permute.xlu0 %1239  ;;  %v1277_v57 = vsel %vm1261_vm6, %v2574_v20, %v1020_v30 }
  0xf0   : > { %v1504_v48 = vsel %vm1492_vm12, %v1471_v31, %v1240_v34  ;;  %1191 = vrot.lane.b32.xlu1 %v2930_v9, %s2289_s12 }
  0xf1   : > { %1189 = vrot.lane.b32.xlu0 %v2905_v59, %s2289_s12  ;;  %2186 = vmatmul.mubr.msk.bf16.gmra.mxu0 %vm1568_vm14, %v1504_v48 }
  0xf2   : > { %v1052_v47 = vpop.permute.xlu1 %1051 }
  0xf3   : > { %v1050_v62 = vpop.permute.xlu0 %1049  ;;  %v1310_v37 = vsel %vm1294_vm7, %v1277_v57, %v1052_v47 }
  0xf4   : > { %1223 = vrot.lane.b32.xlu1 %v889_v63, %s2293_s16  ;;  %v1308_v24 = vsel %vm1294_vm7, %v1275_v2, %v1050_v62 }
  0xf5   : > { %1221 = vrot.lane.b32.xlu0 %v877_v54, %s2293_s16 }
  0xf6   : > { %v1084_v8 = vpop.permute.xlu1 %1083 }
  0xf7   : > { %v1082_v42 = vpop.permute.xlu0 %1081  ;;  %v1343_v14 = vsel %vm1327_vm8, %v1310_v37, %v1084_v8 }
  0xf8   : > { %1033 = vrot.lane.b32.xlu1 %v877_v54, %s2287_s10  ;;  %v977_v54 = vor.u32 %v976_v45, %v972_v40 }
  0xf9   : > { %1253 = vrot.lane.b32.xlu0 %v967_v56, %s2291_s14 }
  0xfa   : > { %v1116_v50 = vpop.permute.xlu1 %1115  ;;  %v982_v7 = vsel %vm697_vm4, %v977_v54, %v981_v19 }
  0xfb   : > { %v1114_v52 = vpop.permute.xlu0 %1113  ;;  %v1376_v43 = vsel %vm1360_vm9, %v1343_v14, %v1116_v50 }
  0xfc   : > { %1035 = vrot.lane.b32.xlu1 %v889_v63, %s2287_s10 }
  0xfd   : > { %1255 = vrot.lane.b32.xlu0 %v970_v29, %s2291_s14 }
  0xfe   : > { %v1148_v55 = vpop.permute.xlu1 %1147 }
  0xff   : > { %v1146_v16 = vpop.permute.xlu0 %1145  ;;  %v1409_v58 = vsel %vm1393_vm10, %v1376_v43, %v1148_v55 }
 0x100   : > { %1067 = vrot.lane.b32.xlu1 %v970_v29, %s2286_s9 }
 0x101   : > { %1065 = vrot.lane.b32.xlu0 %v967_v56, %s2286_s9  ;;  %v1341_v56 = vsel %vm1327_vm8, %v1308_v24, %v1082_v42 }
 0x102   : > { %v1180_v17 = vpop.permute.xlu1 %1179  ;;  %v1374_v27 = vsel %vm1360_vm9, %v1341_v56, %v1114_v52 }
 0x103   : > { %v1178_v49 = vpop.permute.xlu0 %1177  ;;  %v1407_v33 = vsel %vm1393_vm10, %v1374_v27, %v1146_v16  ;;  %v1442_v21 = vsel %vm1426_vm11, %v1409_v58, %v1180_v17 }
 0x104   : > { %1099 = vrot.lane.b32.xlu1 %v677_v32, %s2288_s11  ;;  %v1440_v38 = vsel %vm1426_vm11, %v1407_v33, %v1178_v49 }
 0x105   : > { %1097 = vrot.lane.b32.xlu0 %v2930_v9, %s2288_s11 }
 0x106   : > { %v1212_v25 = vpop.permute.xlu1 %1211 }
 0x107   : > { %v1210_v11 = vpop.permute.xlu0 %1209  ;;  %v1475_v0 = vsel %vm1459_vm13, %v1442_v21, %v1212_v25 }
 0x108   : > { %1131 = vrot.lane.b32.xlu1 %v982_v7, %s2292_s15  ;;  %v1473_v22 = vsel %vm1459_vm13, %v1440_v38, %v1210_v11 }
 0x109   : > { %1129 = vrot.lane.b32.xlu0 %v889_v63, %s2292_s15 }
 0x10a   : > { %v1022_v41 = vpop.permute.xlu1 %1021 }
 0x10b   : > { %v1242_v15 = vpop.permute.xlu0 %1241  ;;  %v1279_v26 = vsel %vm1261_vm6, %v2607_v53, %v1022_v41 }
 0x10c   : > { %v1506_v20 = vsel %vm1492_vm12, %v1473_v22, %v1242_v15  ;;  %1163 = vrot.lane.b32.xlu1 %v987_v36, %s2290_s13 }
 0x10d   : > { %1161 = vrot.lane.b32.xlu0 %v970_v29, %s2290_s13  ;;  %2189 = vmatprep.mubr.msk.bf16.mxu0 %vm1568_vm14, %v1506_v20 }
 0x10e   : > { %v1024_v46 = vpop.permute.xlu1 %1023 }
 0x10f   : > { %v1244_v30 = vpop.permute.xlu0 %1243 }
 0x110   : > { %v1508_v39 = vsel %vm1492_vm12, %v1475_v0, %v1244_v30  ;;  %1195 = vrot.lane.b32.xlu1 %v2354_v3, %s2289_s12 }
 0x111   : > { %1193 = vrot.lane.b32.xlu0 %v677_v32, %s2289_s12  ;;  %2190 = vmatmul.mubr.msk.bf16.gmra.mxu0 %vm1568_vm14, %v1508_v39  ;;  %s3098_s12 = scalar_lea.vmem %s3300_s5, %s2144_s27  ;;  %s2115_s27 = sshll.u32 %s3309_s21, 1 }
 0x112   : > { %v1056_v51 = vpop.permute.xlu1 %1055  ;;  %s295_s15 = scalar_lea.vmem %s3301_s6, %s2115_s27 }
 0x113   : > { %v1054_v31 = vpop.permute.xlu0 %1053 }
 0x114   : > { %1227 = vrot.lane.b32.xlu1 %v2399_v28, %s2293_s16  ;;  %v1312_v28 = vsel %vm1294_vm7, %v1279_v26, %v1054_v31 }
 0x115   : > { %1225 = vrot.lane.b32.xlu0 %v982_v7, %s2293_s16 }
 0x116   : > { %v1088_v34 = vpop.permute.xlu1 %1087 }
 0x117   : > { %v1086_v48 = vpop.permute.xlu0 %1085 }
 0x118   : > { %1259 = vrot.lane.b32.xlu1 %v2375_v12, %s2291_s14  ;;  %v1345_v32 = vsel %vm1327_vm8, %v1312_v28, %v1086_v48  ;;  %v1281_v12 = vsel %vm1261_vm6, %v2628_v18, %v1024_v46 }
 0x119   : > { %1257 = vrot.lane.b32.xlu0 %v987_v36, %s2291_s14  ;;  %v1314_v29 = vsel %vm1294_vm7, %v1281_v12, %v1056_v51 }
 0x11a   : > { %v1120_v63 = vpop.permute.xlu1 %1119  ;;  %v1347_v53 = vsel %vm1327_vm8, %v1314_v29, %v1088_v34 }
 0x11b   : > { %v1118_v3 = vpop.permute.xlu0 %1117  ;;  %v1380_v13 = vsel %vm1360_vm9, %v1347_v53, %v1120_v63 }
 0x11c   : > { %v1378_v6 = vsel %vm1360_vm9, %v1345_v32, %v1118_v3 }
 0x11e   : > { %v1152_v47 = vpop.permute.xlu1 %1151 }
 0x11f   : > { %v1150_v61 = vpop.permute.xlu0 %1149  ;;  %v1413_v16 = vsel %vm1393_vm10, %v1380_v13, %v1152_v47 }
 0x120   : > { %v1411_v50 = vsel %vm1393_vm10, %v1378_v6, %v1150_v61 }
 0x122   : > { %v1184_v62 = vpop.permute.xlu1 %1183 }
 0x123   : > { %v1182_v8 = vpop.permute.xlu0 %1181  ;;  %v1446_v18 = vsel %vm1426_vm11, %v1413_v16, %v1184_v62 }
 0x124   : > { %v1444_v10 = vsel %vm1426_vm11, %v1411_v50, %v1182_v8 }
 0x126   : > { %v1216_v5 = vpop.permute.xlu1 %1215 }
 0x127   : > { %v1214_v42 = vpop.permute.xlu0 %1213  ;;  %v1479_v19 = vsel %vm1459_vm13, %v1446_v18, %v1216_v5 }
 0x128   : > { %v1477_v40 = vsel %vm1459_vm13, %v1444_v10, %v1214_v42 }
 0x12a   : > { %v1026_v52 = vpop.permute.xlu1 %1025 }
 0x12b   : > { %v1246_v45 = vpop.permute.xlu0 %1245  ;;  %v1283_v33 = vsel %vm1261_vm6, %v2672_v60, %v1026_v52 }
 0x12c   : > { %v1510_v55 = vsel %vm1492_vm12, %v1477_v40, %v1246_v45 }
 0x12d   : > { %2193 = vmatprep.mubr.msk.bf16.mxu1 %vm1568_vm14, %v1510_v55 }
 0x12e   : > { %v1028_v54 = vpop.permute.xlu1 %1027 }
 0x12f   : > { %v1248_v17 = vpop.permute.xlu0 %1247  ;;  %v1285_v22 = vsel %vm1261_vm6, %v2701_v35, %v1028_v54 }
 0x130   : > { %v1512_v49 = vsel %vm1492_vm12, %v1479_v19, %v1248_v17 }
 0x131   : > { %2194 = vmatmul.mubr.msk.bf16.vlgmr.msra.gmra.mxu1 %vm1568_vm14, %v1512_v49 }
 0x132   : > { %v1060_v2 = vpop.permute.xlu1 %1059 }
 0x133   : > { %v1058_v7 = vpop.permute.xlu0 %1057  ;;  %v1318_v43 = vsel %vm1294_vm7, %v1285_v22, %v1060_v2 }
 0x134   : > { %v1316_v36 = vsel %vm1294_vm7, %v1283_v33, %v1058_v7  ;;  %v3090_v7 = vld [vmem:[%s3299_s4] ss:$0 sm:$0xff] }
 0x136   : > { %v1092_v1 = vpop.permute.xlu1 %1091 }
 0x137   : > { %v1090_v4 = vpop.permute.xlu0 %1089  ;;  %v1351_v60 = vsel %vm1327_vm8, %v1318_v43, %v1092_v1 }
 0x138   : > { %v1349_v38 = vsel %vm1327_vm8, %v1316_v36, %v1090_v4 }
 0x13a   : > { %v1124_v24 = vpop.permute.xlu1 %1123 }
 0x13b   : > { %v1122_v25 = vpop.permute.xlu0 %1121  ;;  %v1384_v0 = vsel %vm1360_vm9, %v1351_v60, %v1124_v24 }
 0x13c   : > { %v1382_v14 = vsel %vm1360_vm9, %v1349_v38, %v1122_v25 }
 0x13e   : > { %v1156_v56 = vpop.permute.xlu1 %1155 }
 0x13f   : > { %v1154_v11 = vpop.permute.xlu0 %1153  ;;  %v1417_v39 = vsel %vm1393_vm10, %v1384_v0, %v1156_v56 }
 0x140   : > { %v1415_v15 = vsel %vm1393_vm10, %v1382_v14, %v1154_v11 }
 0x142   : > { %v1188_v27 = vpop.permute.xlu1 %1187 }
 0x143   : > { %v1186_v57 = vpop.permute.xlu0 %1185  ;;  %v1450_v35 = vsel %vm1426_vm11, %v1417_v39, %v1188_v27 }
 0x144   : > { %v1448_v20 = vsel %vm1426_vm11, %v1415_v15, %v1186_v57 }
 0x146   : > { %v1220_v37 = vpop.permute.xlu1 %1219 }
 0x147   : > { %v1218_v41 = vpop.permute.xlu0 %1217  ;;  %v1483_v31 = vsel %vm1459_vm13, %v1450_v35, %v1220_v37 }
 0x148   : > { %v1481_v21 = vsel %vm1459_vm13, %v1448_v20, %v1218_v41 }
 0x14a   : > { %v1030_v58 = vpop.permute.xlu1 %1029 }
 0x14b   : > { %v1250_v46 = vpop.permute.xlu0 %1249  ;;  %v1287_v42 = vsel %vm1261_vm6, %v2782_v44, %v1030_v58 }
 0x14c   : > { %v1514_v30 = vsel %vm1492_vm12, %v1481_v21, %v1250_v46 }
 0x14d   : > { %2197 = vmatprep.mubr.msk.bf16.mxu1 %vm1568_vm14, %v1514_v30 }
 0x14e   : > { %v1032_v51 = vpop.permute.xlu1 %1031 }
 0x14f   : > { %v1252_v34 = vpop.permute.xlu0 %1251  ;;  %v1289_v52 = vsel %vm1261_vm6, %v2813_v23, %v1032_v51 }
 0x150   : > { %v1516_v48 = vsel %vm1492_vm12, %v1483_v31, %v1252_v34 }
 0x151   : > { %2198 = vmatmul.mubr.msk.bf16.gmra.mxu1 %vm1568_vm14, %v1516_v48 }
 0x152   : > { %v1064_v63 = vpop.permute.xlu1 %1063 }
 0x153   : > { %v1062_v3 = vpop.permute.xlu0 %1061  ;;  %v1322_v40 = vsel %vm1294_vm7, %v1289_v52, %v1064_v63 }
 0x154   : > { %v1320_v6 = vsel %vm1294_vm7, %v1287_v42, %v1062_v3 }
 0x156   : > { %v1096_v47 = vpop.permute.xlu1 %1095 }
 0x157   : > { %v1094_v61 = vpop.permute.xlu0 %1093  ;;  %v1355_v44 = vsel %vm1327_vm8, %v1322_v40, %v1096_v47 }
 0x158   : > { %v1353_v50 = vsel %vm1327_vm8, %v1320_v6, %v1094_v61 }
 0x15a   : > { %v1128_v62 = vpop.permute.xlu1 %1127 }
 0x15b   : > { %v1126_v8 = vpop.permute.xlu0 %1125  ;;  %v1388_v18 = vsel %vm1360_vm9, %v1355_v44, %v1128_v62 }
 0x15c   : > { %v1386_v10 = vsel %vm1360_vm9, %v1353_v50, %v1126_v8 }
 0x15e   : > { %v1160_v26 = vpop.permute.xlu1 %1159 }
 0x15f   : > { %v1158_v28 = vpop.permute.xlu0 %1157  ;;  %v1421_v19 = vsel %vm1393_vm10, %v1388_v18, %v1160_v26 }
 0x160   : > { %v1419_v53 = vsel %vm1393_vm10, %v1386_v10, %v1158_v28 }
 0x162   : > { %v1192_v5 = vpop.permute.xlu1 %1191 }
 0x163   : > { %v1190_v32 = vpop.permute.xlu0 %1189  ;;  %v1454_v23 = vsel %vm1426_vm11, %v1421_v19, %v1192_v5 }
 0x164   : > { %v1452_v45 = vsel %vm1426_vm11, %v1419_v53, %v1190_v32 }
 0x166   : > { %v1224_v12 = vpop.permute.xlu1 %1223 }
 0x167   : > { %v1222_v29 = vpop.permute.xlu0 %1221  ;;  %v1487_v49 = vsel %vm1459_vm13, %v1454_v23, %v1224_v12 }
 0x168   : > { %v1485_v55 = vsel %vm1459_vm13, %v1452_v45, %v1222_v29 }
 0x16a   : > { %v1034_v13 = vpop.permute.xlu1 %1033 }
 0x16b   : > { %v1254_v16 = vpop.permute.xlu0 %1253  ;;  %v1291_v5 = vsel %vm1261_vm6, %v2905_v59, %v1034_v13 }
 0x16c   : > { %v1518_v54 = vsel %vm1492_vm12, %v1485_v55, %v1254_v16 }
 0x16d   : > { %2201 = vmatprep.mubr.msk.bf16.mxu1 %vm1568_vm14, %v1518_v54 }
 0x16e   : > { %v1036_v17 = vpop.permute.xlu1 %1035 }
 0x16f   : > { %v1256_v2 = vpop.permute.xlu0 %1255  ;;  %v1293_v28 = vsel %vm1261_vm6, %v2930_v9, %v1036_v17 }
 0x170   : > { %v1520_v1 = vsel %vm1492_vm12, %v1487_v49, %v1256_v2 }
 0x171   : > { %v2179_v4 = vpop.f32.mrf.mxu0  ;;  %2202 = vmatmul.mubr.msk.bf16.gmra.mxu1 %vm1568_vm14, %v1520_v1 }
 0x172   : > { %v1648_v24 = vadd.f32 %v2179_v4, %v3090_v7  ;;  %v1068_v25 = vpop.permute.xlu1 %1067 }
 0x173   : > { %v1639_v56 = vpop.f32.mrf.mxu0  ;;  %v1066_v11 = vpop.permute.xlu0 %1065  ;;  %v1326_v32 = vsel %vm1294_vm7, %v1293_v28, %v1068_v25 }
 0x174   : > { %1768 = vst.msk [vmem:[%s3098_s12 + $0x10] sm:$0xff] %vm1261_vm6, %v1648_v24  ;;  %v1640_v27 = vadd.f32 %v3090_v7, %v1639_v56  ;;  %v1869_v22 = vmul.f32 %v1648_v24, %v1648_v24  ;;  %v1801_v46 = vsel %vm1261_vm6, %v1648_v24, 0.0  ;;  %v1324_v42 = vsel %vm1294_vm7, %v1291_v5, %v1066_v11 }
 0x175   : > { %v2180_v57 = vpop.f32.mrf.mxu0 }
 0x176   : > { %1766 = vst.msk [vmem:[%s3098_s12] sm:$0xff] %vm1261_vm6, %v1640_v27  ;;  %v1651_v33 = vadd.f32 %v2180_v57, %v3090_v7  ;;  %v1100_v36 = vpop.permute.xlu1 %1099  ;;  %v1867_v41 = vmul.f32 %v1640_v27, %v1640_v27  ;;  %v1798_v15 = vsel %vm1261_vm6, %v1640_v27, 0.0  ;;  %v1902_v31 = vsel %vm1261_vm6, %v1869_v22, 0.0 }
 0x177   : > { %v1642_v37 = vpop.f32.mrf.mxu0  ;;  %v1098_v38 = vpop.permute.xlu0 %1097  ;;  %v1359_v6 = vsel %vm1327_vm8, %v1326_v32, %v1100_v36 }
 0x178   : > { %1769 = vst.msk [vmem:[%s3098_s12 + $0x18] sm:$0xff] %vm1261_vm6, %v1651_v33  ;;  %v1643_v14 = vadd.f32 %v3090_v7, %v1642_v37  ;;  %v1899_v0 = vsel %vm1261_vm6, %v1867_v41, 0.0  ;;  %v1870_v30 = vmul.f32 %v1651_v33, %v1651_v33  ;;  %v1803_v34 = vsel %vm1261_vm6, %v1651_v33, 0.0 }
 0x179   : > { %v1357_v50 = vsel %vm1327_vm8, %v1324_v42, %v1098_v38 }
 0x17a   : > { %1767 = vst.msk [vmem:[%s3098_s12 + $0x8] sm:$0xff] %vm1261_vm6, %v1643_v14  ;;  %v1799_v43 = vsel %vm1261_vm6, %v1643_v14, 0.0  ;;  %v1868_v20 = vmul.f32 %v1643_v14, %v1643_v14  ;;  %v1132_v58 = vpop.permute.xlu1 %1131  ;;  %v1904_v61 = vsel %vm1261_vm6, %v1870_v30, 0.0 }
 0x17b   : > { %v1800_v60 = vadd.f32 %v1799_v43, %v1798_v15  ;;  %v1130_v21 = vpop.permute.xlu0 %1129  ;;  %v1392_v29 = vsel %vm1360_vm9, %v1359_v6, %v1132_v58 }
 0x17c   : > { %v1900_v39 = vsel %vm1261_vm6, %v1868_v20, 0.0  ;;  %v1390_v52 = vsel %vm1360_vm9, %v1357_v50, %v1130_v21 }
 0x17d   : > { %v1802_v35 = vadd.f32 %v1801_v46, %v1800_v60  ;;  %v1901_v51 = vadd.f32 %v1900_v39, %v1899_v0 }
 0x17e   : > { %v1164_v48 = vpop.permute.xlu1 %1163 }
 0x17f   : > { %v1903_v63 = vadd.f32 %v1902_v31, %v1901_v51  ;;  %v1162_v3 = vpop.permute.xlu0 %1161  ;;  %v1804_v47 = vadd.f32 %v1803_v34, %v1802_v35  ;;  %v1425_v9 = vsel %vm1393_vm10, %v1392_v29, %v1164_v48 }
 0x180   : > { %v1423_v53 = vsel %vm1393_vm10, %v1390_v52, %v1162_v3 }
 0x181   : > { %v1905_v62 = vadd.f32 %v1904_v61, %v1903_v63 }
 0x182   : > { %v1196_v8 = vpop.permute.xlu1 %1195 }
 0x183   : > { %v1194_v26 = vpop.permute.xlu0 %1193  ;;  %v1458_v59 = vsel %vm1426_vm11, %v1425_v9, %v1196_v8 }
 0x184   : > { %v1456_v40 = vsel %vm1426_vm11, %v1423_v53, %v1194_v26 }
 0x186   : > { %v1228_v12 = vpop.permute.xlu1 %1227 }
 0x187   : > { %v1226_v10 = vpop.permute.xlu0 %1225  ;;  %v1491_v45 = vsel %vm1459_vm13, %v1458_v59, %v1228_v12 }
 0x188   : > { %v1489_v44 = vsel %vm1459_vm13, %v1456_v40, %v1226_v10 }
 0x18a   : > { %v1260_v13 = vpop.permute.xlu1 %1259 }
 0x18b   : > { %v1524_v55 = vsel %vm1492_vm12, %v1491_v45, %v1260_v13  ;;  %v1258_v16 = vpop.permute.xlu0 %1257 }
 0x18c   : > { %v1522_v18 = vsel %vm1492_vm12, %v1489_v44, %v1258_v16 }
 0x18d   : > { %2205 = vmatprep.mubr.msk.bf16.mxu1 %vm1568_vm14, %v1522_v18 }
 0x18e   : > { %2206 = vmatmul.mubr.msk.bf16.gmra.mxu1 %vm1568_vm14, %v1524_v55 }
 0x191   : > { %v2183_v54 = vpop.f32.mrf.mxu0 }
 0x192   : > { %v1664_v19 = vadd.f32 %v2183_v54, %v3090_v7 }
 0x193   : > { %v1655_v23 = vpop.f32.mrf.mxu0 }
 0x194   : > { %1772 = vst.msk [vmem:[%s3098_s12 + $0x30] sm:$0xff] %vm1261_vm6, %v1664_v19  ;;  %v1656_v17 = vadd.f32 %v3090_v7, %v1655_v23  ;;  %v1873_v57 = vmul.f32 %v1664_v19, %v1664_v19  ;;  %v1809_v38 = vsel %vm1261_vm6, %v1664_v19, 0.0 }
 0x195   : > { %v2184_v49 = vpop.f32.mrf.mxu0 }
 0x196   : > { %1770 = vst.msk [vmem:[%s3098_s12 + $0x20] sm:$0xff] %vm1261_vm6, %v1656_v17  ;;  %v1805_v2 = vsel %vm1261_vm6, %v1656_v17, 0.0  ;;  %v1871_v1 = vmul.f32 %v1656_v17, %v1656_v17  ;;  %v1667_v4 = vadd.f32 %v2184_v49, %v3090_v7  ;;  %v1910_v43 = vsel %vm1261_vm6, %v1873_v57, 0.0 }
 0x197   : > { %v1806_v24 = vadd.f32 %v1805_v2, %v1804_v47  ;;  %v1658_v25 = vpop.f32.mrf.mxu0 }
 0x198   : > { %v1906_v56 = vsel %vm1261_vm6, %v1871_v1, 0.0  ;;  %1773 = vst.msk [vmem:[%s3098_s12 + $0x38] sm:$0xff] %vm1261_vm6, %v1667_v4  ;;  %v1659_v11 = vadd.f32 %v3090_v7, %v1658_v25  ;;  %v1874_v41 = vmul.f32 %v1667_v4, %v1667_v4  ;;  %v1811_v20 = vsel %vm1261_vm6, %v1667_v4, 0.0 }
 0x199   : > { %v1907_v27 = vadd.f32 %v1906_v56, %v1905_v62 }
 0x19a   : > { %1771 = vst.msk [vmem:[%s3098_s12 + $0x28] sm:$0xff] %vm1261_vm6, %v1659_v11  ;;  %v1807_v33 = vsel %vm1261_vm6, %v1659_v11, 0.0  ;;  %v1872_v36 = vmul.f32 %v1659_v11, %v1659_v11  ;;  %v1912_v21 = vsel %vm1261_vm6, %v1874_v41, 0.0 }
 0x19b   : > { %v1808_v37 = vadd.f32 %v1807_v33, %v1806_v24 }
 0x19c   : > { %v1908_v14 = vsel %vm1261_vm6, %v1872_v36, 0.0 }
 0x19d   : > { %v1810_v22 = vadd.f32 %v1809_v38, %v1808_v37  ;;  %v1909_v15 = vadd.f32 %v1908_v14, %v1907_v27 }
 0x19f   : > { %v1911_v58 = vadd.f32 %v1910_v43, %v1909_v15  ;;  %v1812_v60 = vadd.f32 %v1811_v20, %v1810_v22 }
 0x1a1   : > { %v1913_v46 = vadd.f32 %v1912_v21, %v1911_v58 }
 0x1b1   : > { %v2187_v0 = vpop.f32.mrf.mxu0 }
 0x1b2   : > { %v1680_v30 = vadd.f32 %v2187_v0, %v3090_v7 }
 0x1b3   : > { %v1671_v39 = vpop.f32.mrf.mxu0 }
 0x1b4   : > { %1776 = vst.msk [vmem:[%s3098_s12 + $0x50] sm:$0xff] %vm1261_vm6, %v1680_v30  ;;  %v1672_v35 = vadd.f32 %v3090_v7, %v1671_v39  ;;  %v1877_v8 = vmul.f32 %v1680_v30, %v1680_v30  ;;  %v1817_v32 = vsel %vm1261_vm6, %v1680_v30, 0.0 }
 0x1b5   : > { %v2188_v51 = vpop.f32.mrf.mxu0 }
 0x1b6   : > { %1774 = vst.msk [vmem:[%s3098_s12 + $0x40] sm:$0xff] %vm1261_vm6, %v1672_v35  ;;  %v1813_v31 = vsel %vm1261_vm6, %v1672_v35, 0.0  ;;  %v1875_v34 = vmul.f32 %v1672_v35, %v1672_v35  ;;  %v1683_v48 = vadd.f32 %v2188_v51, %v3090_v7  ;;  %v1918_v29 = vsel %vm1261_vm6, %v1877_v8, 0.0 }
 0x1b7   : > { %v1814_v63 = vadd.f32 %v1813_v31, %v1812_v60  ;;  %v1674_v3 = vpop.f32.mrf.mxu0 }
 0x1b8   : > { %v1914_v47 = vsel %vm1261_vm6, %v1875_v34, 0.0  ;;  %1777 = vst.msk [vmem:[%s3098_s12 + $0x58] sm:$0xff] %vm1261_vm6, %v1683_v48  ;;  %v1675_v61 = vadd.f32 %v3090_v7, %v1674_v3  ;;  %v1878_v42 = vmul.f32 %v1683_v48, %v1683_v48  ;;  %v1819_v10 = vsel %vm1261_vm6, %v1683_v48, 0.0 }
 0x1b9   : > { %v1915_v62 = vadd.f32 %v1914_v47, %v1913_v46 }
 0x1ba   : > { %1775 = vst.msk [vmem:[%s3098_s12 + $0x48] sm:$0xff] %vm1261_vm6, %v1675_v61  ;;  %v1815_v26 = vsel %vm1261_vm6, %v1675_v61, 0.0  ;;  %v1876_v28 = vmul.f32 %v1675_v61, %v1675_v61  ;;  %v1920_v53 = vsel %vm1261_vm6, %v1878_v42, 0.0 }
 0x1bb   : > { %v1816_v5 = vadd.f32 %v1815_v26, %v1814_v63 }
 0x1bc   : > { %v1916_v6 = vsel %vm1261_vm6, %v1876_v28, 0.0 }
 0x1bd   : > { %v1818_v12 = vadd.f32 %v1817_v32, %v1816_v5  ;;  %v1917_v50 = vadd.f32 %v1916_v6, %v1915_v62 }
 0x1bf   : > { %v1919_v52 = vadd.f32 %v1918_v29, %v1917_v50  ;;  %v1820_v9 = vadd.f32 %v1819_v10, %v1818_v12 }
 0x1c1   : > { %v1921_v59 = vadd.f32 %v1920_v53, %v1919_v52 }
 0x1d1   : > { %v2191_v40 = vpop.f32.mrf.mxu0 }
 0x1d2   : > { %v1696_v45 = vadd.f32 %v2191_v40, %v3090_v7 }
 0x1d3   : > { %v1687_v13 = vpop.f32.mrf.mxu0 }
 0x1d4   : > { %1780 = vst.msk [vmem:[%s3098_s12 + $0x70] sm:$0xff] %vm1261_vm6, %v1696_v45  ;;  %v1688_v44 = vadd.f32 %v3090_v7, %v1687_v13  ;;  %v1881_v1 = vmul.f32 %v1696_v45, %v1696_v45  ;;  %v1825_v56 = vsel %vm1261_vm6, %v1696_v45, 0.0 }
 0x1d5   : > { %v2192_v55 = vpop.f32.mrf.mxu0 }
 0x1d6   : > { %1778 = vst.msk [vmem:[%s3098_s12 + $0x60] sm:$0xff] %vm1261_vm6, %v1688_v44  ;;  %v1821_v16 = vsel %vm1261_vm6, %v1688_v44, 0.0  ;;  %v1879_v18 = vmul.f32 %v1688_v44, %v1688_v44  ;;  %v1699_v54 = vadd.f32 %v2192_v55, %v3090_v7  ;;  %v1926_v36 = vsel %vm1261_vm6, %v1881_v1, 0.0 }
 0x1d7   : > { %v1822_v19 = vadd.f32 %v1821_v16, %v1820_v9  ;;  %v1690_v23 = vpop.f32.mrf.mxu0 }
 0x1d8   : > { %v1922_v17 = vsel %vm1261_vm6, %v1879_v18, 0.0  ;;  %1781 = vst.msk [vmem:[%s3098_s12 + $0x78] sm:$0xff] %vm1261_vm6, %v1699_v54  ;;  %v1691_v49 = vadd.f32 %v3090_v7, %v1690_v23  ;;  %v1882_v11 = vmul.f32 %v1699_v54, %v1699_v54  ;;  %v1827_v37 = vsel %vm1261_vm6, %v1699_v54, 0.0 }
 0x1d9   : > { %v1923_v2 = vadd.f32 %v1922_v17, %v1921_v59 }
 0x1da   : > { %1779 = vst.msk [vmem:[%s3098_s12 + $0x68] sm:$0xff] %vm1261_vm6, %v1691_v49  ;;  %v1823_v4 = vsel %vm1261_vm6, %v1691_v49, 0.0  ;;  %v1880_v24 = vmul.f32 %v1691_v49, %v1691_v49  ;;  %v1928_v14 = vsel %vm1261_vm6, %v1882_v11, 0.0 }
 0x1db   : > { %v1824_v25 = vadd.f32 %v1823_v4, %v1822_v19 }
 0x1dc   : > { %v1924_v27 = vsel %vm1261_vm6, %v1880_v24, 0.0 }
 0x1dd   : > { %v1826_v57 = vadd.f32 %v1825_v56, %v1824_v25  ;;  %v1925_v33 = vadd.f32 %v1924_v27, %v1923_v2 }
 0x1df   : > { %v1927_v38 = vadd.f32 %v1926_v36, %v1925_v33  ;;  %v1828_v41 = vadd.f32 %v1827_v37, %v1826_v57 }
 0x1e1   : > { %v1929_v22 = vadd.f32 %v1928_v14, %v1927_v38 }
 0x1f1   : > { %v2195_v15 = vpop.f32.mrf.mxu1 }
 0x1f2   : > { %v1712_v43 = vadd.f32 %v2195_v15, %v3090_v7 }
 0x1f3   : > { %v1703_v20 = vpop.f32.mrf.mxu1 }
 0x1f4   : > { %1784 = vst.msk [vmem:[%s3098_s12 + $0x90] sm:$0xff] %vm1261_vm6, %v1712_v43  ;;  %v1704_v58 = vadd.f32 %v3090_v7, %v1703_v20  ;;  %v1885_v34 = vmul.f32 %v1712_v43, %v1712_v43  ;;  %v1833_v47 = vsel %vm1261_vm6, %v1712_v43, 0.0 }
 0x1f5   : > { %v2196_v60 = vpop.f32.mrf.mxu1 }
 0x1f6   : > { %1782 = vst.msk [vmem:[%s3098_s12 + $0x80] sm:$0xff] %vm1261_vm6, %v1704_v58  ;;  %v1829_v21 = vsel %vm1261_vm6, %v1704_v58, 0.0  ;;  %v1883_v46 = vmul.f32 %v1704_v58, %v1704_v58  ;;  %v1715_v0 = vadd.f32 %v2196_v60, %v3090_v7  ;;  %v1934_v28 = vsel %vm1261_vm6, %v1885_v34, 0.0 }
 0x1f7   : > { %v1830_v30 = vadd.f32 %v1829_v21, %v1828_v41  ;;  %v1706_v39 = vpop.f32.mrf.mxu1 }
 0x1f8   : > { %v1930_v35 = vsel %vm1261_vm6, %v1883_v46, 0.0  ;;  %1785 = vst.msk [vmem:[%s3098_s12 + $0x98] sm:$0xff] %vm1261_vm6, %v1715_v0  ;;  %v1707_v51 = vadd.f32 %v3090_v7, %v1706_v39  ;;  %v1886_v61 = vmul.f32 %v1715_v0, %v1715_v0  ;;  %v1835_v5 = vsel %vm1261_vm6, %v1715_v0, 0.0 }
 0x1f9   : > { %v1931_v31 = vadd.f32 %v1930_v35, %v1929_v22 }
 0x1fa   : > { %1783 = vst.msk [vmem:[%s3098_s12 + $0x88] sm:$0xff] %vm1261_vm6, %v1707_v51  ;;  %v1831_v48 = vsel %vm1261_vm6, %v1707_v51, 0.0  ;;  %v1884_v63 = vmul.f32 %v1707_v51, %v1707_v51  ;;  %v1936_v6 = vsel %vm1261_vm6, %v1886_v61, 0.0 }
 0x1fb   : > { %v1832_v3 = vadd.f32 %v1831_v48, %v1830_v30 }
 0x1fc   : > { %v1932_v62 = vsel %vm1261_vm6, %v1884_v63, 0.0 }
 0x1fd   : > { %v1834_v8 = vadd.f32 %v1833_v47, %v1832_v3  ;;  %v1933_v26 = vadd.f32 %v1932_v62, %v1931_v31 }
 0x1ff   : > { %v1935_v32 = vadd.f32 %v1934_v28, %v1933_v26  ;;  %v1836_v42 = vadd.f32 %v1835_v5, %v1834_v8 }
 0x201   : > { %v1937_v12 = vadd.f32 %v1936_v6, %v1935_v32 }
 0x211   : > { %v2199_v50 = vpop.f32.mrf.mxu1 }
 0x212   : > { %v1728_v29 = vadd.f32 %v2199_v50, %v3090_v7 }
 0x213   : > { %v1719_v10 = vpop.f32.mrf.mxu1 }
 0x214   : > { %1788 = vst.msk [vmem:[%s3098_s12 + $0xb0] sm:$0xff] %vm1261_vm6, %v1728_v29  ;;  %v1720_v52 = vadd.f32 %v3090_v7, %v1719_v10  ;;  %v1889_v11 = vmul.f32 %v1728_v29, %v1728_v29  ;;  %v1841_v57 = vsel %vm1261_vm6, %v1728_v29, 0.0 }
 0x215   : > { %v2200_v9 = vpop.f32.mrf.mxu1 }
 0x216   : > { %1786 = vst.msk [vmem:[%s3098_s12 + $0xa0] sm:$0xff] %vm1261_vm6, %v1720_v52  ;;  %v1731_v53 = vadd.f32 %v2200_v9, %v3090_v7  ;;  %v1887_v23 = vmul.f32 %v1720_v52, %v1720_v52  ;;  %v1837_v17 = vsel %vm1261_vm6, %v1720_v52, 0.0  ;;  %v1942_v36 = vsel %vm1261_vm6, %v1889_v11, 0.0 }
 0x217   : > { %v1722_v59 = vpop.f32.mrf.mxu1  ;;  %v1838_v4 = vadd.f32 %v1837_v17, %v1836_v42 }
 0x218   : > { %1789 = vst.msk [vmem:[%s3098_s12 + $0xb8] sm:$0xff] %vm1261_vm6, %v1731_v53  ;;  %v1723_v40 = vadd.f32 %v3090_v7, %v1722_v59  ;;  %v1938_v2 = vsel %vm1261_vm6, %v1887_v23, 0.0  ;;  %v1890_v37 = vmul.f32 %v1731_v53, %v1731_v53  ;;  %v1843_v14 = vsel %vm1261_vm6, %v1731_v53, 0.0 }
 0x219   : > { %v1939_v25 = vadd.f32 %v1938_v2, %v1937_v12 }
 0x21a   : > { %1787 = vst.msk [vmem:[%s3098_s12 + $0xa8] sm:$0xff] %vm1261_vm6, %v1723_v40  ;;  %v1888_v49 = vmul.f32 %v1723_v40, %v1723_v40  ;;  %v1839_v1 = vsel %vm1261_vm6, %v1723_v40, 0.0  ;;  %v1944_v20 = vsel %vm1261_vm6, %v1890_v37, 0.0 }
 0x21b   : > { %v1840_v56 = vadd.f32 %v1839_v1, %v1838_v4 }
 0x21c   : > { %v1940_v24 = vsel %vm1261_vm6, %v1888_v49, 0.0 }
 0x21d   : > { %v1941_v27 = vadd.f32 %v1940_v24, %v1939_v25  ;;  %v1842_v33 = vadd.f32 %v1841_v57, %v1840_v56 }
 0x21f   : > { %v1943_v41 = vadd.f32 %v1942_v36, %v1941_v27  ;;  %v1844_v43 = vadd.f32 %v1843_v14, %v1842_v33 }
 0x221   : > { %v1945_v46 = vadd.f32 %v1944_v20, %v1943_v41 }
 0x231   : > { %v2203_v45 = vpop.f32.mrf.mxu1 }
 0x232   : > { %v1744_v13 = vadd.f32 %v2203_v45, %v3090_v7 }
 0x233   : > { %v1735_v44 = vpop.f32.mrf.mxu1 }
 0x234   : > { %1792 = vst.msk [vmem:[%s3098_s12 + $0xd0] sm:$0xff] %vm1261_vm6, %v1744_v13  ;;  %v1736_v55 = vadd.f32 %v3090_v7, %v1735_v44  ;;  %v1893_v35 = vmul.f32 %v1744_v13, %v1744_v13  ;;  %v1849_v34 = vsel %vm1261_vm6, %v1744_v13, 0.0 }
 0x235   : > { %v2204_v16 = vpop.f32.mrf.mxu1 }
 0x236   : > { %1790 = vst.msk [vmem:[%s3098_s12 + $0xc0] sm:$0xff] %vm1261_vm6, %v1736_v55  ;;  %v1747_v18 = vadd.f32 %v2204_v16, %v3090_v7  ;;  %v1891_v38 = vmul.f32 %v1736_v55, %v1736_v55  ;;  %v1845_v22 = vsel %vm1261_vm6, %v1736_v55, 0.0  ;;  %v1950_v47 = vsel %vm1261_vm6, %v1893_v35, 0.0 }
 0x237   : > { %v1738_v54 = vpop.f32.mrf.mxu1  ;;  %v1846_v21 = vadd.f32 %v1845_v22, %v1844_v43 }
 0x238   : > { %1793 = vst.msk [vmem:[%s3098_s12 + $0xd8] sm:$0xff] %vm1261_vm6, %v1747_v18  ;;  %v1739_v19 = vadd.f32 %v3090_v7, %v1738_v54  ;;  %v1946_v58 = vsel %vm1261_vm6, %v1891_v38, 0.0  ;;  %v1894_v61 = vmul.f32 %v1747_v18, %v1747_v18  ;;  %v1851_v28 = vsel %vm1261_vm6, %v1747_v18, 0.0 }
 0x239   : > { %v1947_v30 = vadd.f32 %v1946_v58, %v1945_v46 }
 0x23a   : > { %1791 = vst.msk [vmem:[%s3098_s12 + $0xc8] sm:$0xff] %vm1261_vm6, %v1739_v19  ;;  %v1892_v15 = vmul.f32 %v1739_v19, %v1739_v19  ;;  %v1847_v60 = vsel %vm1261_vm6, %v1739_v19, 0.0  ;;  %v1952_v50 = vsel %vm1261_vm6, %v1894_v61, 0.0 }
 0x23b   : > { %v1848_v39 = vadd.f32 %v1847_v60, %v1846_v21 }
 0x23c   : > { %v1948_v0 = vsel %vm1261_vm6, %v1892_v15, 0.0 }
 0x23d   : > { %v1949_v51 = vadd.f32 %v1948_v0, %v1947_v30  ;;  %v1850_v63 = vadd.f32 %v1849_v34, %v1848_v39 }
 0x23f   : > { %v1951_v8 = vadd.f32 %v1950_v47, %v1949_v51  ;;  %v1852_v6 = vadd.f32 %v1851_v28, %v1850_v63 }
 0x241   : > { %v1953_v9 = vadd.f32 %v1952_v50, %v1951_v8 }
 0x24e   : > { %v2207_v31 = vpop.f32.mrf.mxu1 }
 0x24f   : > { %v1760_v48 = vadd.f32 %v2207_v31, %v3090_v7 }
 0x250   : > { %v1751_v3 = vpop.f32.mrf.mxu1 }
 0x251   : > { %1796 = vst.msk [vmem:[%s3098_s12 + $0xf0] sm:$0xff] %vm1261_vm6, %v1760_v48  ;;  %v1752_v62 = vadd.f32 %v3090_v7, %v1751_v3  ;;  %v1897_v53 = vmul.f32 %v1760_v48, %v1760_v48  ;;  %v1857_v44 = vsel %vm1261_vm6, %v1760_v48, 0.0 }
 0x252   : > { %v2208_v26 = vpop.f32.mrf.mxu1 }
 0x253   : > { %1794 = vst.msk [vmem:[%s3098_s12 + $0xe0] sm:$0xff] %vm1261_vm6, %v1752_v62  ;;  %v1853_v5 = vsel %vm1261_vm6, %v1752_v62, 0.0  ;;  %v1895_v32 = vmul.f32 %v1752_v62, %v1752_v62  ;;  %v1763_v42 = vadd.f32 %v2208_v26, %v3090_v7 }
 0x254   : > { %v1754_v12 = vpop.f32.mrf.mxu1  ;;  %v1854_v52 = vadd.f32 %v1853_v5, %v1852_v6 }
 0x255   : > { %v1954_v29 = vsel %vm1261_vm6, %v1895_v32, 0.0  ;;  %1797 = vst.msk [vmem:[%s3098_s12 + $0xf8] sm:$0xff] %vm1261_vm6, %v1763_v42  ;;  %v1755_v10 = vadd.f32 %v3090_v7, %v1754_v12  ;;  %v1898_v55 = vmul.f32 %v1763_v42, %v1763_v42  ;;  %v1958_v7 = vsel %vm1261_vm6, %v1897_v53, 0.0 }
 0x256   : > { %v1955_v45 = vadd.f32 %v1954_v29, %v1953_v9  ;;  %v1859_v19 = vsel %vm1261_vm6, %v1763_v42, 0.0 }
 0x257   : > { %1795 = vst.msk [vmem:[%s3098_s12 + $0xe8] sm:$0xff] %vm1261_vm6, %v1755_v10  ;;  %v1855_v59 = vsel %vm1261_vm6, %v1755_v10, 0.0  ;;  %v1896_v40 = vmul.f32 %v1755_v10, %v1755_v10  ;;  %v1960_v49 = vsel %vm1261_vm6, %v1898_v55, 0.0 }
 0x258   : > { %v1856_v13 = vadd.f32 %v1855_v59, %v1854_v52 }
 0x259   : > { %v1956_v16 = vsel %vm1261_vm6, %v1896_v40, 0.0 }
 0x25a   : > { %v1858_v18 = vadd.f32 %v1857_v44, %v1856_v13  ;;  %v1957_v54 = vadd.f32 %v1956_v16, %v1955_v45 }
 0x25c   : > { %v1860_v23 = vadd.f32 %v1859_v19, %v1858_v18  ;;  %v1959_v17 = vadd.f32 %v1958_v7, %v1957_v54 }
 0x25e   : > { %v1861_v2 = vrot.slane %v1860_v23, 4  ;;  %v1961_v1 = vadd.f32 %v1960_v49, %v1959_v17 }
 0x260   : > { %v1862_v4 = vadd.f32 %v1861_v2, %v1860_v23  ;;  %v1962_v24 = vrot.slane %v1961_v1, 4 }
 0x262   : > { %v1863_v25 = vrot.slane %v1862_v4, 2  ;;  %v1963_v56 = vadd.f32 %v1962_v24, %v1961_v1 }
 0x264   : > { %v1864_v11 = vadd.f32 %v1863_v25, %v1862_v4  ;;  %v1964_v27 = vrot.slane %v1963_v56, 2 }
 0x266   : > { %v1865_v57 = vrot.slane %v1864_v11, 1  ;;  %v1965_v33 = vadd.f32 %v1964_v27, %v1963_v56 }
 0x268   : > { %v1966_v36 = vrot.slane %v1965_v33, 1  ;;  %v1866_v37 = vadd.f32 %v1865_v57, %v1864_v11 }
 0x26a   : > { %v1967_v38 = vadd.f32 %v1966_v36, %v1965_v33 }
 0x26c   : > { %v1969_v41 = vsel %vm658_vm0, %v1866_v37, %v1967_v38 }
 0x26d   : > { %1971 = vst.msk [vmem:[%s295_s15] sm:$0x3] %vm1970_vm15, %v1969_v41 }
 0x26e PF: > { %s17_s23 = sadd.s32 1, %s2283_s23   ;;  %s3304_s21 = smov %s2279_s22 }
 0x26f   : > { %p14_p5 = scmp.ge.s32.totalorder %s17_s23, 4   ;;  %s3305_s22 = smov %s3307_s24 }
 0x271   :  { %16 = sbr.rel (!%p14_p5) target bundleno = 2 (0x2), region = 85 }

// kernel: conv_block_forward.3
= control target key start
LH: loop header
LB: loop body
LE: loop exit
PB: predicated region body
PF: predicated region fallthrough
CT: control target
= control target key end

     0   :  { %s2173_s21 = smov 0   ;;  %s2175_s22 = smov 0   ;;  %s2966_s0 = inlined_call_operand.vmem [shape: f32[2,16,16,4], index: 0, kind: input, shape index: {}]   ;;  %s2967_s1 = inlined_call_operand.vmem [shape: f32[1,4], index: 1, kind: input, shape index: {}]   ;;  %s2968_s2 = inlined_call_operand.vmem [shape: f32[1,4], index: 2, kind: input, shape index: {}]   ;;  %s2969_s3 = inlined_call_operand.vmem [shape: bf16[36,8], index: 3, kind: input, shape index: {}]   ;;  %s2970_s4 = inlined_call_operand.vmem [shape: f32[1,8], index: 4, kind: input, shape index: {}]   ;;  %s2971_s5 = inlined_call_operand.vmem [shape: f32[2,16,16,8], index: 5, kind: output, shape index: {0}]   ;;  %s2972_s6 = inlined_call_operand.vmem [shape: f32[2,1,2,8], index: 6, kind: output, shape index: {1}]  }
   0x1   :  { %s2177_s1 = smov 0  }
   0x2 LB: > { %s29_s2 = sadd.s32 1, %s2123_s22  ;;  %p1972_p0 = scmp.ge.s32.totalorder %s2127_s1, 1  ;;  %s2127_s1 = sphi %s2177_s1, %s17_s1   ;;  %s2123_s22 = sphi %s2175_s22, %s2976_s22   ;;  %s2119_s21 = sphi %s2173_s21, %s2975_s21  }
   0x3   : > { %p31_p1 = scmp.ge.s32.totalorder %s29_s2, 2  ;;  %p231_p2 = scmp.lt.s32.totalorder %s2127_s1, 3 }
   0x5   : > { %s2978_s2 = smov (%p31_p1, %s29_s2), 0  ;;  %p232_p3 = pnand %p1972_p0, %p231_p2 }
   0x6   : > { %p273_p4 = scmp.lt.s32.totalorder (!%p232_p3), %s2119_s21, 1  ;;  %s2130_s27 = smov (!%p232_p3), 8  }
   0x7   : > { %235 = sbr.rel (%p232_p3) target bundleno = 616 (0x268), region = 40  ;;  %s2131_s28 = smov (!%p232_p3), 4  }
   0x8   : > { %s2132_s29 = smov (!%p232_p3), 12   ;;  %s2133_s30 = smov (!%p232_p3), 24  }
   0x9   : > { %s2134_s7 = smov (!%p232_p3), 20   ;;  %s2135_s8 = smov (!%p232_p3), 16  }
   0xa   : > { %s2136_s9 = smov (!%p232_p3), 28   ;;  %s2137_s14 = smov (!%p232_p3), 32  }
   0xc   : > { %vm536_vm0 = vcmask 1040384   ;;  %vm537_vm1 = vsmask.f32 256  ;;  %v2129_v0 = vmov 0   ;;  %vm800_vm3 = vcmask 1046528   ;;  %s2980_s21 = smov (!%p273_p4, %s2119_s21), 1 }
   0xd   : > { %v377_v1 = vrot.slane %v2129_v0, 7  ;;  %vm2192_vm2 = vmand %vm536_vm0, %vm537_vm1  ;;  %s2002_s23 = sshll.u32 %s2980_s21, 8  ;;  %vm575_vm4 = vsmask.f32 7424  ;;  %vm1463_vm5 = vcmask 1041408   ;;  %vm1139_vm6 = vcmask 31744  }
   0xe   : > { %s2216_s26 = scalar_lea.vmem %s2966_s0, %s2002_s23  ;;  %vm1172_vm7 = vcmask 64512   ;;  %vm1205_vm8 = vcmask 97280   ;;  %vm1238_vm9 = vcmask 130048   ;;  %vm1271_vm10 = vcmask 162816   ;;  %s2769_s24 = scalar_lea.vmem %s2971_s5, %s2002_s23 }
   0xf   : > { %v2198_v3 = vsel %vm2192_vm2, 0, %v377_v1  ;;  %v557_v4 = vsel %vm2192_vm2, %v377_v1, 0  ;;  %v302_v13 = vld [vmem:[%s2216_s26 + $0x10] sm:$0xff]  ;;  %v303_v14 = vld [vmem:[%s2216_s26 + $0x18] sm:$0xff]  ;;  %v300_v15 = vld [vmem:[%s2216_s26] sm:$0xff]  ;;  %vm1304_vm11 = vcmask 195584  }
  0x10   : > { %v801_v5 = vrot.slane %v2198_v3, 1  ;;  %v802_v6 = vrot.slane %v557_v4, 1  ;;  %v577_v7 = vshrl.u32 %v2198_v3, 16  ;;  %v579_v8 = vshll.u32 %v2198_v3, 16  ;;  %v301_v18 = vld [vmem:[%s2216_s26 + $0x8] sm:$0xff]  ;;  %v304_v19 = vld [vmem:[%s2216_s26 + $0x20] sm:$0xff] }
  0x11   : > { %v584_v9 = vshll.u32 %v557_v4, 16  ;;  %v333_v17 = vpack.c.bf16 %v303_v14, %v302_v13  ;;  %v305_v20 = vld [vmem:[%s2216_s26 + $0x28] sm:$0xff]  ;;  %v332_v21 = vpack.c.bf16 %v301_v18, %v300_v15  ;;  %v306_v48 = vld [vmem:[%s2216_s26 + $0x30] sm:$0xff]  ;;  %v307_v49 = vld [vmem:[%s2216_s26 + $0x38] sm:$0xff]  ;;  %vm1337_vm12 = vcmask 228352   ;;  %s1977_s23 = sshll.u32 %s2980_s21, 1 }
  0x12   : > { %v2209_v10 = vsel %vm800_vm3, %v801_v5, %v802_v6  ;;  %v581_v11 = vrot.slane %v579_v8, 1  ;;  %v334_v22 = vpack.c.bf16 %v305_v20, %v304_v19  ;;  %v335_v60 = vpack.c.bf16 %v307_v49, %v306_v48  ;;  %v308_v13 = vld [vmem:[%s2216_s26 + $0x40] sm:$0xff]  ;;  %v309_v14 = vld [vmem:[%s2216_s26 + $0x48] sm:$0xff]  ;;  %v2102_v18 = vld [vmem:[%s2969_s3 + $0x10] ss:$0 sps:$4 sm:$0x33]  }
  0x13   : > { %915 = vrot.lane.b32.xlu1 %v2209_v10, %s2130_s27  ;;  %v586_v12 = vrot.slane %v584_v9, 1  ;;  %v389_v24 = vshrl.u32 %v333_v17, 16  ;;  %v392_v25 = vshll.u32 %v333_v17, 16  ;;  %v382_v26 = vshrl.u32 %v332_v21, 16  ;;  %2067 = vmatprep.subr.msk.bf16.mxu0 %vm1463_vm5, %v2102_v18 }
  0x14   : > { %v582_v16 = vor.u32 %v581_v11, %v577_v7  ;;  %v385_v27 = vshll.u32 %v332_v21, 16  ;;  %v396_v28 = vshrl.u32 %v334_v22, 16  ;;  %v399_v29 = vshll.u32 %v334_v22, 16  ;;  %2068 = vmatprep.subr.msk.bf16.mxu1 %vm1463_vm5, %v2102_v18 }
  0x15   : > { %v391_v30 = vrot.slane %v389_v24, 7  ;;  %v384_v31 = vrot.slane %v382_v26, 7  ;;  %v403_v6 = vshrl.u32 %v335_v60, 16  ;;  %v336_v17 = vpack.c.bf16 %v309_v14, %v308_v13  ;;  %v2103_v24 = vld [vmem:[%s2969_s3 + $0x8] sm:$0xff]  }
  0x16   : > { %v2227_v23 = vsel %vm575_vm4, %v582_v16, %v586_v12  ;;  %v398_v32 = vrot.slane %v396_v28, 7  ;;  %v406_v12 = vshll.u32 %v335_v60, 16  ;;  %v1465_v26 = vsel %vm1463_vm5, %v2102_v18, 0  ;;  %v313_v60 = vld [vmem:[%s2216_s26 + $0x68] sm:$0xff] }
  0x17   : > { %883 = vrot.lane.b32.xlu0 %v2227_v23, %s2131_s28  ;;  %v394_v33 = vor.u32 %v392_v25, %v391_v30  ;;  %v387_v34 = vor.u32 %v385_v27, %v384_v31  ;;  %v558_v36 = vsel %vm2192_vm2, %v384_v31, 0  ;;  %v559_v39 = vsel %vm2192_vm2, %v391_v30, 0  ;;  %2024 = vmatpush3.bf16.msra.mxu0 %v1465_v26  ;;  %v2104_v31 = vld [vmem:[%s2969_s3] sm:$0xff]  }
  0x18   : > { %v401_v35 = vor.u32 %v399_v29, %v398_v32  ;;  %v805_v42 = vrot.slane %v558_v36, 1  ;;  %v596_v45 = vshll.u32 %v558_v36, 16  ;;  %v808_v51 = vrot.slane %v559_v39, 1  ;;  %2025 = vmatprep.subr.bf16.mxu0 %v2103_v24  ;;  %2064 = vmatpush3.bf16.msra.mxu1 %v1465_v26 }
  0x19   : > { %v2235_v37 = vsel %vm2192_vm2, 0, %v394_v33  ;;  %v2241_v38 = vsel %vm2192_vm2, 0, %v387_v34  ;;  %v608_v52 = vshll.u32 %v559_v39, 16  ;;  %v560_v59 = vsel %vm2192_vm2, %v398_v32, 0  ;;  %2062 = vmatprep.subr.bf16.mxu1 %v2103_v24 }
  0x1a   : > { %949 = vrot.lane.b32.xlu1 %v2235_v37, %s2132_s29  ;;  %v2249_v40 = vsel %vm2192_vm2, 0, %v401_v35  ;;  %v804_v41 = vrot.slane %v2241_v38, 1  ;;  %v591_v43 = vshll.u32 %v2241_v38, 16  ;;  %v589_v44 = vshrl.u32 %v2241_v38, 16 }
  0x1b   : > { %947 = vrot.lane.b32.xlu0 %v2241_v38, %s2132_s29  ;;  %v603_v46 = vshll.u32 %v2235_v37, 16  ;;  %v807_v50 = vrot.slane %v2235_v37, 1  ;;  %v601_v54 = vshrl.u32 %v2235_v37, 16  ;;  %v615_v56 = vshll.u32 %v2249_v40, 16  ;;  %2026 = vmatpush3.bf16.msra.mxu0 %v2103_v24 }
  0x1c   : > { %v593_v47 = vrot.slane %v591_v43, 1  ;;  %v806_v53 = vsel %vm800_vm3, %v804_v41, %v805_v42  ;;  %v598_v58 = vrot.slane %v596_v45, 1  ;;  %v610_v62 = vrot.slane %v608_v52, 1  ;;  %2027 = vmatprep.subr.bf16.mxu0 %v2104_v31  ;;  %2065 = vmatpush3.bf16.msra.mxu1 %v2103_v24  ;;  %v310_v42 = vld [vmem:[%s2216_s26 + $0x50] sm:$0xff]  ;;  %v311_v43 = vld [vmem:[%s2216_s26 + $0x58] sm:$0xff] }
  0x1d   : > { %v605_v55 = vrot.slane %v603_v46, 1  ;;  %v809_v61 = vsel %vm800_vm3, %v807_v50, %v808_v51  ;;  %v613_v0 = vshrl.u32 %v2249_v40, 16  ;;  %v617_v1 = vrot.slane %v615_v56, 1  ;;  %2063 = vmatprep.subr.bf16.mxu1 %v2104_v31 }
  0x1e   : > { %1045 = vrot.lane.b32.xlu1 %v2249_v40, %s2133_s30  ;;  %v594_v57 = vor.u32 %v593_v47, %v589_v44  ;;  %v620_v4 = vshll.u32 %v560_v59, 16  ;;  %v405_v11 = vrot.slane %v403_v6, 7  ;;  %v810_v19 = vrot.slane %v2249_v40, 1 }
  0x1f   : > { %1043 = vrot.lane.b32.xlu0 %v2235_v37, %s2133_s30  ;;  %v606_v63 = vor.u32 %v605_v55, %v601_v54  ;;  %v618_v8 = vor.u32 %v617_v1, %v613_v0  ;;  %v811_v20 = vrot.slane %v560_v59, 1  ;;  %v410_v22 = vshrl.u32 %v336_v17, 16  ;;  %2028 = vmatpush3.bf16.msra.mxu0 %v2104_v31  ;;  %v312_v59 = vld [vmem:[%s2216_s26 + $0x60] sm:$0xff] }
  0x20   : > { %v599_v5 = vsel %vm575_vm4, %v594_v57, %v598_v58  ;;  %v622_v9 = vrot.slane %v620_v4, 1  ;;  %v408_v16 = vor.u32 %v406_v12, %v405_v11  ;;  %v561_v28 = vsel %vm2192_vm2, %v405_v11, 0  ;;  %2066 = vmatpush3.bf16.msra.mxu1 %v2104_v31 }
  0x21   : > { %v611_v7 = vsel %vm575_vm4, %v606_v63, %v610_v62  ;;  %v812_v27 = vsel %vm800_vm3, %v810_v19, %v811_v20  ;;  %v412_v29 = vrot.slane %v410_v22, 7  ;;  %v413_v30 = vshll.u32 %v336_v17, 16  ;;  %v314_v19 = vld [vmem:[%s2216_s26 + $0x70] sm:$0xff]  ;;  %v315_v20 = vld [vmem:[%s2216_s26 + $0x78] sm:$0xff] }
  0x22   : > { %917 = vrot.lane.b32.xlu1 %v806_v53, %s2130_s27  ;;  %v623_v15 = vsel %vm575_vm4, %v618_v8, %v622_v9  ;;  %v2288_v21 = vsel %vm2192_vm2, 0, %v408_v16  ;;  %v632_v34 = vshll.u32 %v561_v28, 16  ;;  %v814_v46 = vrot.slane %v561_v28, 1 }
  0x23   : > { %1011 = vrot.lane.b32.xlu0 %v806_v53, %s2134_s7  ;;  %v627_v25 = vshll.u32 %v2288_v21, 16  ;;  %v625_v32 = vshrl.u32 %v2288_v21, 16  ;;  %v415_v35 = vor.u32 %v413_v30, %v412_v29  ;;  %v813_v45 = vrot.slane %v2288_v21, 1 }
  0x24   : > { %v634_v39 = vrot.slane %v632_v34, 1  ;;  %v562_v48 = vsel %vm2192_vm2, %v412_v29, 0  ;;  %v337_v49 = vpack.c.bf16 %v311_v43, %v310_v42  ;;  %v338_v63 = vpack.c.bf16 %v313_v60, %v312_v59  ;;  %v316_v42 = vld [vmem:[%s2216_s26 + $0x80] sm:$0xff]  ;;  %v317_v43 = vld [vmem:[%s2216_s26 + $0x88] sm:$0xff] }
  0x25   : > { %v629_v33 = vrot.slane %v627_v25, 1  ;;  %v2309_v41 = vsel %vm2192_vm2, 0, %v415_v35  ;;  %v815_v50 = vsel %vm800_vm3, %v813_v45, %v814_v46  ;;  %v644_v53 = vshll.u32 %v562_v48, 16 }
  0x26   : > { %1013 = vrot.lane.b32.xlu1 %v809_v61, %s2134_s7  ;;  %v639_v47 = vshll.u32 %v2309_v41, 16  ;;  %v637_v51 = vshrl.u32 %v2309_v41, 16  ;;  %v417_v54 = vshrl.u32 %v337_v49, 16  ;;  %v420_v58 = vshll.u32 %v337_v49, 16 }
  0x27   : > { %885 = vrot.lane.b32.xlu0 %v599_v5, %s2131_s28  ;;  %v630_v36 = vor.u32 %v629_v33, %v625_v32  ;;  %v646_v56 = vrot.slane %v644_v53, 1  ;;  %v816_v0 = vrot.slane %v2309_v41, 1  ;;  %v817_v1 = vrot.slane %v562_v48, 1 }
  0x28   : > { %v641_v52 = vrot.slane %v639_v47, 1  ;;  %v419_v57 = vrot.slane %v417_v54, 7  ;;  %v427_v11 = vshll.u32 %v338_v63, 16  ;;  %v339_v28 = vpack.c.bf16 %v315_v20, %v314_v19 }
  0x29   : > { %v635_v44 = vsel %vm575_vm4, %v630_v36, %v634_v39  ;;  %v340_v46 = vpack.c.bf16 %v317_v43, %v316_v42  ;;  %vm1370_vm13 = vcmask 261120   ;;  %vm1430_vm14 = vcmask 293888  }
  0x2a   : > { %981 = vrot.lane.b32.xlu1 %v611_v7, %s2135_s8  ;;  %v642_v55 = vor.u32 %v641_v52, %v637_v51  ;;  %v422_v62 = vor.u32 %v420_v58, %v419_v57  ;;  %v563_v8 = vsel %vm2192_vm2, %v419_v57, 0  ;;  %v431_v33 = vshrl.u32 %v339_v28, 16 }
  0x2b   : > { %979 = vrot.lane.b32.xlu0 %v599_v5, %s2135_s8  ;;  %v424_v5 = vshrl.u32 %v338_v63, 16  ;;  %v656_v14 = vshll.u32 %v563_v8, 16  ;;  %v820_v25 = vrot.slane %v563_v8, 1  ;;  %v434_v39 = vshll.u32 %v339_v28, 16  ;;  %v318_v63 = vld [vmem:[%s2216_s26 + $0x90] sm:$0xff] }
  0x2c   : > { %v2340_v4 = vsel %vm2192_vm2, 0, %v422_v62  ;;  %v433_v36 = vrot.slane %v431_v33, 7  ;;  %vm1832_vm15 = vcmask 58368  }
  0x2d   : > { %v651_v6 = vshll.u32 %v2340_v4, 16  ;;  %v426_v9 = vrot.slane %v424_v5, 7  ;;  %v649_v12 = vshrl.u32 %v2340_v4, 16  ;;  %v658_v17 = vrot.slane %v656_v14, 1 }
  0x2e   : > { %1077 = vrot.lane.b32.xlu1 %v623_v15, %s2136_s9  ;;  %v819_v24 = vrot.slane %v2340_v4, 1  ;;  %v436_v45 = vor.u32 %v434_v39, %v433_v36  ;;  %v565_v53 = vsel %vm2192_vm2, %v433_v36, 0 }
  0x2f   : > { %1075 = vrot.lane.b32.xlu0 %v611_v7, %s2136_s9  ;;  %v653_v13 = vrot.slane %v651_v6, 1  ;;  %v680_v58 = vshll.u32 %v565_v53, 16  ;;  %v826_v6 = vrot.slane %v565_v53, 1 }
  0x30   : > { %v821_v29 = vsel %vm800_vm3, %v819_v24, %v820_v25  ;;  %v2386_v49 = vsel %vm2192_vm2, 0, %v436_v45  ;;  %v320_v25 = vld [vmem:[%s2216_s26 + $0xa0] sm:$0xff] }
  0x31   : > { %v654_v16 = vor.u32 %v653_v13, %v649_v12  ;;  %v675_v51 = vshll.u32 %v2386_v49, 16  ;;  %v825_v5 = vrot.slane %v2386_v49, 1 }
  0x32   : > { %887 = vrot.lane.b32.xlu1 %v611_v7, %s2131_s28  ;;  %v818_v7 = vsel %vm800_vm3, %v816_v0, %v817_v1  ;;  %v319_v0 = vld [vmem:[%s2216_s26 + $0x98] sm:$0xff] }
  0x33   : > { %1107 = vrot.lane.b32.xlu0 %v809_v61, %s2137_s14  ;;  %v659_v22 = vsel %vm575_vm4, %v654_v16, %v658_v17  ;;  %v677_v57 = vrot.slane %v675_v51, 1 }
  0x36   : > { %889 = vrot.lane.b32.xlu1 %v623_v15, %s2131_s28 }
  0x37   : > { %1109 = vrot.lane.b32.xlu0 %v812_v27, %s2137_s14 }
  0x3a   : > { %921 = vrot.lane.b32.xlu1 %v812_v27, %s2130_s27 }
  0x3b   : > { %919 = vrot.lane.b32.xlu0 %v809_v61, %s2130_s27  ;;  %v647_v61 = vsel %vm575_vm4, %v642_v55, %v646_v56  ;;  %v441_v55 = vshll.u32 %v340_v46, 16  ;;  %v673_v56 = vshrl.u32 %v2386_v49, 16 }
  0x3d   : > { %v678_v60 = vor.u32 %v677_v57, %v673_v56 }
  0x3e   : > { %953 = vrot.lane.b32.xlu1 %v2288_v21, %s2132_s29 }
  0x3f   : > { %951 = vrot.lane.b32.xlu0 %v2249_v40, %s2132_s29 }
  0x42   : > { %985 = vrot.lane.b32.xlu1 %v635_v44, %s2135_s8 }
  0x43   : > { %983 = vrot.lane.b32.xlu0 %v623_v15, %s2135_s8  ;;  %v429_v15 = vor.u32 %v427_v11, %v426_v9  ;;  %v827_v11 = vsel %vm800_vm3, %v825_v5, %v826_v6  ;;  %v322_v6 = vld [vmem:[%s2216_s26 + $0xb0] sm:$0xff] }
  0x45   : > { %v2355_v18 = vsel %vm2192_vm2, 0, %v429_v15 }
  0x46   : > { %1017 = vrot.lane.b32.xlu1 %v815_v50, %s2134_s7  ;;  %v663_v26 = vshll.u32 %v2355_v18, 16  ;;  %v661_v30 = vshrl.u32 %v2355_v18, 16  ;;  %v822_v47 = vrot.slane %v2355_v18, 1 }
  0x47   : > { %1015 = vrot.lane.b32.xlu0 %v812_v27, %s2134_s7  ;;  %v564_v27 = vsel %vm2192_vm2, %v426_v9, 0  ;;  %v341_v9 = vpack.c.bf16 %v319_v0, %v318_v63 }
  0x48   : > { %v665_v31 = vrot.slane %v663_v26, 1  ;;  %v668_v32 = vshll.u32 %v564_v27, 16  ;;  %v823_v48 = vrot.slane %v564_v27, 1  ;;  %v321_v26 = vld [vmem:[%s2216_s26 + $0xa8] sm:$0xff] }
  0x49   : > { %v445_v15 = vshrl.u32 %v341_v9, 16  ;;  %v448_v24 = vshll.u32 %v341_v9, 16 }
  0x4a   : > { %1049 = vrot.lane.b32.xlu1 %v2309_v41, %s2133_s30  ;;  %v666_v34 = vor.u32 %v665_v31, %v661_v30  ;;  %v670_v35 = vrot.slane %v668_v32, 1  ;;  %v824_v52 = vsel %vm800_vm3, %v822_v47, %v823_v48  ;;  %v342_v30 = vpack.c.bf16 %v321_v26, %v320_v25 }
  0x4b   : > { %1047 = vrot.lane.b32.xlu0 %v2288_v21, %s2133_s30 }
  0x4c   : > { %v452_v36 = vshrl.u32 %v342_v30, 16  ;;  %v455_v47 = vshll.u32 %v342_v30, 16 }
  0x4e   : > { %1081 = vrot.lane.b32.xlu1 %v647_v61, %s2136_s9 }
  0x4f   : > { %1079 = vrot.lane.b32.xlu0 %v635_v44, %s2136_s9 }
  0x52   : > { %891 = vrot.lane.b32.xlu1 %v635_v44, %s2131_s28  ;;  %v671_v44 = vsel %vm575_vm4, %v666_v34, %v670_v35 }
  0x53   : > { %1111 = vrot.lane.b32.xlu0 %v815_v50, %s2137_s14 }
  0x56   : > { %893 = vrot.lane.b32.xlu1 %v647_v61, %s2131_s28 }
  0x57   : > { %1113 = vrot.lane.b32.xlu0 %v818_v7, %s2137_s14 }
  0x5a   : > { %925 = vrot.lane.b32.xlu1 %v818_v7, %s2130_s27 }
  0x5b   : > { %923 = vrot.lane.b32.xlu0 %v815_v50, %s2130_s27  ;;  %v438_v50 = vshrl.u32 %v340_v46, 16  ;;  %v454_v46 = vrot.slane %v452_v36, 7 }
  0x5d   : > { %v440_v54 = vrot.slane %v438_v50, 7 }
  0x5e   : > { %957 = vrot.lane.b32.xlu1 %v2340_v4, %s2132_s29 }
  0x5f   : > { %955 = vrot.lane.b32.xlu0 %v2309_v41, %s2132_s29  ;;  %v443_v59 = vor.u32 %v441_v55, %v440_v54  ;;  %v566_v8 = vsel %vm2192_vm2, %v440_v54, 0  ;;  %v457_v54 = vor.u32 %v455_v47, %v454_v46 }
  0x60   : > { %v692_v14 = vshll.u32 %v566_v8, 16  ;;  %v829_v34 = vrot.slane %v566_v8, 1 }
  0x61   : > { %v2401_v62 = vsel %vm2192_vm2, 0, %v443_v59  ;;  %v2463_v0 = vsel %vm2192_vm2, 0, %v457_v54 }
  0x62   : > { %989 = vrot.lane.b32.xlu1 %v659_v22, %s2135_s8  ;;  %v685_v12 = vshrl.u32 %v2401_v62, 16  ;;  %v694_v20 = vrot.slane %v692_v14, 1  ;;  %v828_v33 = vrot.slane %v2401_v62, 1  ;;  %v711_v14 = vshll.u32 %v2463_v0, 16 }
  0x63   : > { %987 = vrot.lane.b32.xlu0 %v647_v61, %s2135_s8  ;;  %v682_v61 = vrot.slane %v680_v58, 1  ;;  %v709_v26 = vshrl.u32 %v2463_v0, 16 }
  0x65   : > { %v683_v1 = vsel %vm575_vm4, %v678_v60, %v682_v61 }
  0x66   : > { %1021 = vrot.lane.b32.xlu1 %v821_v29, %s2134_s7 }
  0x67   : > { %1019 = vrot.lane.b32.xlu0 %v818_v7, %s2134_s7  ;;  %v687_v7 = vshll.u32 %v2401_v62, 16 }
  0x69   : > { %v689_v13 = vrot.slane %v687_v7, 1  ;;  %v323_v7 = vld [vmem:[%s2216_s26 + $0xb8] sm:$0xff] }
  0x6a   : > { %1053 = vrot.lane.b32.xlu1 %v2355_v18, %s2133_s30 }
  0x6b   : > { %1051 = vrot.lane.b32.xlu0 %v2340_v4, %s2133_s30  ;;  %v690_v19 = vor.u32 %v689_v13, %v685_v12 }
  0x6d   : > { %v2427_v27 = vsel %vm575_vm4, %v690_v19, %v694_v20  ;;  %v343_v19 = vpack.c.bf16 %v323_v7, %v322_v6 }
  0x6e   : > { %1085 = vrot.lane.b32.xlu1 %v671_v44, %s2136_s9 }
  0x6f   : > { %1083 = vrot.lane.b32.xlu0 %v659_v22, %s2136_s9 }
  0x72   : > { %895 = vrot.lane.b32.xlu1 %v659_v22, %s2131_s28  ;;  %v447_v22 = vrot.slane %v445_v15, 7 }
  0x73   : > { %1115 = vrot.lane.b32.xlu0 %v821_v29, %s2137_s14 }
  0x74   : > { %v567_v45 = vsel %vm2192_vm2, %v447_v22, 0 }
  0x76   : > { %897 = vrot.lane.b32.xlu1 %v671_v44, %s2131_s28 }
  0x77   : > { %1117 = vrot.lane.b32.xlu0 %v824_v52, %s2137_s14 }
  0x7a   : > { %929 = vrot.lane.b32.xlu1 %v824_v52, %s2130_s27 }
  0x7b   : > { %927 = vrot.lane.b32.xlu0 %v821_v29, %s2130_s27  ;;  %v450_v29 = vor.u32 %v448_v24, %v447_v22 }
  0x7d   : > { %v2437_v35 = vsel %vm2192_vm2, 0, %v450_v29 }
  0x7e   : > { %961 = vrot.lane.b32.xlu1 %v2386_v49, %s2132_s29  ;;  %v699_v42 = vshll.u32 %v2437_v35, 16  ;;  %v697_v50 = vshrl.u32 %v2437_v35, 16  ;;  %v831_v9 = vrot.slane %v2437_v35, 1 }
  0x7f   : > { %959 = vrot.lane.b32.xlu0 %v2355_v18, %s2132_s29 }
  0x80   : > { %v701_v51 = vrot.slane %v699_v42, 1 }
  0x82   : > { %993 = vrot.lane.b32.xlu1 %v683_v1, %s2135_s8  ;;  %v702_v59 = vor.u32 %v701_v51, %v697_v50  ;;  %v324_v50 = vld [vmem:[%s2216_s26 + $0xc0] sm:$0xff] }
  0x83   : > { %991 = vrot.lane.b32.xlu0 %v671_v44, %s2135_s8  ;;  %v2443_v44 = vsel %vm800_vm3, %v828_v33, %v829_v34 }
  0x85   : > { %v916_v16 = vpop.permute.xlu1 %915 }
  0x86   : > { %1025 = vrot.lane.b32.xlu1 %v827_v11, %s2134_s7 }
  0x87   : > { %1023 = vrot.lane.b32.xlu0 %v824_v52, %s2134_s7  ;;  %v704_v52 = vshll.u32 %v567_v45, 16 }
  0x89   : > { %v884_v17 = vpop.permute.xlu0 %883  ;;  %v706_v60 = vrot.slane %v704_v52, 1 }
  0x8a   : > { %1057 = vrot.lane.b32.xlu1 %v2401_v62, %s2133_s30  ;;  %v1141_v55 = vsel %vm1139_vm6, %v2198_v3, %v884_v17  ;;  %v568_v17 = vsel %vm2192_vm2, %v454_v46, 0  ;;  %v462_v46 = vshll.u32 %v343_v19, 16 }
  0x8b   : > { %1055 = vrot.lane.b32.xlu0 %v2386_v49, %s2133_s30  ;;  %v1174_v61 = vsel %vm1172_vm7, %v1141_v55, %v916_v16  ;;  %v707_v13 = vsel %vm575_vm4, %v702_v59, %v706_v60  ;;  %v716_v29 = vshll.u32 %v568_v17, 16 }
  0x8c   : > { %v950_v28 = vpop.permute.xlu1 %949 }
  0x8d   : > { %v948_v31 = vpop.permute.xlu0 %947  ;;  %v718_v42 = vrot.slane %v716_v29, 1 }
  0x8e   : > { %1089 = vrot.lane.b32.xlu1 %v2427_v27, %s2136_s9 }
  0x8f   : > { %1087 = vrot.lane.b32.xlu0 %v683_v1, %s2136_s9 }
  0x90   : > { %v2432_v32 = vpop.permute.xlu1 %1045 }
  0x91   : > { %v1044_v39 = vpop.permute.xlu0 %1043 }
  0x92   : > { %899 = vrot.lane.b32.xlu1 %v683_v1, %s2131_s28 }
  0x93   : > { %1119 = vrot.lane.b32.xlu0 %v827_v11, %s2137_s14 }
  0x94   : > { %v918_v43 = vpop.permute.xlu1 %917 }
  0x95   : > { %v1012_v48 = vpop.permute.xlu0 %1011 }
  0x96   : > { %901 = vrot.lane.b32.xlu1 %v2427_v27, %s2131_s28 }
  0x97   : > { %1121 = vrot.lane.b32.xlu0 %v2443_v44, %s2137_s14 }
  0x98   : > { %v1014_v53 = vpop.permute.xlu1 %1013 }
  0x99   : > { %v886_v56 = vpop.permute.xlu0 %885 }
  0x9a   : > { %v1143_v57 = vsel %vm1139_vm6, %v2241_v38, %v886_v56  ;;  %933 = vrot.lane.b32.xlu1 %v2443_v44, %s2130_s27  ;;  %v1207_v38 = vsel %vm1205_vm8, %v1174_v61, %v948_v31  ;;  %v459_v31 = vshrl.u32 %v343_v19, 16 }
  0x9b   : > { %v1176_v58 = vsel %vm1172_vm7, %v1143_v57, %v918_v43  ;;  %931 = vrot.lane.b32.xlu0 %v827_v11, %s2130_s27  ;;  %v832_v11 = vrot.slane %v567_v45, 1  ;;  %v834_v57 = vrot.slane %v2463_v0, 1 }
  0x9c   : > { %v982_v63 = vpop.permute.xlu1 %981  ;;  %v1209_v1 = vsel %vm1205_vm8, %v1176_v58, %v950_v28  ;;  %v713_v28 = vrot.slane %v711_v14, 1  ;;  %v461_v45 = vrot.slane %v459_v31, 7  ;;  %v835_v58 = vrot.slane %v568_v17, 1 }
  0x9d   : > { %v980_v5 = vpop.permute.xlu0 %979  ;;  %v1242_v15 = vsel %vm1238_vm9, %v1209_v1, %v982_v63  ;;  %v833_v24 = vsel %vm800_vm3, %v831_v9, %v832_v11 }
  0x9e   : > { %v1240_v8 = vsel %vm1238_vm9, %v1207_v38, %v980_v5  ;;  %965 = vrot.lane.b32.xlu1 %v2437_v35, %s2132_s29  ;;  %v1275_v25 = vsel %vm1271_vm10, %v1242_v15, %v1014_v53  ;;  %v464_v53 = vor.u32 %v462_v46, %v461_v45  ;;  %v836_v1 = vsel %vm800_vm3, %v834_v57, %v835_v58 }
  0x9f   : > { %v1273_v12 = vsel %vm1271_vm10, %v1240_v8, %v1012_v48  ;;  %963 = vrot.lane.b32.xlu0 %v2401_v62, %s2132_s29  ;;  %v1308_v36 = vsel %vm1304_vm11, %v1275_v25, %v2432_v32  ;;  %v325_v32 = vld [vmem:[%s2216_s26 + $0xc8] sm:$0xff]  ;;  %v569_v5 = vsel %vm2192_vm2, %v461_v45, 0  ;;  %v326_v25 = vld [vmem:[%s2216_s26 + $0xd0] sm:$0xff] }
  0xa0   : > { %v1078_v16 = vpop.permute.xlu1 %1077  ;;  %v1306_v22 = vsel %vm1304_vm11, %v1273_v12, %v1044_v39  ;;  %v714_v39 = vor.u32 %v713_v28, %v709_v26  ;;  %v344_v54 = vpack.c.bf16 %v325_v32, %v324_v50  ;;  %v2515_v59 = vsel %vm2192_vm2, 0, %v464_v53  ;;  %v327_v26 = vld [vmem:[%s2216_s26 + $0xd8] sm:$0xff] }
  0xa1   : > { %v1076_v20 = vpop.permute.xlu0 %1075  ;;  %v1341_v47 = vsel %vm1337_vm12, %v1308_v36, %v1078_v16  ;;  %v723_v63 = vshll.u32 %v2515_v59, 16  ;;  %v721_v9 = vshrl.u32 %v2515_v59, 16  ;;  %v728_v12 = vshll.u32 %v569_v5, 16 }
  0xa2   : > { %997 = vrot.lane.b32.xlu1 %v707_v13, %s2135_s8  ;;  %v1339_v33 = vsel %vm1337_vm12, %v1306_v22, %v1076_v20  ;;  %v466_v60 = vshrl.u32 %v344_v54, 16  ;;  %v469_v7 = vshll.u32 %v344_v54, 16  ;;  %v837_v28 = vrot.slane %v2515_v59, 1 }
  0xa3   : > { %995 = vrot.lane.b32.xlu0 %v2427_v27, %s2135_s8  ;;  %v725_v11 = vrot.slane %v723_v63, 1  ;;  %v730_v17 = vrot.slane %v728_v12, 1  ;;  %v838_v29 = vrot.slane %v569_v5, 1 }
  0xa4   : > { %v2488_v30 = vpop.permute.xlu1 %887  ;;  %v468_v6 = vrot.slane %v466_v60, 7 }
  0xa5   : > { %v1108_v34 = vpop.permute.xlu0 %1107  ;;  %v726_v16 = vor.u32 %v725_v11, %v721_v9  ;;  %v839_v50 = vsel %vm800_vm3, %v837_v28, %v838_v29  ;;  %v329_v9 = vld [vmem:[%s2216_s26 + $0xe8] sm:$0xff] }
  0xa6   : > { %1029 = vrot.lane.b32.xlu1 %v833_v24, %s2134_s7  ;;  %v1372_v27 = vsel %vm1370_vm13, %v1339_v33, %v1108_v34  ;;  %v471_v14 = vor.u32 %v469_v7, %v468_v6  ;;  %v570_v33 = vsel %vm2192_vm2, %v468_v6, 0 }
  0xa7   : > { %1027 = vrot.lane.b32.xlu0 %v2443_v44, %s2134_s7  ;;  %2029 = vmatprep.mubr.msk.bf16.mxu0 %vm1430_vm14, %v1372_v27  ;;  %v719_v44 = vsel %vm575_vm4, %v714_v39, %v718_v42  ;;  %v731_v31 = vsel %vm575_vm4, %v726_v16, %v730_v17  ;;  %v345_v39 = vpack.c.bf16 %v327_v26, %v326_v25 }
  0xa8   : > { %v2498_v43 = vpop.permute.xlu1 %889  ;;  %v2530_v20 = vsel %vm2192_vm2, 0, %v471_v14 }
  0xa9   : > { %v1110_v48 = vpop.permute.xlu0 %1109  ;;  %v735_v34 = vshll.u32 %v2530_v20, 16  ;;  %v476_v6 = vshll.u32 %v345_v39, 16  ;;  %v840_v17 = vrot.slane %v2530_v20, 1 }
  0xaa   : > { %v1374_v51 = vsel %vm1370_vm13, %v1341_v47, %v1110_v48  ;;  %1061 = vrot.lane.b32.xlu1 %v2463_v0, %s2133_s30  ;;  %v1147_v47 = vsel %vm1139_vm6, %v2249_v40, %v2498_v43 }
  0xab   : > { %1059 = vrot.lane.b32.xlu0 %v2437_v35, %s2133_s30  ;;  %2030 = vmatmul.mubr.msk.bf16.vlgmr.msra.gmra.mxu0 %vm1430_vm14, %v1374_v51  ;;  %v737_v32 = vrot.slane %v735_v34, 1 }
  0xac   : > { %v922_v52 = vpop.permute.xlu1 %921 }
  0xad   : > { %v920_v55 = vpop.permute.xlu0 %919  ;;  %v1180_v51 = vsel %vm1172_vm7, %v1147_v47, %v922_v52 }
  0xae   : > { %1093 = vrot.lane.b32.xlu1 %v719_v44, %s2136_s9 }
  0xaf   : > { %1091 = vrot.lane.b32.xlu0 %v707_v13, %s2136_s9 }
  0xb0   : > { %v954_v56 = vpop.permute.xlu1 %953 }
  0xb1   : > { %v952_v61 = vpop.permute.xlu0 %951  ;;  %v1213_v57 = vsel %vm1205_vm8, %v1180_v51, %v954_v56 }
  0xb2   : > { %903 = vrot.lane.b32.xlu1 %v707_v13, %s2131_s28 }
  0xb3   : > { %1123 = vrot.lane.b32.xlu0 %v833_v24, %s2137_s14 }
  0xb4   : > { %v986_v38 = vpop.permute.xlu1 %985 }
  0xb5   : > { %v984_v8 = vpop.permute.xlu0 %983  ;;  %v1246_v43 = vsel %vm1238_vm9, %v1213_v57, %v986_v38 }
  0xb6   : > { %905 = vrot.lane.b32.xlu1 %v719_v44, %s2131_s28 }
  0xb7   : > { %1125 = vrot.lane.b32.xlu0 %v836_v1, %s2137_s14 }
  0xb8   : > { %v1018_v13 = vpop.permute.xlu1 %1017 }
  0xb9   : > { %v1016_v15 = vpop.permute.xlu0 %1015  ;;  %v1279_v52 = vsel %vm1271_vm10, %v1246_v43, %v1018_v13 }
  0xba   : > { %937 = vrot.lane.b32.xlu1 %v836_v1, %s2130_s27 }
  0xbb   : > { %935 = vrot.lane.b32.xlu0 %v833_v24, %s2130_s27  ;;  %v1145_v24 = vsel %vm1139_vm6, %v2235_v37, %v2488_v30  ;;  %v733_v37 = vshrl.u32 %v2530_v20, 16  ;;  %v740_v30 = vshll.u32 %v570_v33, 16 }
  0xbc   : > { %v1050_v19 = vpop.permute.xlu1 %1049  ;;  %v1178_v36 = vsel %vm1172_vm7, %v1145_v24, %v920_v55  ;;  %v473_v55 = vshrl.u32 %v345_v39, 16 }
  0xbd   : > { %v1048_v22 = vpop.permute.xlu0 %1047  ;;  %v1211_v42 = vsel %vm1205_vm8, %v1178_v36, %v952_v61  ;;  %v738_v60 = vor.u32 %v737_v32, %v733_v37  ;;  %v742_v61 = vrot.slane %v740_v30, 1  ;;  %v1312_v56 = vsel %vm1304_vm11, %v1279_v52, %v1050_v19 }
  0xbe   : > { %969 = vrot.lane.b32.xlu1 %v2515_v59, %s2132_s29  ;;  %v1244_v46 = vsel %vm1238_vm9, %v1211_v42, %v984_v8  ;;  %v475_v5 = vrot.slane %v473_v55, 7  ;;  %v328_v8 = vld [vmem:[%s2216_s26 + $0xe0] sm:$0xff]  ;;  %v841_v19 = vrot.slane %v570_v33, 1  ;;  %v331_v55 = vld [vmem:[%s2216_s26 + $0xf8] sm:$0xff] }
  0xbf   : > { %967 = vrot.lane.b32.xlu0 %v2463_v0, %s2132_s29  ;;  %v1277_v48 = vsel %vm1271_vm10, %v1244_v46, %v1016_v15  ;;  %v346_v14 = vpack.c.bf16 %v329_v9, %v328_v8 }
  0xc0   : > { %v1082_v27 = vpop.permute.xlu1 %1081  ;;  %v1310_v53 = vsel %vm1304_vm11, %v1277_v48, %v1048_v22  ;;  %v478_v13 = vor.u32 %v476_v6, %v475_v5  ;;  %v842_v24 = vsel %vm800_vm3, %v840_v17, %v841_v19  ;;  %v571_v34 = vsel %vm2192_vm2, %v475_v5, 0 }
  0xc1   : > { %v1080_v45 = vpop.permute.xlu0 %1079  ;;  %v1345_v38 = vsel %vm1337_vm12, %v1312_v56, %v1082_v27  ;;  %v480_v25 = vshrl.u32 %v346_v14, 16  ;;  %v483_v33 = vshll.u32 %v346_v14, 16  ;;  %v752_v42 = vshll.u32 %v571_v34, 16 }
  0xc2   : > { %1001 = vrot.lane.b32.xlu1 %v731_v31, %s2135_s8  ;;  %v1343_v58 = vsel %vm1337_vm12, %v1310_v53, %v1080_v45  ;;  %v2587_v22 = vsel %vm2192_vm2, 0, %v478_v13  ;;  %v330_v53 = vld [vmem:[%s2216_s26 + $0xf0] sm:$0xff] }
  0xc3   : > { %999 = vrot.lane.b32.xlu0 %v719_v44, %s2135_s8  ;;  %v747_v28 = vshll.u32 %v2587_v22, 16  ;;  %v482_v36 = vrot.slane %v480_v25, 7  ;;  %v754_v47 = vrot.slane %v752_v42, 1  ;;  %v843_v57 = vrot.slane %v2587_v22, 1 }
  0xc4   : > { %v2559_v54 = vpop.permute.xlu1 %891 }
  0xc5   : > { %v1112_v40 = vpop.permute.xlu0 %1111  ;;  %v749_v39 = vrot.slane %v747_v28, 1  ;;  %v485_v46 = vor.u32 %v483_v33, %v482_v36 }
  0xc6   : > { %v1376_v44 = vsel %vm1370_vm13, %v1343_v58, %v1112_v40  ;;  %1033 = vrot.lane.b32.xlu1 %v839_v50, %s2134_s7  ;;  %v844_v58 = vrot.slane %v571_v34, 1 }
  0xc7   : > { %1031 = vrot.lane.b32.xlu0 %v836_v1, %s2134_s7  ;;  %2033 = vmatprep.mubr.msk.bf16.mxu0 %vm1430_vm14, %v1376_v44  ;;  %v743_v1 = vsel %vm575_vm4, %v738_v60, %v742_v61  ;;  %v2602_v32 = vsel %vm2192_vm2, 0, %v485_v46  ;;  %v572_v60 = vsel %vm2192_vm2, %v482_v36, 0  ;;  %v347_v61 = vpack.c.bf16 %v331_v55, %v330_v53 }
  0xc8   : > { %v2570_v63 = vpop.permute.xlu1 %893  ;;  %v759_v43 = vshll.u32 %v2602_v32, 16  ;;  %v764_v9 = vshll.u32 %v572_v60, 16  ;;  %v846_v46 = vrot.slane %v2602_v32, 1 }
  0xc9   : > { %v1114_v7 = vpop.permute.xlu0 %1113  ;;  %v490_v36 = vshll.u32 %v347_v61, 16 }
  0xca   : > { %v1378_v11 = vsel %vm1370_vm13, %v1345_v38, %v1114_v7  ;;  %1065 = vrot.lane.b32.xlu1 %v2530_v20, %s2133_s30  ;;  %v1151_v38 = vsel %vm1139_vm6, %v2309_v41, %v2570_v63  ;;  %v761_v8 = vrot.slane %v759_v43, 1 }
  0xcb   : > { %1063 = vrot.lane.b32.xlu0 %v2515_v59, %s2133_s30  ;;  %2034 = vmatmul.mubr.msk.bf16.gmra.mxu0 %vm1430_vm14, %v1378_v11 }
  0xcc   : > { %v926_v12 = vpop.permute.xlu1 %925 }
  0xcd   : > { %v924_v15 = vpop.permute.xlu0 %923  ;;  %v1184_v11 = vsel %vm1172_vm7, %v1151_v38, %v926_v12  ;;  %v766_v12 = vrot.slane %v764_v9, 1 }
  0xce   : > { %1097 = vrot.lane.b32.xlu1 %v743_v1, %s2136_s9 }
  0xcf   : > { %1095 = vrot.lane.b32.xlu0 %v731_v31, %s2136_s9 }
  0xd0   : > { %v958_v16 = vpop.permute.xlu1 %957 }
  0xd1   : > { %v956_v26 = vpop.permute.xlu0 %955  ;;  %v1217_v17 = vsel %vm1205_vm8, %v1184_v11, %v958_v16 }
  0xd2   : > { %907 = vrot.lane.b32.xlu1 %v731_v31, %s2131_s28  ;;  %v745_v31 = vshrl.u32 %v2587_v22, 16 }
  0xd3   : > { %1127 = vrot.lane.b32.xlu0 %v839_v50, %s2137_s14 }
  0xd4   : > { %v990_v29 = vpop.permute.xlu1 %989  ;;  %v750_v30 = vor.u32 %v749_v39, %v745_v31 }
  0xd5   : > { %v988_v27 = vpop.permute.xlu0 %987 }
  0xd6   : > { %909 = vrot.lane.b32.xlu1 %v743_v1, %s2131_s28  ;;  %v755_v40 = vsel %vm575_vm4, %v750_v30, %v754_v47 }
  0xd7   : > { %1129 = vrot.lane.b32.xlu0 %v842_v24, %s2137_s14 }
  0xd8   : > { %v1022_v45 = vpop.permute.xlu1 %1021 }
  0xd9   : > { %v1020_v37 = vpop.permute.xlu0 %1019 }
  0xda   : > { %941 = vrot.lane.b32.xlu1 %v842_v24, %s2130_s27 }
  0xdb   : > { %939 = vrot.lane.b32.xlu0 %v839_v50, %s2130_s27  ;;  %v1149_v50 = vsel %vm1139_vm6, %v2288_v21, %v2559_v54  ;;  %v845_v21 = vsel %vm800_vm3, %v843_v57, %v844_v58  ;;  %v757_v54 = vshrl.u32 %v2602_v32, 16 }
  0xdc   : > { %v1054_v48 = vpop.permute.xlu1 %1053  ;;  %v1182_v44 = vsel %vm1172_vm7, %v1149_v50, %v924_v15  ;;  %v487_v15 = vshrl.u32 %v347_v61, 16 }
  0xdd   : > { %v1052_v51 = vpop.permute.xlu0 %1051  ;;  %v1215_v56 = vsel %vm1205_vm8, %v1182_v44, %v956_v26  ;;  %v1250_v26 = vsel %vm1238_vm9, %v1217_v17, %v990_v29 }
  0xde   : > { %973 = vrot.lane.b32.xlu1 %v2587_v22, %s2132_s29  ;;  %v1248_v6 = vsel %vm1238_vm9, %v1215_v56, %v988_v27  ;;  %v1283_v63 = vsel %vm1271_vm10, %v1250_v26, %v1022_v45  ;;  %v489_v34 = vrot.slane %v487_v15, 7 }
  0xdf   : > { %971 = vrot.lane.b32.xlu0 %v2530_v20, %s2132_s29  ;;  %v1281_v7 = vsel %vm1271_vm10, %v1248_v6, %v1020_v37  ;;  %v1316_v28 = vsel %vm1304_vm11, %v1283_v63, %v1054_v48  ;;  %v847_v37 = vrot.slane %v572_v60, 1 }
  0xe0   : > { %v1086_v52 = vpop.permute.xlu1 %1085  ;;  %v1314_v13 = vsel %vm1304_vm11, %v1281_v7, %v1052_v51  ;;  %v492_v39 = vor.u32 %v490_v36, %v489_v34  ;;  %v573_v55 = vsel %vm2192_vm2, %v489_v34, 0 }
  0xe1   : > { %v1084_v5 = vpop.permute.xlu0 %1083  ;;  %v1349_v33 = vsel %vm1337_vm12, %v1316_v28, %v1086_v52  ;;  %v848_v53 = vsel %vm800_vm3, %v846_v46, %v847_v37  ;;  %v857_v43 = vshll.u32 %v573_v55, 16 }
  0xe2   : > { %1005 = vrot.lane.b32.xlu1 %v755_v40, %s2135_s8  ;;  %v1347_v19 = vsel %vm1337_vm12, %v1314_v13, %v1084_v5  ;;  %v555_v30 = vsel %vm2192_vm2, 0, %v492_v39 }
  0xe3   : > { %1003 = vrot.lane.b32.xlu0 %v743_v1, %s2135_s8  ;;  %v762_v1 = vor.u32 %v761_v8, %v757_v54  ;;  %v852_v48 = vshll.u32 %v555_v30, 16  ;;  %v850_v58 = vshrl.u32 %v555_v30, 16  ;;  %v859_v60 = vrot.slane %v857_v43, 1 }
  0xe4   : > { %v896_v14 = vpop.permute.xlu1 %895  ;;  %v863_v6 = vrot.slane %v555_v30, 1  ;;  %v864_v54 = vrot.slane %v573_v55, 1 }
  0xe5   : > { %v1116_v25 = vpop.permute.xlu0 %1115  ;;  %v854_v50 = vrot.slane %v852_v48, 1  ;;  %v1153_v2 = vsel %vm1139_vm6, %v2340_v4, %v896_v14 }
  0xe6   : > { %v1380_v41 = vsel %vm1370_vm13, %v1347_v19, %v1116_v25  ;;  %1037 = vrot.lane.b32.xlu1 %v845_v21, %s2134_s7  ;;  %v865_v13 = vsel %vm800_vm3, %v863_v6, %v864_v54 }
  0xe7   : > { %1035 = vrot.lane.b32.xlu0 %v842_v24, %s2134_s7  ;;  %2037 = vmatprep.mubr.msk.bf16.mxu0 %vm1430_vm14, %v1380_v41  ;;  %v767_v24 = vsel %vm575_vm4, %v762_v1, %v766_v12 }
  0xe8   : > { %v898_v16 = vpop.permute.xlu1 %897 }
  0xe9   : > { %v1118_v29 = vpop.permute.xlu0 %1117  ;;  %v1155_v4 = vsel %vm1139_vm6, %v2355_v18, %v898_v16 }
  0xea   : > { %v1382_v27 = vsel %vm1370_vm13, %v1349_v33, %v1118_v29  ;;  %1069 = vrot.lane.b32.xlu1 %v2602_v32, %s2133_s30 }
  0xeb   : > { %1067 = vrot.lane.b32.xlu0 %v2587_v22, %s2133_s30  ;;  %2038 = vmatmul.mubr.msk.bf16.gmra.mxu0 %vm1430_vm14, %v1382_v27 }
  0xec   : > { %v930_v31 = vpop.permute.xlu1 %929 }
  0xed   : > { %v928_v42 = vpop.permute.xlu0 %927  ;;  %v1188_v14 = vsel %vm1172_vm7, %v1155_v4, %v930_v31 }
  0xee   : > { %1101 = vrot.lane.b32.xlu1 %v767_v24, %s2136_s9  ;;  %v1186_v38 = vsel %vm1172_vm7, %v1153_v2, %v928_v42 }
  0xef   : > { %1099 = vrot.lane.b32.xlu0 %v755_v40, %s2136_s9 }
  0xf0   : > { %v962_v45 = vpop.permute.xlu1 %961 }
  0xf1   : > { %v960_v47 = vpop.permute.xlu0 %959  ;;  %v1221_v19 = vsel %vm1205_vm8, %v1188_v14, %v962_v45 }
  0xf2   : > { %911 = vrot.lane.b32.xlu1 %v755_v40, %s2131_s28  ;;  %v855_v40 = vor.u32 %v854_v50, %v850_v58 }
  0xf3   : > { %1131 = vrot.lane.b32.xlu0 %v845_v21, %s2137_s14 }
  0xf4   : > { %v994_v51 = vpop.permute.xlu1 %993  ;;  %v860_v5 = vsel %vm575_vm4, %v855_v40, %v859_v60 }
  0xf5   : > { %v992_v57 = vpop.permute.xlu0 %991  ;;  %v1254_v41 = vsel %vm1238_vm9, %v1221_v19, %v994_v51 }
  0xf6   : > { %913 = vrot.lane.b32.xlu1 %v767_v24, %s2131_s28 }
  0xf7   : > { %1133 = vrot.lane.b32.xlu0 %v848_v53, %s2137_s14 }
  0xf8   : > { %v1026_v44 = vpop.permute.xlu1 %1025 }
  0xf9   : > { %v1024_v52 = vpop.permute.xlu0 %1023  ;;  %v1287_v63 = vsel %vm1271_vm10, %v1254_v41, %v1026_v44 }
  0xfa   : > { %945 = vrot.lane.b32.xlu1 %v848_v53, %s2130_s27 }
  0xfb   : > { %943 = vrot.lane.b32.xlu0 %v845_v21, %s2130_s27  ;;  %v1219_v21 = vsel %vm1205_vm8, %v1186_v38, %v960_v47  ;;  %s295_s27 = scalar_lea.vmem %s2972_s6, %s1977_s23 }
  0xfc   : > { %v1058_v61 = vpop.permute.xlu1 %1057  ;;  %v1252_v9 = vsel %vm1238_vm9, %v1219_v21, %v992_v57 }
  0xfd   : > { %v1056_v56 = vpop.permute.xlu0 %1055  ;;  %v1285_v11 = vsel %vm1271_vm10, %v1252_v9, %v1024_v52  ;;  %v1320_v1 = vsel %vm1304_vm11, %v1287_v63, %v1058_v61 }
  0xfe   : > { %977 = vrot.lane.b32.xlu1 %v555_v30, %s2132_s29  ;;  %v1318_v15 = vsel %vm1304_vm11, %v1285_v11, %v1056_v56 }
  0xff   : > { %975 = vrot.lane.b32.xlu0 %v2602_v32, %s2132_s29 }
 0x100   : > { %v1090_v7 = vpop.permute.xlu1 %1089 }
 0x101   : > { %v1088_v8 = vpop.permute.xlu0 %1087  ;;  %v1353_v28 = vsel %vm1337_vm12, %v1320_v1, %v1090_v7 }
 0x102   : > { %1009 = vrot.lane.b32.xlu1 %v860_v5, %s2135_s8  ;;  %v1351_v25 = vsel %vm1337_vm12, %v1318_v15, %v1088_v8 }
 0x103   : > { %1007 = vrot.lane.b32.xlu0 %v767_v24, %s2135_s8 }
 0x104   : > { %v900_v17 = vpop.permute.xlu1 %899 }
 0x105   : > { %v1120_v26 = vpop.permute.xlu0 %1119  ;;  %v1157_v46 = vsel %vm1139_vm6, %v2386_v49, %v900_v17 }
 0x106   : > { %v1384_v18 = vsel %vm1370_vm13, %v1351_v25, %v1120_v26  ;;  %1041 = vrot.lane.b32.xlu1 %v865_v13, %s2134_s7 }
 0x107   : > { %1039 = vrot.lane.b32.xlu0 %v848_v53, %s2134_s7  ;;  %2041 = vmatprep.mubr.msk.bf16.mxu0 %vm1430_vm14, %v1384_v18 }
 0x108   : > { %v902_v12 = vpop.permute.xlu1 %901 }
 0x109   : > { %v1122_v16 = vpop.permute.xlu0 %1121 }
 0x10a   : > { %v1386_v34 = vsel %vm1370_vm13, %v1353_v28, %v1122_v16  ;;  %1073 = vrot.lane.b32.xlu1 %v2198_v3, %s2133_s30 }
 0x10b   : > { %1071 = vrot.lane.b32.xlu0 %v555_v30, %s2133_s30  ;;  %2042 = vmatmul.mubr.msk.bf16.gmra.mxu0 %vm1430_vm14, %v1386_v34 }
 0x10c   : > { %v934_v36 = vpop.permute.xlu1 %933 }
 0x10d   : > { %v932_v33 = vpop.permute.xlu0 %931 }
 0x10e   : > { %1105 = vrot.lane.b32.xlu1 %v2227_v23, %s2136_s9  ;;  %v1190_v23 = vsel %vm1172_vm7, %v1157_v46, %v932_v33 }
 0x10f   : > { %1103 = vrot.lane.b32.xlu0 %v860_v5, %s2136_s9 }
 0x110   : > { %v966_v29 = vpop.permute.xlu1 %965 }
 0x111   : > { %v964_v27 = vpop.permute.xlu0 %963 }
 0x112   : > { %1137 = vrot.lane.b32.xlu1 %v2209_v10, %s2137_s14  ;;  %v1223_v30 = vsel %vm1205_vm8, %v1190_v23, %v964_v27  ;;  %v1159_v10 = vsel %vm1139_vm6, %v2401_v62, %v902_v12 }
 0x113   : > { %1135 = vrot.lane.b32.xlu0 %v865_v13, %s2137_s14  ;;  %v1192_v53 = vsel %vm1172_vm7, %v1159_v10, %v934_v36 }
 0x114   : > { %v998_v24 = vpop.permute.xlu1 %997  ;;  %v1225_v49 = vsel %vm1205_vm8, %v1192_v53, %v966_v29 }
 0x115   : > { %v996_v3 = vpop.permute.xlu0 %995  ;;  %v1258_v43 = vsel %vm1238_vm9, %v1225_v49, %v998_v24 }
 0x116   : > { %v1256_v48 = vsel %vm1238_vm9, %v1223_v30, %v996_v3 }
 0x118   : > { %v1030_v31 = vpop.permute.xlu1 %1029 }
 0x119   : > { %v1028_v39 = vpop.permute.xlu0 %1027  ;;  %v1291_v52 = vsel %vm1271_vm10, %v1258_v43, %v1030_v31 }
 0x11a   : > { %v1289_v51 = vsel %vm1271_vm10, %v1256_v48, %v1028_v39 }
 0x11c   : > { %v1062_v42 = vpop.permute.xlu1 %1061 }
 0x11d   : > { %v1060_v45 = vpop.permute.xlu0 %1059  ;;  %v1324_v62 = vsel %vm1304_vm11, %v1291_v52, %v1062_v42 }
 0x11e   : > { %v1322_v55 = vsel %vm1304_vm11, %v1289_v51, %v1060_v45 }
 0x120   : > { %v1094_v37 = vpop.permute.xlu1 %1093 }
 0x121   : > { %v1092_v47 = vpop.permute.xlu0 %1091  ;;  %v1357_v60 = vsel %vm1337_vm12, %v1324_v62, %v1094_v37 }
 0x122   : > { %v1355_v58 = vsel %vm1337_vm12, %v1322_v55, %v1092_v47 }
 0x124   : > { %v904_v57 = vpop.permute.xlu1 %903 }
 0x125   : > { %v1124_v50 = vpop.permute.xlu0 %1123  ;;  %v1161_v11 = vsel %vm1139_vm6, %v2437_v35, %v904_v57 }
 0x126   : > { %v1388_v44 = vsel %vm1370_vm13, %v1355_v58, %v1124_v50 }
 0x127   : > { %2045 = vmatprep.mubr.msk.bf16.mxu1 %vm1430_vm14, %v1388_v44 }
 0x128   : > { %v906_v40 = vpop.permute.xlu1 %905 }
 0x129   : > { %v1126_v61 = vpop.permute.xlu0 %1125  ;;  %v1163_v25 = vsel %vm1139_vm6, %v2463_v0, %v906_v40 }
 0x12a   : > { %v1390_v56 = vsel %vm1370_vm13, %v1357_v60, %v1126_v61 }
 0x12b   : > { %2046 = vmatmul.mubr.msk.bf16.vlgmr.msra.gmra.mxu1 %vm1430_vm14, %v1390_v56 }
 0x12c   : > { %v938_v2 = vpop.permute.xlu1 %937 }
 0x12d   : > { %v936_v5 = vpop.permute.xlu0 %935  ;;  %v1196_v41 = vsel %vm1172_vm7, %v1163_v25, %v938_v2 }
 0x12e   : > { %v1194_v13 = vsel %vm1172_vm7, %v1161_v11, %v936_v5  ;;  %v2761_v5 = vld [vmem:[%s2970_s4] ss:$0 sm:$0xff] }
 0x130   : > { %v970_v6 = vpop.permute.xlu1 %969 }
 0x131   : > { %v968_v54 = vpop.permute.xlu0 %967  ;;  %v1229_v35 = vsel %vm1205_vm8, %v1196_v41, %v970_v6 }
 0x132   : > { %v1227_v15 = vsel %vm1205_vm8, %v1194_v13, %v968_v54 }
 0x134   : > { %v1002_v38 = vpop.permute.xlu1 %1001 }
 0x135   : > { %v1000_v7 = vpop.permute.xlu0 %999  ;;  %v1262_v28 = vsel %vm1238_vm9, %v1229_v35, %v1002_v38 }
 0x136   : > { %v1260_v19 = vsel %vm1238_vm9, %v1227_v15, %v1000_v7 }
 0x138   : > { %v1034_v21 = vpop.permute.xlu1 %1033 }
 0x139   : > { %v1032_v8 = vpop.permute.xlu0 %1031  ;;  %v1295_v34 = vsel %vm1271_vm10, %v1262_v28, %v1034_v21 }
 0x13a   : > { %v1293_v26 = vsel %vm1271_vm10, %v1260_v19, %v1032_v8 }
 0x13c   : > { %v1066_v9 = vpop.permute.xlu1 %1065 }
 0x13d   : > { %v1064_v4 = vpop.permute.xlu0 %1063  ;;  %v1328_v0 = vsel %vm1304_vm11, %v1295_v34, %v1066_v9 }
 0x13e   : > { %v1326_v18 = vsel %vm1304_vm11, %v1293_v26, %v1064_v4 }
 0x140   : > { %v1098_v14 = vpop.permute.xlu1 %1097 }
 0x141   : > { %v1096_v17 = vpop.permute.xlu0 %1095  ;;  %v1361_v33 = vsel %vm1337_vm12, %v1328_v0, %v1098_v14 }
 0x142   : > { %v1359_v1 = vsel %vm1337_vm12, %v1326_v18, %v1096_v17 }
 0x144   : > { %v908_v63 = vpop.permute.xlu1 %907 }
 0x145   : > { %v1128_v12 = vpop.permute.xlu0 %1127  ;;  %v1165_v47 = vsel %vm1139_vm6, %v2515_v59, %v908_v63 }
 0x146   : > { %v1392_v16 = vsel %vm1370_vm13, %v1359_v1, %v1128_v12 }
 0x147   : > { %2049 = vmatprep.mubr.msk.bf16.mxu1 %vm1430_vm14, %v1392_v16 }
 0x148   : > { %v910_v36 = vpop.permute.xlu1 %909 }
 0x149   : > { %v1130_v29 = vpop.permute.xlu0 %1129  ;;  %v1167_v57 = vsel %vm1139_vm6, %v2530_v20, %v910_v36 }
 0x14a   : > { %v1394_v27 = vsel %vm1370_vm13, %v1361_v33, %v1130_v29 }
 0x14b   : > { %2050 = vmatmul.mubr.msk.bf16.gmra.mxu1 %vm1430_vm14, %v1394_v27 }
 0x14c   : > { %v942_v24 = vpop.permute.xlu1 %941 }
 0x14d   : > { %v940_v3 = vpop.permute.xlu0 %939  ;;  %v1200_v58 = vsel %vm1172_vm7, %v1167_v57, %v942_v24 }
 0x14e   : > { %v1198_v48 = vsel %vm1172_vm7, %v1165_v47, %v940_v3 }
 0x150   : > { %v974_v31 = vpop.permute.xlu1 %973 }
 0x151   : > { %v972_v39 = vpop.permute.xlu0 %971  ;;  %v1233_v59 = vsel %vm1205_vm8, %v1200_v58, %v974_v31 }
 0x152   : > { %v1231_v51 = vsel %vm1205_vm8, %v1198_v48, %v972_v39 }
 0x154   : > { %v1006_v42 = vpop.permute.xlu1 %1005 }
 0x155   : > { %v1004_v45 = vpop.permute.xlu0 %1003  ;;  %v1266_v62 = vsel %vm1238_vm9, %v1233_v59, %v1006_v42 }
 0x156   : > { %v1264_v55 = vsel %vm1238_vm9, %v1231_v51, %v1004_v45 }
 0x158   : > { %v1038_v46 = vpop.permute.xlu1 %1037 }
 0x159   : > { %v1036_v23 = vpop.permute.xlu0 %1035  ;;  %v1299_v60 = vsel %vm1271_vm10, %v1266_v62, %v1038_v46 }
 0x15a   : > { %v1297_v49 = vsel %vm1271_vm10, %v1264_v55, %v1036_v23 }
 0x15c   : > { %v1070_v37 = vpop.permute.xlu1 %1069 }
 0x15d   : > { %v1068_v30 = vpop.permute.xlu0 %1067  ;;  %v1332_v20 = vsel %vm1304_vm11, %v1299_v60, %v1070_v37 }
 0x15e   : > { %v1330_v50 = vsel %vm1304_vm11, %v1297_v49, %v1068_v30 }
 0x160   : > { %v1102_v10 = vpop.permute.xlu1 %1101 }
 0x161   : > { %v1100_v53 = vpop.permute.xlu0 %1099  ;;  %v1365_v56 = vsel %vm1337_vm12, %v1332_v20, %v1102_v10 }
 0x162   : > { %v1363_v44 = vsel %vm1337_vm12, %v1330_v50, %v1100_v53 }
 0x164   : > { %v912_v43 = vpop.permute.xlu1 %911 }
 0x165   : > { %v1132_v52 = vpop.permute.xlu0 %1131  ;;  %v1169_v37 = vsel %vm1139_vm6, %v2587_v22, %v912_v43 }
 0x166   : > { %v1396_v40 = vsel %vm1370_vm13, %v1363_v44, %v1132_v52 }
 0x167   : > { %2053 = vmatprep.mubr.msk.bf16.mxu1 %vm1430_vm14, %v1396_v40 }
 0x168   : > { %v914_v61 = vpop.permute.xlu1 %913 }
 0x169   : > { %v1134_v2 = vpop.permute.xlu0 %1133  ;;  %v1171_v23 = vsel %vm1139_vm6, %v2602_v32, %v914_v61 }
 0x16a   : > { %v1398_v6 = vsel %vm1370_vm13, %v1365_v56, %v1134_v2 }
 0x16b   : > { %v2031_v54 = vpop.f32.mrf.mxu0  ;;  %2054 = vmatmul.mubr.msk.bf16.gmra.mxu1 %vm1430_vm14, %v1398_v6 }
 0x16c   : > { %v1510_v38 = vadd.f32 %v2031_v54, %v2761_v5  ;;  %v946_v7 = vpop.permute.xlu1 %945 }
 0x16d   : > { %v1501_v21 = vpop.f32.mrf.mxu0  ;;  %v944_v8 = vpop.permute.xlu0 %943  ;;  %v1204_v30 = vsel %vm1172_vm7, %v1171_v23, %v946_v7 }
 0x16e   : > { %1630 = vst.msk [vmem:[%s2769_s24 + $0x10] sm:$0xff] %vm1172_vm7, %v1510_v38  ;;  %v1502_v9 = vadd.f32 %v2761_v5, %v1501_v21  ;;  %v1731_v25 = vmul.f32 %v1510_v38, %v1510_v38  ;;  %v1663_v12 = vsel %vm1172_vm7, %v1510_v38, 0.0  ;;  %v1202_v47 = vsel %vm1172_vm7, %v1169_v37, %v944_v8 }
 0x16f   : > { %v2032_v4 = vpop.f32.mrf.mxu0 }
 0x170   : > { %1628 = vst.msk [vmem:[%s2769_s24] sm:$0xff] %vm1172_vm7, %v1502_v9  ;;  %v1513_v11 = vadd.f32 %v2032_v4, %v2761_v5  ;;  %v978_v13 = vpop.permute.xlu1 %977  ;;  %v1729_v17 = vmul.f32 %v1502_v9, %v1502_v9  ;;  %v1660_v26 = vsel %vm1172_vm7, %v1502_v9, 0.0  ;;  %v1764_v33 = vsel %vm1172_vm7, %v1731_v25, 0.0 }
 0x171   : > { %v1504_v14 = vpop.f32.mrf.mxu0  ;;  %v976_v15 = vpop.permute.xlu0 %975  ;;  %v1237_v48 = vsel %vm1205_vm8, %v1204_v30, %v978_v13 }
 0x172   : > { %1631 = vst.msk [vmem:[%s2769_s24 + $0x18] sm:$0xff] %vm1172_vm7, %v1513_v11  ;;  %v1505_v19 = vadd.f32 %v2761_v5, %v1504_v14  ;;  %v1761_v28 = vsel %vm1172_vm7, %v1729_v17, 0.0  ;;  %v1732_v16 = vmul.f32 %v1513_v11, %v1513_v11  ;;  %v1665_v29 = vsel %vm1172_vm7, %v1513_v11, 0.0 }
 0x173   : > { %v1235_v51 = vsel %vm1205_vm8, %v1202_v47, %v976_v15 }
 0x174   : > { %1629 = vst.msk [vmem:[%s2769_s24 + $0x8] sm:$0xff] %vm1172_vm7, %v1505_v19  ;;  %v1661_v41 = vsel %vm1172_vm7, %v1505_v19, 0.0  ;;  %v1730_v18 = vmul.f32 %v1505_v19, %v1505_v19  ;;  %v1010_v63 = vpop.permute.xlu1 %1009  ;;  %v1766_v39 = vsel %vm1172_vm7, %v1732_v16, 0.0 }
 0x175   : > { %v1662_v35 = vadd.f32 %v1661_v41, %v1660_v26  ;;  %v1008_v1 = vpop.permute.xlu0 %1007  ;;  %v1270_v53 = vsel %vm1238_vm9, %v1237_v48, %v1010_v63 }
 0x176   : > { %v1762_v34 = vsel %vm1172_vm7, %v1730_v18, 0.0  ;;  %v1268_v57 = vsel %vm1238_vm9, %v1235_v51, %v1008_v1 }
 0x177   : > { %v1664_v0 = vadd.f32 %v1663_v12, %v1662_v35  ;;  %v1763_v36 = vadd.f32 %v1762_v34, %v1761_v28 }
 0x178   : > { %v1042_v27 = vpop.permute.xlu1 %1041 }
 0x179   : > { %v1765_v24 = vadd.f32 %v1764_v33, %v1763_v36  ;;  %v1040_v3 = vpop.permute.xlu0 %1039  ;;  %v1666_v31 = vadd.f32 %v1665_v29, %v1664_v0  ;;  %v1303_v32 = vsel %vm1271_vm10, %v1270_v53, %v1042_v27 }
 0x17a   : > { %v1301_v49 = vsel %vm1271_vm10, %v1268_v57, %v1040_v3 }
 0x17b   : > { %v1767_v42 = vadd.f32 %v1766_v39, %v1765_v24 }
 0x17c   : > { %v1074_v45 = vpop.permute.xlu1 %1073 }
 0x17d   : > { %v1072_v46 = vpop.permute.xlu0 %1071  ;;  %v1336_v22 = vsel %vm1304_vm11, %v1303_v32, %v1074_v45 }
 0x17e   : > { %v1334_v58 = vsel %vm1304_vm11, %v1301_v49, %v1072_v46 }
 0x180   : > { %v1106_v10 = vpop.permute.xlu1 %1105 }
 0x181   : > { %v1104_v55 = vpop.permute.xlu0 %1103  ;;  %v1369_v50 = vsel %vm1337_vm12, %v1336_v22, %v1106_v10 }
 0x182   : > { %v1367_v59 = vsel %vm1337_vm12, %v1334_v58, %v1104_v55 }
 0x184   : > { %v1138_v43 = vpop.permute.xlu1 %1137 }
 0x185   : > { %v1402_v44 = vsel %vm1370_vm13, %v1369_v50, %v1138_v43  ;;  %v1136_v52 = vpop.permute.xlu0 %1135 }
 0x186   : > { %v1400_v62 = vsel %vm1370_vm13, %v1367_v59, %v1136_v52 }
 0x187   : > { %2057 = vmatprep.mubr.msk.bf16.mxu1 %vm1430_vm14, %v1400_v62 }
 0x188   : > { %2058 = vmatmul.mubr.msk.bf16.gmra.mxu1 %vm1430_vm14, %v1402_v44 }
 0x18b   : > { %v2035_v40 = vpop.f32.mrf.mxu0 }
 0x18c   : > { %v1526_v60 = vadd.f32 %v2035_v40, %v2761_v5 }
 0x18d   : > { %v1517_v20 = vpop.f32.mrf.mxu0 }
 0x18e   : > { %1634 = vst.msk [vmem:[%s2769_s24 + $0x30] sm:$0xff] %vm1172_vm7, %v1526_v60  ;;  %v1518_v61 = vadd.f32 %v2761_v5, %v1517_v20  ;;  %v1735_v4 = vmul.f32 %v1526_v60, %v1526_v60  ;;  %v1671_v15 = vsel %vm1172_vm7, %v1526_v60, 0.0 }
 0x18f   : > { %v2036_v56 = vpop.f32.mrf.mxu0 }
 0x190   : > { %1632 = vst.msk [vmem:[%s2769_s24 + $0x20] sm:$0xff] %vm1172_vm7, %v1518_v61  ;;  %v1667_v2 = vsel %vm1172_vm7, %v1518_v61, 0.0  ;;  %v1733_v6 = vmul.f32 %v1518_v61, %v1518_v61  ;;  %v1529_v54 = vadd.f32 %v2036_v56, %v2761_v5  ;;  %v1772_v41 = vsel %vm1172_vm7, %v1735_v4, 0.0 }
 0x191   : > { %v1668_v38 = vadd.f32 %v1667_v2, %v1666_v31  ;;  %v1520_v7 = vpop.f32.mrf.mxu0 }
 0x192   : > { %v1768_v21 = vsel %vm1172_vm7, %v1733_v6, 0.0  ;;  %1635 = vst.msk [vmem:[%s2769_s24 + $0x38] sm:$0xff] %vm1172_vm7, %v1529_v54  ;;  %v1521_v8 = vadd.f32 %v2761_v5, %v1520_v7  ;;  %v1736_v17 = vmul.f32 %v1529_v54, %v1529_v54  ;;  %v1673_v18 = vsel %vm1172_vm7, %v1529_v54, 0.0 }
 0x193   : > { %v1769_v9 = vadd.f32 %v1768_v21, %v1767_v42 }
 0x194   : > { %1633 = vst.msk [vmem:[%s2769_s24 + $0x28] sm:$0xff] %vm1172_vm7, %v1521_v8  ;;  %v1669_v11 = vsel %vm1172_vm7, %v1521_v8, 0.0  ;;  %v1734_v13 = vmul.f32 %v1521_v8, %v1521_v8  ;;  %v1774_v1 = vsel %vm1172_vm7, %v1736_v17, 0.0 }
 0x195   : > { %v1670_v14 = vadd.f32 %v1669_v11, %v1668_v38 }
 0x196   : > { %v1770_v19 = vsel %vm1172_vm7, %v1734_v13, 0.0 }
 0x197   : > { %v1672_v25 = vadd.f32 %v1671_v15, %v1670_v14  ;;  %v1771_v26 = vadd.f32 %v1770_v19, %v1769_v9 }
 0x199   : > { %v1773_v63 = vadd.f32 %v1772_v41, %v1771_v26  ;;  %v1674_v35 = vadd.f32 %v1673_v18, %v1672_v25 }
 0x19b   : > { %v1775_v12 = vadd.f32 %v1774_v1, %v1773_v63 }
 0x1ab   : > { %v2039_v28 = vpop.f32.mrf.mxu0 }
 0x1ac   : > { %v1542_v16 = vadd.f32 %v2039_v28, %v2761_v5 }
 0x1ad   : > { %v1533_v34 = vpop.f32.mrf.mxu0 }
 0x1ae   : > { %1638 = vst.msk [vmem:[%s2769_s24 + $0x50] sm:$0xff] %vm1172_vm7, %v1542_v16  ;;  %v1534_v0 = vadd.f32 %v2761_v5, %v1533_v34  ;;  %v1739_v45 = vmul.f32 %v1542_v16, %v1542_v16  ;;  %v1679_v30 = vsel %vm1172_vm7, %v1542_v16, 0.0 }
 0x1af   : > { %v2040_v36 = vpop.f32.mrf.mxu0 }
 0x1b0   : > { %1636 = vst.msk [vmem:[%s2769_s24 + $0x40] sm:$0xff] %vm1172_vm7, %v1534_v0  ;;  %v1675_v33 = vsel %vm1172_vm7, %v1534_v0, 0.0  ;;  %v1737_v29 = vmul.f32 %v1534_v0, %v1534_v0  ;;  %v1545_v27 = vadd.f32 %v2040_v36, %v2761_v5  ;;  %v1780_v53 = vsel %vm1172_vm7, %v1739_v45, 0.0 }
 0x1b1   : > { %v1676_v24 = vadd.f32 %v1675_v33, %v1674_v35  ;;  %v1536_v3 = vpop.f32.mrf.mxu0 }
 0x1b2   : > { %v1776_v31 = vsel %vm1172_vm7, %v1737_v29, 0.0  ;;  %1639 = vst.msk [vmem:[%s2769_s24 + $0x58] sm:$0xff] %vm1172_vm7, %v1545_v27  ;;  %v1537_v39 = vadd.f32 %v2761_v5, %v1536_v3  ;;  %v1740_v47 = vmul.f32 %v1545_v27, %v1545_v27  ;;  %v1681_v55 = vsel %vm1172_vm7, %v1545_v27, 0.0 }
 0x1b3   : > { %v1777_v42 = vadd.f32 %v1776_v31, %v1775_v12 }
 0x1b4   : > { %1637 = vst.msk [vmem:[%s2769_s24 + $0x48] sm:$0xff] %vm1172_vm7, %v1537_v39  ;;  %v1677_v46 = vsel %vm1172_vm7, %v1537_v39, 0.0  ;;  %v1738_v23 = vmul.f32 %v1537_v39, %v1537_v39  ;;  %v1782_v49 = vsel %vm1172_vm7, %v1740_v47, 0.0 }
 0x1b5   : > { %v1678_v37 = vadd.f32 %v1677_v46, %v1676_v24 }
 0x1b6   : > { %v1778_v48 = vsel %vm1172_vm7, %v1738_v23, 0.0 }
 0x1b7   : > { %v1680_v10 = vadd.f32 %v1679_v30, %v1678_v37  ;;  %v1779_v51 = vadd.f32 %v1778_v48, %v1777_v42 }
 0x1b9   : > { %v1781_v57 = vadd.f32 %v1780_v53, %v1779_v51  ;;  %v1682_v32 = vadd.f32 %v1681_v55, %v1680_v10 }
 0x1bb   : > { %v1783_v22 = vadd.f32 %v1782_v49, %v1781_v57 }
 0x1cb   : > { %v2043_v58 = vpop.f32.mrf.mxu0 }
 0x1cc   : > { %v1558_v50 = vadd.f32 %v2043_v58, %v2761_v5 }
 0x1cd   : > { %v1549_v43 = vpop.f32.mrf.mxu0 }
 0x1ce   : > { %1642 = vst.msk [vmem:[%s2769_s24 + $0x70] sm:$0xff] %vm1172_vm7, %v1558_v50  ;;  %v1550_v59 = vadd.f32 %v2761_v5, %v1549_v43  ;;  %v1743_v6 = vmul.f32 %v1558_v50, %v1558_v50  ;;  %v1687_v21 = vsel %vm1172_vm7, %v1558_v50, 0.0 }
 0x1cf   : > { %v2044_v44 = vpop.f32.mrf.mxu0 }
 0x1d0   : > { %1640 = vst.msk [vmem:[%s2769_s24 + $0x60] sm:$0xff] %vm1172_vm7, %v1550_v59  ;;  %v1683_v52 = vsel %vm1172_vm7, %v1550_v59, 0.0  ;;  %v1741_v62 = vmul.f32 %v1550_v59, %v1550_v59  ;;  %v1561_v40 = vadd.f32 %v2044_v44, %v2761_v5  ;;  %v1788_v13 = vsel %vm1172_vm7, %v1743_v6, 0.0 }
 0x1d1   : > { %v1684_v60 = vadd.f32 %v1683_v52, %v1682_v32  ;;  %v1552_v20 = vpop.f32.mrf.mxu0 }
 0x1d2   : > { %v1784_v61 = vsel %vm1172_vm7, %v1741_v62, 0.0  ;;  %1643 = vst.msk [vmem:[%s2769_s24 + $0x78] sm:$0xff] %vm1172_vm7, %v1561_v40  ;;  %v1553_v56 = vadd.f32 %v2761_v5, %v1552_v20  ;;  %v1744_v8 = vmul.f32 %v1561_v40, %v1561_v40  ;;  %v1689_v14 = vsel %vm1172_vm7, %v1561_v40, 0.0 }
 0x1d3   : > { %v1785_v2 = vadd.f32 %v1784_v61, %v1783_v22 }
 0x1d4   : > { %1641 = vst.msk [vmem:[%s2769_s24 + $0x68] sm:$0xff] %vm1172_vm7, %v1553_v56  ;;  %v1685_v54 = vsel %vm1172_vm7, %v1553_v56, 0.0  ;;  %v1742_v38 = vmul.f32 %v1553_v56, %v1553_v56  ;;  %v1790_v19 = vsel %vm1172_vm7, %v1744_v8, 0.0 }
 0x1d5   : > { %v1686_v7 = vadd.f32 %v1685_v54, %v1684_v60 }
 0x1d6   : > { %v1786_v9 = vsel %vm1172_vm7, %v1742_v38, 0.0 }
 0x1d7   : > { %v1688_v4 = vadd.f32 %v1687_v21, %v1686_v7  ;;  %v1787_v11 = vadd.f32 %v1786_v9, %v1785_v2 }
 0x1d9   : > { %v1789_v15 = vadd.f32 %v1788_v13, %v1787_v11  ;;  %v1690_v17 = vadd.f32 %v1689_v14, %v1688_v4 }
 0x1db   : > { %v1791_v25 = vadd.f32 %v1790_v19, %v1789_v15 }
 0x1eb   : > { %v2047_v26 = vpop.f32.mrf.mxu1 }
 0x1ec   : > { %v1574_v41 = vadd.f32 %v2047_v26, %v2761_v5 }
 0x1ed   : > { %v1565_v18 = vpop.f32.mrf.mxu1 }
 0x1ee   : > { %1646 = vst.msk [vmem:[%s2769_s24 + $0x90] sm:$0xff] %vm1172_vm7, %v1574_v41  ;;  %v1566_v63 = vadd.f32 %v2761_v5, %v1565_v18  ;;  %v1747_v29 = vmul.f32 %v1574_v41, %v1574_v41  ;;  %v1695_v31 = vsel %vm1172_vm7, %v1574_v41, 0.0 }
 0x1ef   : > { %v2048_v35 = vpop.f32.mrf.mxu1 }
 0x1f0   : > { %1644 = vst.msk [vmem:[%s2769_s24 + $0x80] sm:$0xff] %vm1172_vm7, %v1566_v63  ;;  %v1691_v1 = vsel %vm1172_vm7, %v1566_v63, 0.0  ;;  %v1745_v12 = vmul.f32 %v1566_v63, %v1566_v63  ;;  %v1577_v28 = vadd.f32 %v2048_v35, %v2761_v5  ;;  %v1796_v23 = vsel %vm1172_vm7, %v1747_v29, 0.0 }
 0x1f1   : > { %v1692_v16 = vadd.f32 %v1691_v1, %v1690_v17  ;;  %v1568_v34 = vpop.f32.mrf.mxu1 }
 0x1f2   : > { %v1792_v0 = vsel %vm1172_vm7, %v1745_v12, 0.0  ;;  %1647 = vst.msk [vmem:[%s2769_s24 + $0x98] sm:$0xff] %vm1172_vm7, %v1577_v28  ;;  %v1569_v36 = vadd.f32 %v2761_v5, %v1568_v34  ;;  %v1748_v39 = vmul.f32 %v1577_v28, %v1577_v28  ;;  %v1697_v37 = vsel %vm1172_vm7, %v1577_v28, 0.0 }
 0x1f3   : > { %v1793_v33 = vadd.f32 %v1792_v0, %v1791_v25 }
 0x1f4   : > { %1645 = vst.msk [vmem:[%s2769_s24 + $0x88] sm:$0xff] %vm1172_vm7, %v1569_v36  ;;  %v1693_v27 = vsel %vm1172_vm7, %v1569_v36, 0.0  ;;  %v1746_v24 = vmul.f32 %v1569_v36, %v1569_v36  ;;  %v1798_v48 = vsel %vm1172_vm7, %v1748_v39, 0.0 }
 0x1f5   : > { %v1694_v3 = vadd.f32 %v1693_v27, %v1692_v16 }
 0x1f6   : > { %v1794_v42 = vsel %vm1172_vm7, %v1746_v24, 0.0 }
 0x1f7   : > { %v1696_v45 = vadd.f32 %v1695_v31, %v1694_v3  ;;  %v1795_v46 = vadd.f32 %v1794_v42, %v1793_v33 }
 0x1f9   : > { %v1797_v30 = vadd.f32 %v1796_v23, %v1795_v46  ;;  %v1698_v47 = vadd.f32 %v1697_v37, %v1696_v45 }
 0x1fb   : > { %v1799_v10 = vadd.f32 %v1798_v48, %v1797_v30 }
 0x20b   : > { %v2051_v51 = vpop.f32.mrf.mxu1 }
 0x20c   : > { %v1590_v53 = vadd.f32 %v2051_v51, %v2761_v5 }
 0x20d   : > { %v1581_v55 = vpop.f32.mrf.mxu1 }
 0x20e   : > { %1650 = vst.msk [vmem:[%s2769_s24 + $0xb0] sm:$0xff] %vm1172_vm7, %v1590_v53  ;;  %v1582_v57 = vadd.f32 %v2761_v5, %v1581_v55  ;;  %v1751_v8 = vmul.f32 %v1590_v53, %v1590_v53  ;;  %v1703_v4 = vsel %vm1172_vm7, %v1590_v53, 0.0 }
 0x20f   : > { %v2052_v32 = vpop.f32.mrf.mxu1 }
 0x210   : > { %1648 = vst.msk [vmem:[%s2769_s24 + $0xa0] sm:$0xff] %vm1172_vm7, %v1582_v57  ;;  %v1593_v49 = vadd.f32 %v2052_v32, %v2761_v5  ;;  %v1749_v20 = vmul.f32 %v1582_v57, %v1582_v57  ;;  %v1699_v61 = vsel %vm1172_vm7, %v1582_v57, 0.0  ;;  %v1804_v13 = vsel %vm1172_vm7, %v1751_v8, 0.0 }
 0x211   : > { %v1584_v22 = vpop.f32.mrf.mxu1  ;;  %v1700_v54 = vadd.f32 %v1699_v61, %v1698_v47 }
 0x212   : > { %1651 = vst.msk [vmem:[%s2769_s24 + $0xb8] sm:$0xff] %vm1172_vm7, %v1593_v49  ;;  %v1585_v58 = vadd.f32 %v2761_v5, %v1584_v22  ;;  %v1800_v2 = vsel %vm1172_vm7, %v1749_v20, 0.0  ;;  %v1752_v14 = vmul.f32 %v1593_v49, %v1593_v49  ;;  %v1705_v19 = vsel %vm1172_vm7, %v1593_v49, 0.0 }
 0x213   : > { %v1801_v7 = vadd.f32 %v1800_v2, %v1799_v10 }
 0x214   : > { %1649 = vst.msk [vmem:[%s2769_s24 + $0xa8] sm:$0xff] %vm1172_vm7, %v1585_v58  ;;  %v1750_v56 = vmul.f32 %v1585_v58, %v1585_v58  ;;  %v1701_v6 = vsel %vm1172_vm7, %v1585_v58, 0.0  ;;  %v1806_v18 = vsel %vm1172_vm7, %v1752_v14, 0.0 }
 0x215   : > { %v1702_v21 = vadd.f32 %v1701_v6, %v1700_v54 }
 0x216   : > { %v1802_v38 = vsel %vm1172_vm7, %v1750_v56, 0.0 }
 0x217   : > { %v1803_v9 = vadd.f32 %v1802_v38, %v1801_v7  ;;  %v1704_v11 = vadd.f32 %v1703_v4, %v1702_v21 }
 0x219   : > { %v1805_v17 = vadd.f32 %v1804_v13, %v1803_v9  ;;  %v1706_v41 = vadd.f32 %v1705_v19, %v1704_v11 }
 0x21b   : > { %v1807_v12 = vadd.f32 %v1806_v18, %v1805_v17 }
 0x22b   : > { %v2055_v50 = vpop.f32.mrf.mxu1 }
 0x22c   : > { %v1606_v43 = vadd.f32 %v2055_v50, %v2761_v5 }
 0x22d   : > { %v1597_v59 = vpop.f32.mrf.mxu1 }
 0x22e   : > { %1654 = vst.msk [vmem:[%s2769_s24 + $0xd0] sm:$0xff] %vm1172_vm7, %v1606_v43  ;;  %v1598_v44 = vadd.f32 %v2761_v5, %v1597_v59  ;;  %v1755_v0 = vmul.f32 %v1606_v43, %v1606_v43  ;;  %v1711_v29 = vsel %vm1172_vm7, %v1606_v43, 0.0 }
 0x22f   : > { %v2056_v52 = vpop.f32.mrf.mxu1 }
 0x230   : > { %1652 = vst.msk [vmem:[%s2769_s24 + $0xc0] sm:$0xff] %vm1172_vm7, %v1598_v44  ;;  %v1609_v62 = vadd.f32 %v2056_v52, %v2761_v5  ;;  %v1753_v15 = vmul.f32 %v1598_v44, %v1598_v44  ;;  %v1707_v25 = vsel %vm1172_vm7, %v1598_v44, 0.0  ;;  %v1812_v31 = vsel %vm1172_vm7, %v1755_v0, 0.0 }
 0x231   : > { %v1600_v40 = vpop.f32.mrf.mxu1  ;;  %v1708_v1 = vadd.f32 %v1707_v25, %v1706_v41 }
 0x232   : > { %1655 = vst.msk [vmem:[%s2769_s24 + $0xd8] sm:$0xff] %vm1172_vm7, %v1609_v62  ;;  %v1601_v60 = vadd.f32 %v2761_v5, %v1600_v40  ;;  %v1808_v63 = vsel %vm1172_vm7, %v1753_v15, 0.0  ;;  %v1756_v39 = vmul.f32 %v1609_v62, %v1609_v62  ;;  %v1713_v23 = vsel %vm1172_vm7, %v1609_v62, 0.0 }
 0x233   : > { %v1809_v16 = vadd.f32 %v1808_v63, %v1807_v12 }
 0x234   : > { %1653 = vst.msk [vmem:[%s2769_s24 + $0xc8] sm:$0xff] %vm1172_vm7, %v1601_v60  ;;  %v1754_v26 = vmul.f32 %v1601_v60, %v1601_v60  ;;  %v1709_v35 = vsel %vm1172_vm7, %v1601_v60, 0.0  ;;  %v1814_v51 = vsel %vm1172_vm7, %v1756_v39, 0.0 }
 0x235   : > { %v1710_v34 = vadd.f32 %v1709_v35, %v1708_v1 }
 0x236   : > { %v1810_v28 = vsel %vm1172_vm7, %v1754_v26, 0.0 }
 0x237   : > { %v1811_v36 = vadd.f32 %v1810_v28, %v1809_v16  ;;  %v1712_v24 = vadd.f32 %v1711_v29, %v1710_v34 }
 0x239   : > { %v1813_v45 = vadd.f32 %v1812_v31, %v1811_v36  ;;  %v1714_v48 = vadd.f32 %v1713_v23, %v1712_v24 }
 0x23b   : > { %v1815_v32 = vadd.f32 %v1814_v51, %v1813_v45 }
 0x248   : > { %v2059_v33 = vpop.f32.mrf.mxu1 }
 0x249   : > { %v1622_v27 = vadd.f32 %v2059_v33, %v2761_v5 }
 0x24a   : > { %v1613_v3 = vpop.f32.mrf.mxu1 }
 0x24b   : > { %1658 = vst.msk [vmem:[%s2769_s24 + $0xf0] sm:$0xff] %vm1172_vm7, %v1622_v27  ;;  %v1614_v42 = vadd.f32 %v2761_v5, %v1613_v3  ;;  %v1759_v49 = vmul.f32 %v1622_v27, %v1622_v27  ;;  %v1719_v59 = vsel %vm1172_vm7, %v1622_v27, 0.0 }
 0x24c   : > { %v2060_v46 = vpop.f32.mrf.mxu1 }
 0x24d   : > { %1656 = vst.msk [vmem:[%s2769_s24 + $0xe0] sm:$0xff] %vm1172_vm7, %v1614_v42  ;;  %v1715_v37 = vsel %vm1172_vm7, %v1614_v42, 0.0  ;;  %v1757_v30 = vmul.f32 %v1614_v42, %v1614_v42  ;;  %v1625_v47 = vadd.f32 %v2060_v46, %v2761_v5 }
 0x24e   : > { %v1616_v10 = vpop.f32.mrf.mxu1  ;;  %v1716_v57 = vadd.f32 %v1715_v37, %v1714_v48 }
 0x24f   : > { %v1816_v53 = vsel %vm1172_vm7, %v1757_v30, 0.0  ;;  %1659 = vst.msk [vmem:[%s2769_s24 + $0xf8] sm:$0xff] %vm1172_vm7, %v1625_v47  ;;  %v1617_v55 = vadd.f32 %v2761_v5, %v1616_v10  ;;  %v1760_v44 = vmul.f32 %v1625_v47, %v1625_v47  ;;  %v1820_v5 = vsel %vm1172_vm7, %v1759_v49, 0.0 }
 0x250   : > { %v1817_v50 = vadd.f32 %v1816_v53, %v1815_v32  ;;  %v1721_v60 = vsel %vm1172_vm7, %v1625_v47, 0.0 }
 0x251   : > { %1657 = vst.msk [vmem:[%s2769_s24 + $0xe8] sm:$0xff] %vm1172_vm7, %v1617_v55  ;;  %v1717_v22 = vsel %vm1172_vm7, %v1617_v55, 0.0  ;;  %v1758_v58 = vmul.f32 %v1617_v55, %v1617_v55  ;;  %v1822_v56 = vsel %vm1172_vm7, %v1760_v44, 0.0 }
 0x252   : > { %v1718_v43 = vadd.f32 %v1717_v22, %v1716_v57 }
 0x253   : > { %v1818_v52 = vsel %vm1172_vm7, %v1758_v58, 0.0 }
 0x254   : > { %v1720_v62 = vadd.f32 %v1719_v59, %v1718_v43  ;;  %v1819_v40 = vadd.f32 %v1818_v52, %v1817_v50 }
 0x256   : > { %v1722_v20 = vadd.f32 %v1721_v60, %v1720_v62  ;;  %v1821_v61 = vadd.f32 %v1820_v5, %v1819_v40 }
 0x258   : > { %v1723_v2 = vrot.slane %v1722_v20, 4  ;;  %v1823_v6 = vadd.f32 %v1822_v56, %v1821_v61 }
 0x25a   : > { %v1724_v54 = vadd.f32 %v1723_v2, %v1722_v20  ;;  %v1824_v38 = vrot.slane %v1823_v6, 4 }
 0x25c   : > { %v1725_v7 = vrot.slane %v1724_v54, 2  ;;  %v1825_v21 = vadd.f32 %v1824_v38, %v1823_v6 }
 0x25e   : > { %v1726_v8 = vadd.f32 %v1725_v7, %v1724_v54  ;;  %v1826_v9 = vrot.slane %v1825_v21, 2 }
 0x260   : > { %v1727_v4 = vrot.slane %v1726_v8, 1  ;;  %v1827_v11 = vadd.f32 %v1826_v9, %v1825_v21 }
 0x262   : > { %v1828_v13 = vrot.slane %v1827_v11, 1  ;;  %v1728_v14 = vadd.f32 %v1727_v4, %v1726_v8 }
 0x264   : > { %v1829_v15 = vadd.f32 %v1828_v13, %v1827_v11 }
 0x266   : > { %v1831_v17 = vsel %vm536_vm0, %v1728_v14, %v1829_v15 }
 0x267   : > { %1833 = vst.msk [vmem:[%s295_s27] sm:$0x3] %vm1832_vm15, %v1831_v17 }
 0x268 PF: > { %s17_s1 = sadd.s32 1, %s2127_s1   ;;  %s2975_s21 = smov %s2123_s22 }
 0x269   : > { %p14_p5 = scmp.ge.s32.totalorder %s17_s1, 4   ;;  %s2976_s22 = smov %s2978_s2 }
 0x26b   :  { %16 = sbr.rel (!%p14_p5) target bundleno = 2 (0x2), region = 85 }

</bundles_post_ra>
